<compile_context>
chip_gen: v7x
topology: tpu7x:2x2x1
jax: 0.10.0
libtpu: 0.0.40
codegen_flags: <defaults>
</compile_context>

<pallas_src>
import functools

import jax
import jax.numpy as jnp
from jax import lax
from jax.experimental import pallas as pl
from jax.experimental.pallas import tpu as pltpu

EXPANSION = 4
BN_EPS = 1e-5
LANE = 128                      # channel dims are zero-padded to a multiple of this


def _tpu_defaults():
    # v5e/v6e: 128 MiB VMEM -> bigger M tiles + higher scoped limit.
    # v7x (64 MiB/TC) or unknown: conservative numbers that fit everywhere.
    try:
        vmem_cap = pltpu.get_tpu_info().vmem_capacity_bytes
    except Exception:
        vmem_cap = 64 * 1024 * 1024
    if vmem_cap >= 100 * 1024 * 1024:
        return 512, 96 * 1024 * 1024
    return 256, 48 * 1024 * 1024


TM, VMEM_LIMIT_BYTES = _tpu_defaults()


# ------------------------------- small helpers ----------------------------------------

def _round_up(x, m):
    return (x + m - 1) // m * m


def _pick_tile(dim, candidates):
    for c in candidates:
        if dim % c == 0:
            return c
    return dim


def _pick_band(h, w):
    """Smallest divisor th of h with th*w >= 256 (keeps the MXU M-dim >= 256)."""
    target = max(1, -(-256 // w))
    for th in range(1, h + 1):
        if h % th == 0 and th >= target:
            return th
    return h


def _pad_mat(w, rows, cols):
    return jnp.pad(w, ((0, rows - w.shape[0]), (0, cols - w.shape[1])))


def _pad_vec(v, n):
    return jnp.pad(v, (0, n - v.shape[0]))


# ------------------------------- Pallas kernels ----------------------------------------

def _mm_bias_kernel(x_ref, w_ref, b_ref, o_ref, acc_ref, *, apply_relu):
    # Tiled matmul with K-reduction grid axis: acc += x @ w ; epilogue adds bias (+relu).
    k = pl.program_id(2)

    @pl.when(k == 0)
    def _():
        acc_ref[...] = jnp.zeros_like(acc_ref)

    acc_ref[...] += jnp.dot(x_ref[...], w_ref[...], preferred_element_type=jnp.float32)

    @pl.when(k == pl.num_programs(2) - 1)
    def _():
        out = acc_ref[...] + b_ref[...]
        if apply_relu:
            out = jnp.maximum(out, 0.0)
        o_ref[...] = out.astype(o_ref.dtype)


def _dual_mm_kernel(x_ref, w_ref, xs_ref, ws_ref, b_ref, o_ref):
    # Fused conv3 + shortcut conv: out = relu(x @ w + xs @ ws + bias).
    # w_ref / ws_ref / b_ref are resident (constant index_map) -> streamed from HBM once.
    acc = jnp.dot(x_ref[...], w_ref[...], preferred_element_type=jnp.float32)
    acc = acc + jnp.dot(xs_ref[...], ws_ref[...], preferred_element_type=jnp.float32)
    o_ref[...] = jnp.maximum(acc + b_ref[...], 0.0).astype(o_ref.dtype)


def _mm_bias_add_kernel(x_ref, w_ref, b_ref, r_ref, o_ref):
    # Identity-shortcut variant: out = relu(x @ w + bias + residual).
    acc = jnp.dot(x_ref[...], w_ref[...], preferred_element_type=jnp.float32)
    acc = acc + b_ref[...] + r_ref[...].astype(jnp.float32)
    o_ref[...] = jnp.maximum(acc, 0.0).astype(o_ref.dtype)


def _conv3x3_kernel(x_ref, w_ref, b_ref, o_ref, *, th, nb):
    # x_ref: (1, H, W, C) unpadded image, resident across the band axis (fetched once per n)
    # w_ref: (3, 3*C, Co) resident weight (kw/cin flattened, BN scale folded)
    # b_ref: (1, Co) resident bias
    # o_ref: (1, th, W, Co) output row-band
    hb = pl.program_id(1)
    H, W, C = x_ref.shape[1], x_ref.shape[2], x_ref.shape[3]
    Co = o_ref.shape[3]

    r0 = hb * th
    if th % 8 == 0:
        r0 = pl.multiple_of(r0, 8)

    # Build the spatially padded band as a value (in-kernel halo; no XLA jnp.pad pass).
    interior = x_ref[0, pl.ds(r0, th), :, :]                           # (th, W, C)
    top = x_ref[0, pl.ds(jnp.maximum(r0 - 1, 0), 1), :, :]             # (1,  W, C)
    bot = x_ref[0, pl.ds(jnp.minimum(r0 + th, H - 1), 1), :, :]        # (1,  W, C)
    zero_row = jnp.zeros_like(top)
    top = jnp.where(hb > 0, top, zero_row)
    bot = jnp.where(hb < nb - 1, bot, zero_row)
    band = jnp.concatenate([top, interior, bot], axis=0)               # (th+2, W, C)
    zero_col = jnp.zeros((th + 2, 1, C), band.dtype)
    band = jnp.concatenate([zero_col, band, zero_col], axis=1)         # (th+2, W+2, C)

    # Fused im2col: per kh, concat the 3 kw-shifted patches on the lane axis and do one
    # (th*W, 3C) x (3C, Co) MXU dot (3 deep dots instead of 9 shallow ones).
    acc = jnp.zeros((th * W, Co), jnp.float32)
    for dh in range(3):
        rows = band[dh:dh + th]                                        # (th, W+2, C)
        patch = jnp.concatenate(
            [rows[:, 0:W, :], rows[:, 1:W + 1, :], rows[:, 2:W + 2, :]], axis=-1)
        acc = acc + jnp.dot(patch.reshape(th * W, 3 * C), w_ref[dh],
                            preferred_element_type=jnp.float32)

    out = jnp.maximum(acc + b_ref[...], 0.0)
    o_ref[0] = out.reshape(th, W, Co).astype(o_ref.dtype)


# ------------------------------- kernel wrappers ----------------------------------------

def matmul_bias(x2d, w2d, bias, *, relu, out_dtype):
    M, K = x2d.shape
    Kw, Nc = w2d.shape
    assert K == Kw and K % LANE == 0 and Nc % LANE == 0
    tm = TM if M >= TM else M
    tn = _pick_tile(Nc, (256, 128))
    tk = _pick_tile(K, (512, 256, 128))
    return pl.pallas_call(
        functools.partial(_mm_bias_kernel, apply_relu=relu),
        out_shape=jax.ShapeDtypeStruct((M, Nc), out_dtype),
        grid=(pl.cdiv(M, tm), Nc // tn, K // tk),
        in_specs=[
            pl.BlockSpec((tm, tk), lambda i, j, k: (i, k)),
            pl.BlockSpec((tk, tn), lambda i, j, k: (k, j)),
            pl.BlockSpec((1, tn), lambda i, j, k: (0, j)),
        ],
        out_specs=pl.BlockSpec((tm, tn), lambda i, j, k: (i, j)),
        scratch_shapes=[pltpu.VMEM((tm, tn), jnp.float32)],
        compiler_params=pltpu.CompilerParams(
            dimension_semantics=("parallel", "parallel", "arbitrary"),
            vmem_limit_bytes=VMEM_LIMIT_BYTES),
    )(x2d, w2d, bias.reshape(1, Nc))


def dual_matmul_bias_relu(x2d, w2d, xs2d, ws2d, bias, *, out_dtype):
    M, K1 = x2d.shape
    K1w, Co = w2d.shape
    Ms, K2 = xs2d.shape
    assert Ms == M and K1 == K1w and ws2d.shape == (K2, Co)
    tm = TM if M >= TM else M
    return pl.pallas_call(
        _dual_mm_kernel,
        out_shape=jax.ShapeDtypeStruct((M, Co), out_dtype),
        grid=(pl.cdiv(M, tm),),
        in_specs=[
            pl.BlockSpec((tm, K1), lambda i: (i, 0)),
            pl.BlockSpec((K1, Co), lambda i: (0, 0)),     # resident weight
            pl.BlockSpec((tm, K2), lambda i: (i, 0)),
            pl.BlockSpec((K2, Co), lambda i: (0, 0)),     # resident weight
            pl.BlockSpec((1, Co), lambda i: (0, 0)),      # resident bias
        ],
        out_specs=pl.BlockSpec((tm, Co), lambda i: (i, 0)),
        compiler_params=pltpu.CompilerParams(
            dimension_semantics=("parallel",),
            vmem_limit_bytes=VMEM_LIMIT_BYTES),
    )(x2d, w2d, xs2d, ws2d, bias.reshape(1, Co))


def matmul_bias_add_relu(x2d, w2d, bias, res2d, *, out_dtype):
    M, K = x2d.shape
    Kw, Co = w2d.shape
    assert K == Kw and res2d.shape == (M, Co)
    tm = TM if M >= TM else M
    return pl.pallas_call(
        _mm_bias_add_kernel,
        out_shape=jax.ShapeDtypeStruct((M, Co), out_dtype),
        grid=(pl.cdiv(M, tm),),
        in_specs=[
            pl.BlockSpec((tm, K), lambda i: (i, 0)),
            pl.BlockSpec((K, Co), lambda i: (0, 0)),      # resident weight
            pl.BlockSpec((1, Co), lambda i: (0, 0)),      # resident bias
            pl.BlockSpec((tm, Co), lambda i: (i, 0)),
        ],
        out_specs=pl.BlockSpec((tm, Co), lambda i: (i, 0)),
        compiler_params=pltpu.CompilerParams(
            dimension_semantics=("parallel",),
            vmem_limit_bytes=VMEM_LIMIT_BYTES),
    )(x2d, w2d, bias.reshape(1, Co), res2d)


def conv3x3_bias_relu_s1(x_nhwc, w3r, bias, *, out_dtype):
    # x_nhwc: (N, H, W, C) spatially UNPADDED (halo built in-kernel), lane-padded C, bf16.
    # w3r:    (3, 3*C, Co) weight with BN scale folded.  stride == 1 only.
    N, H, W, C = x_nhwc.shape
    Co = w3r.shape[2]
    th = _pick_band(H, W)
    nb = H // th
    kernel = functools.partial(_conv3x3_kernel, th=th, nb=nb)
    return pl.pallas_call(
        kernel,
        out_shape=jax.ShapeDtypeStruct((N, H, W, Co), out_dtype),
        grid=(N, nb),
        in_specs=[
            pl.BlockSpec((1, H, W, C), lambda n, hb: (n, 0, 0, 0)),   # image: 1 fetch per n
            pl.BlockSpec((3, 3 * C, Co), lambda n, hb: (0, 0, 0)),    # resident weight
            pl.BlockSpec((1, Co), lambda n, hb: (0, 0)),              # resident bias
        ],
        out_specs=pl.BlockSpec((1, th, W, Co), lambda n, hb: (n, hb, 0, 0)),
        compiler_params=pltpu.CompilerParams(
            dimension_semantics=("parallel", "parallel"),
            vmem_limit_bytes=VMEM_LIMIT_BYTES),
    )(x_nhwc, w3r, bias.reshape(1, Co))


# ------------------------------- glue (plain JAX) ---------------------------------------

def fold_bn(gamma, beta, mean, var):
    scale = gamma / jnp.sqrt(var + BN_EPS)
    bias = beta - mean * scale
    return scale.astype(jnp.float32), bias.astype(jnp.float32)


def w1x1_to_2d(w_oihw):
    # (Cout, Cin, 1, 1) -> (Cin, Cout)
    return jnp.transpose(w_oihw[:, :, 0, 0], (1, 0))


def im2col_3x3(x_nhwc, stride):
    """Fallback (stride>1 only): 3x3 patches, pad=1; K ordering = (kh, kw, Cin)."""
    N, H, W, C = x_nhwc.shape
    xp = jnp.pad(x_nhwc, ((0, 0), (1, 1), (1, 1), (0, 0)))
    Ho = (H + 2 - 3) // stride + 1
    Wo = (W + 2 - 3) // stride + 1
    patches = []
    for dh in range(3):
        for dw in range(3):
            patches.append(xp[:, dh:dh + stride * Ho:stride, dw:dw + stride * Wo:stride, :])
    cols = jnp.concatenate(patches, axis=-1)
    return cols.reshape(N * Ho * Wo, 9 * C), (N, Ho, Wo)


@functools.partial(jax.jit, static_argnames=("stride",))
def sparse_bottleneck_forward(x_nchw, p, *, stride=1):
    # bf16 BEFORE the layout transpose (halves the boundary HBM traffic).
    x = jnp.transpose(x_nchw.astype(jnp.bfloat16), (0, 2, 3, 1))      # NHWC bf16
    N, H, W, Cin = x.shape
    planes = p['w1'].shape[0]
    cout = EXPANSION * planes
    Ho = (H + 2 - 3) // stride + 1
    Wo = (W + 2 - 3) // stride + 1

    cin_p, pln_p, co_p = (_round_up(c, LANE) for c in (Cin, planes, cout))

    # lane-pad channels (channels live on the lane axis -> unmasked, lane-dense stores)
    x_p = jnp.pad(x, ((0, 0), (0, 0), (0, 0), (0, cin_p - Cin)))

    # fold BN into (scale, bias); fold scale into the conv weight columns
    s1, b1 = fold_bn(*p['bn1'])
    s2, b2 = fold_bn(*p['bn2'])
    s3, b3 = fold_bn(*p['bn3'])

    w1 = _pad_mat(w1x1_to_2d(p['w1']) * s1[None, :], cin_p, pln_p).astype(jnp.bfloat16)
    b1p = _pad_vec(b1, pln_p)

    w2_4d = jnp.transpose(p['w2'], (2, 3, 1, 0)) * s2[None, None, None, :]   # (kh,kw,Ci,Co)
    w2_4d = jnp.pad(w2_4d, ((0, 0), (0, 0), (0, pln_p - planes),
                            (0, pln_p - planes))).astype(jnp.bfloat16)
    b2p = _pad_vec(b2, pln_p)

    w3 = _pad_mat(w1x1_to_2d(p['w3']) * s3[None, :], pln_p, co_p).astype(jnp.bfloat16)
    b3p = _pad_vec(b3, co_p)

    # ---- conv1 (1x1) + bn1 + relu : tiled matmul ----
    out1 = matmul_bias(x_p.reshape(N * H * W, cin_p), w1, b1p,
                       relu=True, out_dtype=jnp.bfloat16).reshape(N, H, W, pln_p)

    # ---- conv2 (3x3, stride, pad=1) + bn2 + relu ----
    if stride == 1:
        out2 = conv3x3_bias_relu_s1(out1, w2_4d.reshape(3, 3 * pln_p, pln_p), b2p,
                                    out_dtype=jnp.bfloat16)
    else:
        # TODO(synk): stride>1 3x3 (stage-boundary blocks) still uses host-side im2col;
        #             an in-kernel strided band path would remove the 9x HBM blow-up.
        cols, _ = im2col_3x3(out1, stride)
        out2 = matmul_bias(cols, w2_4d.reshape(9 * pln_p, pln_p), b2p,
                           relu=True, out_dtype=jnp.bfloat16).reshape(N, Ho, Wo, pln_p)

    x2_2d = out2.reshape(N * Ho * Wo, pln_p)

    # ---- conv3 (1x1) + bn3 + shortcut + add + relu : fully fused ----
    if (stride != 1) or (Cin != cout):
        s_sc, b_sc = fold_bn(*p['bn_sc'])
        wsc = _pad_mat(w1x1_to_2d(p['w_sc']) * s_sc[None, :], cin_p, co_p).astype(jnp.bfloat16)
        bias_tot = b3p + _pad_vec(b_sc, co_p)
        xs = x_p if stride == 1 else x_p[:, ::stride, ::stride, :]
        out3 = dual_matmul_bias_relu(x2_2d, w3, xs.reshape(N * Ho * Wo, cin_p), wsc,
                                     bias_tot, out_dtype=jnp.float32)
    else:
        out3 = matmul_bias_add_relu(x2_2d, w3, b3p, x_p.reshape(N * H * W, cin_p),
                                    out_dtype=jnp.float32)

    out = out3[:, :cout].reshape(N, Ho, Wo, cout)
    return jnp.transpose(out, (0, 3, 1, 2))                           # back to NCHW


# ------------------------------- parameter init -----------------------------------------

def init_params(key, in_planes, planes):
    ks = jax.random.split(key, 8)

    def conv_w(k, cout, cin, kh, kw):
        fan_in = cin * kh * kw
        return jax.random.normal(k, (cout, cin, kh, kw), jnp.float32) / jnp.sqrt(fan_in)

    def bn_params(k, c):
        k1, k2, k3, k4 = jax.random.split(k, 4)
        gamma = 1.0 + 0.1 * jax.random.normal(k1, (c,), jnp.float32)
        beta = 0.1 * jax.random.normal(k2, (c,), jnp.float32)
        mean = 0.1 * jax.random.normal(k3, (c,), jnp.float32)
        var = 0.5 + 0.1 * jnp.abs(jax.random.normal(k4, (c,), jnp.float32))
        return (gamma, beta, mean, var)

    out_planes = EXPANSION * planes
    return {
        'w1': conv_w(ks[0], planes, in_planes, 1, 1),
        'bn1': bn_params(ks[1], planes),
        'w2': conv_w(ks[2], planes, planes, 3, 3),
        'bn2': bn_params(ks[3], planes),
        'w3': conv_w(ks[4], out_planes, planes, 1, 1),
        'bn3': bn_params(ks[5], out_planes),
        'w_sc': conv_w(ks[6], out_planes, in_planes, 1, 1),
        'bn_sc': bn_params(ks[7], out_planes),
    }


# ------------------------------- pure-JAX reference -------------------------------------

def ref_forward(x, p, stride):
    def conv(z, w, s=1, pad=0):
        return lax.conv_general_dilated(
            z, w, (s, s), [(pad, pad), (pad, pad)],
            dimension_numbers=('NCHW', 'OIHW', 'NCHW'))

    def bn(z, gamma, beta, mean, var):
        s = gamma / jnp.sqrt(var + BN_EPS)
        return z * s[None, :, None, None] + (beta - mean * s)[None, :, None, None]

    in_planes = x.shape[1]
    cout = p['w3'].shape[0]
    out = jax.nn.relu(bn(conv(x, p['w1']), *p['bn1']))
    out = jax.nn.relu(bn(conv(out, p['w2'], stride, 1), *p['bn2']))
    out = bn(conv(out, p['w3']), *p['bn3'])
    if stride != 1 or in_planes != cout:
        sc = bn(conv(x, p['w_sc'], stride, 0), *p['bn_sc'])
    else:
        sc = x
    return jax.nn.relu(out + sc)


# ------------------------------------ main -----------------------------------------------

if __name__ == "__main__":
    key = jax.random.PRNGKey(0)
    configs = [
        # (N, in_planes, planes, H, W, stride)
        (2, 4, 4, 16, 16, 1),     # projection shortcut (Cin != expansion*planes)
        (2, 16, 4, 16, 16, 1),    # identity shortcut
        (2, 4, 4, 16, 16, 2),     # strided block (projection shortcut, im2col fallback)
    ]
    for idx, (N, in_planes, planes, H, W, stride) in enumerate(configs):
        k_x, k_p = jax.random.split(jax.random.fold_in(key, idx))
        x = jax.random.normal(k_x, (N, in_planes, H, W), jnp.float32)
        params = init_params(k_p, in_planes, planes)

        out = jax.block_until_ready(sparse_bottleneck_forward(x, params, stride=stride))
        ref = jax.block_until_ready(ref_forward(x, params, stride))

        Ho = (H + 2 - 3) // stride + 1
        assert out.shape == (N, EXPANSION * planes, Ho, Ho), out.shape
        max_err = float(jnp.max(jnp.abs(out - ref)))
        # bf16 MXU inputs => looser tolerance vs the f32 reference.
        assert jnp.allclose(out, ref, atol=1e-1, rtol=5e-2), \
            f"config {idx} mismatch: max_err={max_err}"
    print("KERNEL_OK")
</pallas_src>

<mosaic_0001>
module attributes {stable_mosaic.version = 11 : i64} {
  func.func @_mm_bias_kernel(%arg0: i32, %arg1: i32, %arg2: i32, %arg3: memref<256x128xbf16, #tpu.memory_space<vmem>>, %arg4: memref<128x128xbf16, #tpu.memory_space<vmem>>, %arg5: memref<1x128xf32, #tpu.memory_space<vmem>>, %arg6: memref<256x128xbf16, #tpu.memory_space<vmem>>, %arg7: memref<256x128xf32, #tpu.memory_space<vmem>>) attributes {dimension_semantics = [#tpu.dimension_semantics<parallel>, #tpu.dimension_semantics<parallel>, #tpu.dimension_semantics<arbitrary>], iteration_bounds = array<i64: 2, 1, 1>, scalar_prefetch = 0 : i64, scratch_operands = 1 : i64, tpu.core_type = #tpu.core_type<tc>, window_params = [{transform_indices = @transform_0, window_bounds = array<i64: 256, 128>}, {transform_indices = @transform_1, window_bounds = array<i64: 128, 128>}, {transform_indices = @transform_2, window_bounds = array<i64: 1, 128>}, {transform_indices = @transform_3, window_bounds = array<i64: 256, 128>}]} {
    %c0_i32 = arith.constant 0 : i32
    %0 = arith.cmpi eq, %arg2, %c0_i32 : i32
    %1 = arith.extui %0 : i1 to i32
    %c0_i32_0 = arith.constant 0 : i32
    %2 = arith.cmpi ne, %1, %c0_i32_0 : i32
    scf.if %2 {
      %cst_10 = arith.constant 0.000000e+00 : f32
      %12 = vector.broadcast %cst_10 : f32 to vector<256x128xf32>
      %c0_11 = arith.constant 0 : index
      %c0_12 = arith.constant 0 : index
      %13 = vector.load %arg7[%c0_11, %c0_12] : memref<256x128xf32, #tpu.memory_space<vmem>>, vector<256x128xf32>
      tpu.vector_store %arg7[%c0_11, %c0_12], %12 {strides = array<i32>} : memref<256x128xf32, #tpu.memory_space<vmem>>, vector<256x128xf32>,
    } else {
    }
    %c0 = arith.constant 0 : index
    %c0_1 = arith.constant 0 : index
    %3 = vector.load %arg7[%c0, %c0_1] : memref<256x128xf32, #tpu.memory_space<vmem>>, vector<256x128xf32>
    %c0_2 = arith.constant 0 : index
    %c0_3 = arith.constant 0 : index
    %4 = vector.load %arg3[%c0_2, %c0_3] : memref<256x128xbf16, #tpu.memory_space<vmem>>, vector<256x128xbf16>
    %c0_4 = arith.constant 0 : index
    %c0_5 = arith.constant 0 : index
    %5 = vector.load %arg4[%c0_4, %c0_5] : memref<128x128xbf16, #tpu.memory_space<vmem>>, vector<128x128xbf16>
    %cst = arith.constant dense<0.000000e+00> : vector<256x128xf32>
    %6 = tpu.matmul %4, %5, %cst {dimension_numbers = #tpu.dot_dimension_numbers<[1], [0], [0], [1], [0, 0, 1, 1], [], []>} : vector<256x128xbf16>, vector<128x128xbf16>, vector<256x128xf32> -> vector<256x128xf32>
    %7 = arith.addf %3, %6 : vector<256x128xf32>
    %c0_6 = arith.constant 0 : index
    %c0_7 = arith.constant 0 : index
    %8 = vector.load %arg7[%c0_6, %c0_7] : memref<256x128xf32, #tpu.memory_space<vmem>>, vector<256x128xf32>
    tpu.vector_store %arg7[%c0_6, %c0_7], %7 {strides = array<i32>} : memref<256x128xf32, #tpu.memory_space<vmem>>, vector<256x128xf32>,
    %c0_i32_8 = arith.constant 0 : i32
    %9 = arith.cmpi eq, %arg2, %c0_i32_8 : i32
    %10 = arith.extui %9 : i1 to i32
    %c0_i32_9 = arith.constant 0 : i32
    %11 = arith.cmpi ne, %10, %c0_i32_9 : i32
    scf.if %11 {
      %c0_10 = arith.constant 0 : index
      %c0_11 = arith.constant 0 : index
      %12 = vector.load %arg7[%c0_10, %c0_11] : memref<256x128xf32, #tpu.memory_space<vmem>>, vector<256x128xf32>
      %c0_12 = arith.constant 0 : index
      %c0_13 = arith.constant 0 : index
      %13 = vector.load %arg5[%c0_12, %c0_13] : memref<1x128xf32, #tpu.memory_space<vmem>>, vector<1x128xf32>
      %14 = vector.broadcast %13 : vector<1x128xf32> to vector<256x128xf32>
      %15 = arith.addf %12, %14 : vector<256x128xf32>
      %cst_14 = arith.constant 0.000000e+00 : f32
      %16 = vector.broadcast %cst_14 : f32 to vector<256x128xf32>
      %17 = arith.maximumf %15, %16 : vector<256x128xf32>
      %18 = arith.truncf %17 : vector<256x128xf32> to vector<256x128xbf16>
      %c0_15 = arith.constant 0 : index
      %c0_16 = arith.constant 0 : index
      %19 = vector.load %arg6[%c0_15, %c0_16] : memref<256x128xbf16, #tpu.memory_space<vmem>>, vector<256x128xbf16>
      tpu.vector_store %arg6[%c0_15, %c0_16], %18 {strides = array<i32>} : memref<256x128xbf16, #tpu.memory_space<vmem>>, vector<256x128xbf16>,
    } else {
    }
    return
  }
  func.func @transform_0(%arg0: i32, %arg1: i32, %arg2: i32) -> (i32, i32) {
    %c0_i32 = arith.constant 0 : i32
    return %arg0, %arg2 : i32, i32
  }
  func.func @transform_1(%arg0: i32, %arg1: i32, %arg2: i32) -> (i32, i32) {
    %c0_i32 = arith.constant 0 : i32
    return %arg2, %arg1 : i32, i32
  }
  func.func @transform_2(%arg0: i32, %arg1: i32, %arg2: i32) -> (i32, i32) {
    %c0_i32 = arith.constant 0 : i32
    %c0_i32_0 = arith.constant 0 : i32
    return %c0_i32, %arg1 : i32, i32
  }
  func.func @transform_3(%arg0: i32, %arg1: i32, %arg2: i32) -> (i32, i32) {
    %c0_i32 = arith.constant 0 : i32
    return %arg0, %arg1 : i32, i32
  }
}

module attributes {stable_mosaic.version = 11 : i64} {
  func.func @_conv3x3_kernel(%arg0: i32, %arg1: i32, %arg2: memref<1x16x16x128xbf16, #tpu.memory_space<vmem>>, %arg3: memref<3x384x128xbf16, #tpu.memory_space<vmem>>, %arg4: memref<1x128xf32, #tpu.memory_space<vmem>>, %arg5: memref<1x16x16x128xbf16, #tpu.memory_space<vmem>>) attributes {dimension_semantics = [#tpu.dimension_semantics<parallel>, #tpu.dimension_semantics<parallel>], iteration_bounds = array<i64: 2, 1>, scalar_prefetch = 0 : i64, scratch_operands = 0 : i64, tpu.core_type = #tpu.core_type<tc>, window_params = [{transform_indices = @transform_0, window_bounds = array<i64: 1, 16, 16, 128>}, {pipeline_mode = #tpu.pipeline_mode<synchronous>, transform_indices = @transform_1, window_bounds = array<i64: 3, 384, 128>}, {pipeline_mode = #tpu.pipeline_mode<synchronous>, transform_indices = @transform_2, window_bounds = array<i64: 1, 128>}, {transform_indices = @transform_3, window_bounds = array<i64: 1, 16, 16, 128>}]} {
    %c16_i32 = arith.constant 16 : i32
    %0 = arith.muli %arg1, %c16_i32 : i32
    %1 = tpu.assume_multiple %0, 8 : i32
    %c0 = arith.constant 0 : index
    %2 = arith.index_cast %1 : i32 to index
    %c0_0 = arith.constant 0 : index
    %c0_1 = arith.constant 0 : index
    %3 = vector.load %arg2[%c0, %2, %c0_0, %c0_1] : memref<1x16x16x128xbf16, #tpu.memory_space<vmem>>, vector<1x16x16x128xbf16>
    %4 = vector.shape_cast %3 : vector<1x16x16x128xbf16> to vector<16x16x128xbf16>
    %c1_i32 = arith.constant 1 : i32
    %5 = arith.subi %1, %c1_i32 : i32
    %c0_i32 = arith.constant 0 : i32
    %6 = arith.maxsi %5, %c0_i32 : i32
    %c0_2 = arith.constant 0 : index
    %7 = arith.index_cast %6 : i32 to index
    %c0_3 = arith.constant 0 : index
    %c0_4 = arith.constant 0 : index
    %8 = vector.load %arg2[%c0_2, %7, %c0_3, %c0_4] : memref<1x16x16x128xbf16, #tpu.memory_space<vmem>>, vector<1x1x16x128xbf16>
    %9 = vector.shape_cast %8 : vector<1x1x16x128xbf16> to vector<1x16x128xbf16>
    %c16_i32_5 = arith.constant 16 : i32
    %10 = arith.addi %1, %c16_i32_5 : i32
    %c15_i32 = arith.constant 15 : i32
    %11 = arith.minsi %10, %c15_i32 : i32
    %c0_6 = arith.constant 0 : index
    %12 = arith.index_cast %11 : i32 to index
    %c0_7 = arith.constant 0 : index
    %c0_8 = arith.constant 0 : index
    %13 = vector.load %arg2[%c0_6, %12, %c0_7, %c0_8] : memref<1x16x16x128xbf16, #tpu.memory_space<vmem>>, vector<1x1x16x128xbf16>
    %14 = vector.shape_cast %13 : vector<1x1x16x128xbf16> to vector<1x16x128xbf16>
    %cst = arith.constant 0.000000e+00 : bf16
    %15 = vector.broadcast %cst : bf16 to vector<1x16x128xbf16>
    %c0_i32_9 = arith.constant 0 : i32
    %16 = arith.cmpi sgt, %arg1, %c0_i32_9 : i32
    %17 = arith.select %16, %9, %15 : vector<1x16x128xbf16>
    %c0_i32_10 = arith.constant 0 : i32
    %18 = arith.cmpi slt, %arg1, %c0_i32_10 : i32
    %19 = arith.select %18, %14, %15 : vector<1x16x128xbf16>
    %20 = tpu.concatenate %17, %4, %19 in 0 : vector<1x16x128xbf16>, vector<16x16x128xbf16>, vector<1x16x128xbf16> -> vector<18x16x128xbf16>
    %cst_11 = arith.constant 0.000000e+00 : bf16
    %21 = vector.broadcast %cst_11 : bf16 to vector<18x1x128xbf16>
    %22 = tpu.concatenate %21, %20, %21 in 1 : vector<18x1x128xbf16>, vector<18x16x128xbf16>, vector<18x1x128xbf16> -> vector<18x18x128xbf16>
    %cst_12 = arith.constant 0.000000e+00 : f32
    %23 = vector.broadcast %cst_12 : f32 to vector<256x128xf32>
    %24 = vector.extract_strided_slice %22 {offsets = [0, 0, 0], sizes = [16, 18, 128], strides = [1, 1, 1]} : vector<18x18x128xbf16> to vector<16x18x128xbf16>
    %25 = vector.extract_strided_slice %24 {offsets = [0, 0, 0], sizes = [16, 16, 128], strides = [1, 1, 1]} : vector<16x18x128xbf16> to vector<16x16x128xbf16>
    %26 = vector.extract_strided_slice %24 {offsets = [0, 1, 0], sizes = [16, 16, 128], strides = [1, 1, 1]} : vector<16x18x128xbf16> to vector<16x16x128xbf16>
    %27 = vector.extract_strided_slice %24 {offsets = [0, 2, 0], sizes = [16, 16, 128], strides = [1, 1, 1]} : vector<16x18x128xbf16> to vector<16x16x128xbf16>
    %28 = tpu.concatenate %25, %26, %27 in 2 : vector<16x16x128xbf16>, vector<16x16x128xbf16>, vector<16x16x128xbf16> -> vector<16x16x384xbf16>
    %29 = vector.shape_cast %28 : vector<16x16x384xbf16> to vector<256x384xbf16>
    %c0_13 = arith.constant 0 : index
    %c0_14 = arith.constant 0 : index
    %c0_15 = arith.constant 0 : index
    %30 = vector.load %arg3[%c0_13, %c0_14, %c0_15] : memref<3x384x128xbf16, #tpu.memory_space<vmem>>, vector<1x384x128xbf16>
    %31 = vector.shape_cast %30 : vector<1x384x128xbf16> to vector<384x128xbf16>
    %cst_16 = arith.constant dense<0.000000e+00> : vector<256x128xf32>
    %32 = tpu.matmul %29, %31, %cst_16 {dimension_numbers = #tpu.dot_dimension_numbers<[1], [0], [0], [1], [0, 0, 1, 1], [], []>} : vector<256x384xbf16>, vector<384x128xbf16>, vector<256x128xf32> -> vector<256x128xf32>
    %33 = arith.addf %23, %32 : vector<256x128xf32>
    %34 = vector.extract_strided_slice %22 {offsets = [1, 0, 0], sizes = [16, 18, 128], strides = [1, 1, 1]} : vector<18x18x128xbf16> to vector<16x18x128xbf16>
    %35 = vector.extract_strided_slice %34 {offsets = [0, 0, 0], sizes = [16, 16, 128], strides = [1, 1, 1]} : vector<16x18x128xbf16> to vector<16x16x128xbf16>
    %36 = vector.extract_strided_slice %34 {offsets = [0, 1, 0], sizes = [16, 16, 128], strides = [1, 1, 1]} : vector<16x18x128xbf16> to vector<16x16x128xbf16>
    %37 = vector.extract_strided_slice %34 {offsets = [0, 2, 0], sizes = [16, 16, 128], strides = [1, 1, 1]} : vector<16x18x128xbf16> to vector<16x16x128xbf16>
    %38 = tpu.concatenate %35, %36, %37 in 2 : vector<16x16x128xbf16>, vector<16x16x128xbf16>, vector<16x16x128xbf16> -> vector<16x16x384xbf16>
    %39 = vector.shape_cast %38 : vector<16x16x384xbf16> to vector<256x384xbf16>
    %c1 = arith.constant 1 : index
    %c0_17 = arith.constant 0 : index
    %c0_18 = arith.constant 0 : index
    %40 = vector.load %arg3[%c1, %c0_17, %c0_18] : memref<3x384x128xbf16, #tpu.memory_space<vmem>>, vector<1x384x128xbf16>
    %41 = vector.shape_cast %40 : vector<1x384x128xbf16> to vector<384x128xbf16>
    %cst_19 = arith.constant dense<0.000000e+00> : vector<256x128xf32>
    %42 = tpu.matmul %39, %41, %cst_19 {dimension_numbers = #tpu.dot_dimension_numbers<[1], [0], [0], [1], [0, 0, 1, 1], [], []>} : vector<256x384xbf16>, vector<384x128xbf16>, vector<256x128xf32> -> vector<256x128xf32>
    %43 = arith.addf %33, %42 : vector<256x128xf32>
    %44 = vector.extract_strided_slice %22 {offsets = [2, 0, 0], sizes = [16, 18, 128], strides = [1, 1, 1]} : vector<18x18x128xbf16> to vector<16x18x128xbf16>
    %45 = vector.extract_strided_slice %44 {offsets = [0, 0, 0], sizes = [16, 16, 128], strides = [1, 1, 1]} : vector<16x18x128xbf16> to vector<16x16x128xbf16>
    %46 = vector.extract_strided_slice %44 {offsets = [0, 1, 0], sizes = [16, 16, 128], strides = [1, 1, 1]} : vector<16x18x128xbf16> to vector<16x16x128xbf16>
    %47 = vector.extract_strided_slice %44 {offsets = [0, 2, 0], sizes = [16, 16, 128], strides = [1, 1, 1]} : vector<16x18x128xbf16> to vector<16x16x128xbf16>
    %48 = tpu.concatenate %45, %46, %47 in 2 : vector<16x16x128xbf16>, vector<16x16x128xbf16>, vector<16x16x128xbf16> -> vector<16x16x384xbf16>
    %49 = vector.shape_cast %48 : vector<16x16x384xbf16> to vector<256x384xbf16>
    %c2 = arith.constant 2 : index
    %c0_20 = arith.constant 0 : index
    %c0_21 = arith.constant 0 : index
    %50 = vector.load %arg3[%c2, %c0_20, %c0_21] : memref<3x384x128xbf16, #tpu.memory_space<vmem>>, vector<1x384x128xbf16>
    %51 = vector.shape_cast %50 : vector<1x384x128xbf16> to vector<384x128xbf16>
    %cst_22 = arith.constant dense<0.000000e+00> : vector<256x128xf32>
    %52 = tpu.matmul %49, %51, %cst_22 {dimension_numbers = #tpu.dot_dimension_numbers<[1], [0], [0], [1], [0, 0, 1, 1], [], []>} : vector<256x384xbf16>, vector<384x128xbf16>, vector<256x128xf32> -> vector<256x128xf32>
    %53 = arith.addf %43, %52 : vector<256x128xf32>
    %c0_23 = arith.constant 0 : index
    %c0_24 = arith.constant 0 : index
    %54 = vector.load %arg4[%c0_23, %c0_24] : memref<1x128xf32, #tpu.memory_space<vmem>>, vector<1x128xf32>
    %55 = vector.broadcast %54 : vector<1x128xf32> to vector<256x128xf32>
    %56 = arith.addf %53, %55 : vector<256x128xf32>
    %cst_25 = arith.constant 0.000000e+00 : f32
    %57 = vector.broadcast %cst_25 : f32 to vector<256x128xf32>
    %58 = arith.maximumf %56, %57 : vector<256x128xf32>
    %59 = vector.shape_cast %58 : vector<256x128xf32> to vector<16x16x128xf32>
    %60 = arith.truncf %59 : vector<16x16x128xf32> to vector<16x16x128xbf16>
    %c0_26 = arith.constant 0 : index
    %c0_27 = arith.constant 0 : index
    %c0_28 = arith.constant 0 : index
    %c0_29 = arith.constant 0 : index
    %61 = vector.load %arg5[%c0_26, %c0_27, %c0_28, %c0_29] : memref<1x16x16x128xbf16, #tpu.memory_space<vmem>>, vector<1x16x16x128xbf16>
    %62 = vector.shape_cast %61 : vector<1x16x16x128xbf16> to vector<16x16x128xbf16>
    %63 = vector.shape_cast %60 : vector<16x16x128xbf16> to vector<1x16x16x128xbf16>
    tpu.vector_store %arg5[%c0_26, %c0_27, %c0_28, %c0_29], %63 {strides = array<i32>} : memref<1x16x16x128xbf16, #tpu.memory_space<vmem>>, vector<1x16x16x128xbf16>,
    return
  }
  func.func @transform_0(%arg0: i32, %arg1: i32) -> (i32, i32, i32, i32) {
    %c0_i32 = arith.constant 0 : i32
    %c0_i32_0 = arith.constant 0 : i32
    %c0_i32_1 = arith.constant 0 : i32
    %c0_i32_2 = arith.constant 0 : i32
    return %arg0, %c0_i32, %c0_i32_0, %c0_i32_1 : i32, i32, i32, i32
  }
  func.func @transform_1(%arg0: i32, %arg1: i32) -> (i32, i32, i32) {
    %c0_i32 = arith.constant 0 : i32
    %c0_i32_0 = arith.constant 0 : i32
    %c0_i32_1 = arith.constant 0 : i32
    %c0_i32_2 = arith.constant 0 : i32
    return %c0_i32, %c0_i32_0, %c0_i32_1 : i32, i32, i32
  }
  func.func @transform_2(%arg0: i32, %arg1: i32) -> (i32, i32) {
    %c0_i32 = arith.constant 0 : i32
    %c0_i32_0 = arith.constant 0 : i32
    %c0_i32_1 = arith.constant 0 : i32
    return %c0_i32, %c0_i32_0 : i32, i32
  }
  func.func @transform_3(%arg0: i32, %arg1: i32) -> (i32, i32, i32, i32) {
    %c0_i32 = arith.constant 0 : i32
    %c0_i32_0 = arith.constant 0 : i32
    %c0_i32_1 = arith.constant 0 : i32
    return %arg0, %arg1, %c0_i32, %c0_i32_0 : i32, i32, i32, i32
  }
}

module attributes {stable_mosaic.version = 11 : i64} {
  func.func @_dual_mm_kernel(%arg0: i32, %arg1: memref<256x128xbf16, #tpu.memory_space<vmem>>, %arg2: memref<128x128xbf16, #tpu.memory_space<vmem>>, %arg3: memref<256x128xbf16, #tpu.memory_space<vmem>>, %arg4: memref<128x128xbf16, #tpu.memory_space<vmem>>, %arg5: memref<1x128xf32, #tpu.memory_space<vmem>>, %arg6: memref<256x128xf32, #tpu.memory_space<vmem>>) attributes {dimension_semantics = [#tpu.dimension_semantics<parallel>], iteration_bounds = array<i64: 2>, scalar_prefetch = 0 : i64, scratch_operands = 0 : i64, tpu.core_type = #tpu.core_type<tc>, window_params = [{transform_indices = @transform_0, window_bounds = array<i64: 256, 128>}, {pipeline_mode = #tpu.pipeline_mode<synchronous>, transform_indices = @transform_1, window_bounds = array<i64: 128, 128>}, {transform_indices = @transform_2, window_bounds = array<i64: 256, 128>}, {pipeline_mode = #tpu.pipeline_mode<synchronous>, transform_indices = @transform_3, window_bounds = array<i64: 128, 128>}, {pipeline_mode = #tpu.pipeline_mode<synchronous>, transform_indices = @transform_4, window_bounds = array<i64: 1, 128>}, {transform_indices = @transform_5, window_bounds = array<i64: 256, 128>}]} {
    %c0 = arith.constant 0 : index
    %c0_0 = arith.constant 0 : index
    %0 = vector.load %arg1[%c0, %c0_0] : memref<256x128xbf16, #tpu.memory_space<vmem>>, vector<256x128xbf16>
    %c0_1 = arith.constant 0 : index
    %c0_2 = arith.constant 0 : index
    %1 = vector.load %arg2[%c0_1, %c0_2] : memref<128x128xbf16, #tpu.memory_space<vmem>>, vector<128x128xbf16>
    %cst = arith.constant dense<0.000000e+00> : vector<256x128xf32>
    %2 = tpu.matmul %0, %1, %cst {dimension_numbers = #tpu.dot_dimension_numbers<[1], [0], [0], [1], [0, 0, 1, 1], [], []>} : vector<256x128xbf16>, vector<128x128xbf16>, vector<256x128xf32> -> vector<256x128xf32>
    %c0_3 = arith.constant 0 : index
    %c0_4 = arith.constant 0 : index
    %3 = vector.load %arg3[%c0_3, %c0_4] : memref<256x128xbf16, #tpu.memory_space<vmem>>, vector<256x128xbf16>
    %c0_5 = arith.constant 0 : index
    %c0_6 = arith.constant 0 : index
    %4 = vector.load %arg4[%c0_5, %c0_6] : memref<128x128xbf16, #tpu.memory_space<vmem>>, vector<128x128xbf16>
    %cst_7 = arith.constant dense<0.000000e+00> : vector<256x128xf32>
    %5 = tpu.matmul %3, %4, %cst_7 {dimension_numbers = #tpu.dot_dimension_numbers<[1], [0], [0], [1], [0, 0, 1, 1], [], []>} : vector<256x128xbf16>, vector<128x128xbf16>, vector<256x128xf32> -> vector<256x128xf32>
    %6 = arith.addf %2, %5 : vector<256x128xf32>
    %c0_8 = arith.constant 0 : index
    %c0_9 = arith.constant 0 : index
    %7 = vector.load %arg5[%c0_8, %c0_9] : memref<1x128xf32, #tpu.memory_space<vmem>>, vector<1x128xf32>
    %8 = vector.broadcast %7 : vector<1x128xf32> to vector<256x128xf32>
    %9 = arith.addf %6, %8 : vector<256x128xf32>
    %cst_10 = arith.constant 0.000000e+00 : f32
    %10 = vector.broadcast %cst_10 : f32 to vector<256x128xf32>
    %11 = arith.maximumf %9, %10 : vector<256x128xf32>
    %c0_11 = arith.constant 0 : index
    %c0_12 = arith.constant 0 : index
    %12 = vector.load %arg6[%c0_11, %c0_12] : memref<256x128xf32, #tpu.memory_space<vmem>>, vector<256x128xf32>
    tpu.vector_store %arg6[%c0_11, %c0_12], %11 {strides = array<i32>} : memref<256x128xf32, #tpu.memory_space<vmem>>, vector<256x128xf32>,
    return
  }
  func.func @transform_0(%arg0: i32) -> (i32, i32) {
    %c0_i32 = arith.constant 0 : i32
    %c0_i32_0 = arith.constant 0 : i32
    return %arg0, %c0_i32 : i32, i32
  }
  func.func @transform_1(%arg0: i32) -> (i32, i32) {
    %c0_i32 = arith.constant 0 : i32
    %c0_i32_0 = arith.constant 0 : i32
    %c0_i32_1 = arith.constant 0 : i32
    return %c0_i32, %c0_i32_0 : i32, i32
  }
  func.func @transform_2(%arg0: i32) -> (i32, i32) {
    %c0_i32 = arith.constant 0 : i32
    %c0_i32_0 = arith.constant 0 : i32
    return %arg0, %c0_i32 : i32, i32
  }
  func.func @transform_3(%arg0: i32) -> (i32, i32) {
    %c0_i32 = arith.constant 0 : i32
    %c0_i32_0 = arith.constant 0 : i32
    %c0_i32_1 = arith.constant 0 : i32
    return %c0_i32, %c0_i32_0 : i32, i32
  }
  func.func @transform_4(%arg0: i32) -> (i32, i32) {
    %c0_i32 = arith.constant 0 : i32
    %c0_i32_0 = arith.constant 0 : i32
    %c0_i32_1 = arith.constant 0 : i32
    return %c0_i32, %c0_i32_0 : i32, i32
  }
  func.func @transform_5(%arg0: i32) -> (i32, i32) {
    %c0_i32 = arith.constant 0 : i32
    %c0_i32_0 = arith.constant 0 : i32
    return %arg0, %c0_i32 : i32, i32
  }
}

</mosaic_0001>

<bundles_post_ra>
// kernel: sparse_bottleneck_forward.3
= control target key start
LH: loop header
LB: loop body
LE: loop exit
PB: predicated region body
PF: predicated region fallthrough
CT: control target
= control target key end

     0   :  { %s1499_s12 = smov 0   ;;  %s1501_s13 = smov 0   ;;  %s1636_s0 = inlined_call_operand.vmem [shape: bf16[512,128], index: 0, kind: input, shape index: {}]   ;;  %s1637_s1 = inlined_call_operand.vmem [shape: bf16[128,128], index: 1, kind: input, shape index: {}]   ;;  %s1638_s2 = inlined_call_operand.vmem [shape: f32[1,128], index: 2, kind: input, shape index: {}]   ;;  %s1639_s3 = inlined_call_operand.vmem [shape: bf16[512,128], index: 3, kind: output, shape index: {}]  }
   0x1   :  { %s1503_s14 = smov 0  }
   0x2 LB: > { %s32_s15 = sadd.s32 1, %s1473_s13  ;;  %p1128_p0 = scmp.ge.s32.totalorder %s1477_s14, 1  ;;  %s1477_s14 = sphi %s1503_s14, %s13_s14   ;;  %s1473_s13 = sphi %s1501_s13, %s1641_s13   ;;  %s1469_s12 = sphi %s1499_s12, %s1640_s12  }
   0x3   : > { %p34_p1 = scmp.ge.s32.totalorder %s32_s15, 2  ;;  %p188_p2 = scmp.lt.s32.totalorder %s1477_s14, 3 }
   0x5   : > { %s1643_s15 = smov (%p34_p1, %s32_s15), 0  ;;  %p189_p3 = pnand %p1128_p0, %p188_p2 }
   0x6   : > { %v1431_v0 = vld [vmem:[%s1637_s1] sm:$0xff] (!%p189_p3)   ;;  %s1129_s18 = sshll.u32 (!%p189_p3), %s1469_s12, 5  ;;  %v1432_v1 = vld [vmem:[%s1637_s1 + $0x8] sm:$0xff] (!%p189_p3)   ;;  %v1433_v2 = vld [vmem:[%s1637_s1 + $0x10] sm:$0xff] (!%p189_p3)  }
   0x7   : > { %192 = sbr.rel (%p189_p3) target bundleno = 285 (0x11d), region = 32  ;;  %p230_p4 = scmp.lt.s32.totalorder (!%p189_p3), %s1129_s18, 63  ;;  %1343 = vmatprep.subr.bf16.mxu0 (!%p189_p3), %v1431_v0  ;;  %1391 = vmatprep.subr.bf16.mxu1 (!%p189_p3), %v1431_v0  ;;  %v1434_v3 = vld [vmem:[%s1637_s1 + $0x18] sm:$0xff] (!%p189_p3)   ;;  %v1435_v6 = vld [vmem:[%s1637_s1 + $0x20] sm:$0xff] (!%p189_p3)   ;;  %v1436_v7 = vld [vmem:[%s1637_s1 + $0x28] sm:$0xff] (!%p189_p3)  }
   0x8   : > { %1344 = vmatpush3.bf16.msra.mxu0 (!%p189_p3), %v1431_v0  ;;  %1399 = vmatpush3.bf16.msra.mxu1 (!%p189_p3), %v1431_v0  ;;  %v1437_v8 = vld [vmem:[%s1637_s1 + $0x30] sm:$0xff] (!%p189_p3)   ;;  %v1438_v9 = vld [vmem:[%s1637_s1 + $0x38] sm:$0xff] (!%p189_p3)   ;;  %v1570_v24 = vld [vmem:[%s1638_s2] ss:$0 sm:$0xff] (!%p189_p3) }
   0x9   : > { %1345 = vmatprep.subr.bf16.mxu0 (!%p189_p3), %v1432_v1  ;;  %1392 = vmatprep.subr.bf16.mxu1 (!%p189_p3), %v1432_v1 }
   0xc   : > { %1346 = vmatpush3.bf16.msra.mxu0 (!%p189_p3), %v1432_v1  ;;  %1400 = vmatpush3.bf16.msra.mxu1 (!%p189_p3), %v1432_v1 }
   0xd   : > { %1347 = vmatprep.subr.bf16.mxu0 (!%p189_p3), %v1433_v2  ;;  %1393 = vmatprep.subr.bf16.mxu1 (!%p189_p3), %v1433_v2 }
   0xe   : > { %s1645_s18 = smov (!%p230_p4, %s1129_s18), 63 }
   0xf   : > { %s1130_s23 = sshll.u32 %s1645_s18, 2 }
  0x10   : > { %s1534_s26 = scalar_lea.vmem %s1636_s0, %s1130_s23  ;;  %1348 = vmatpush3.bf16.msra.mxu0 %v1433_v2  ;;  %1401 = vmatpush3.bf16.msra.mxu1 %v1433_v2  ;;  %s1585_s17 = scalar_lea.vmem %s1639_s3, %s1130_s23 }
  0x11   : > { %v1439_v4 = vld [vmem:[%s1534_s26] sm:$0xff]   ;;  %1349 = vmatprep.subr.bf16.mxu0 %v1434_v3  ;;  %1394 = vmatprep.subr.bf16.mxu1 %v1434_v3  ;;  %v1441_v10 = vld [vmem:[%s1534_s26 + $0x8] sm:$0xff]   ;;  %v1443_v12 = vld [vmem:[%s1534_s26 + $0x10] sm:$0xff]  }
  0x12   : > { %v1440_v5 = vld [vmem:[%s1534_s26 + $0x40] sm:$0xff]   ;;  %1359 = vmatprep.mubr.bf16.mxu0 %v1439_v4  ;;  %v1442_v11 = vld [vmem:[%s1534_s26 + $0x48] sm:$0xff]   ;;  %v1444_v13 = vld [vmem:[%s1534_s26 + $0x50] sm:$0xff]  }
  0x13   : > { %1375 = vmatprep.mubr.bf16.mxu1 %v1440_v5  ;;  %v1445_v14 = vld [vmem:[%s1534_s26 + $0x18] sm:$0xff]   ;;  %v1447_v16 = vld [vmem:[%s1534_s26 + $0x20] sm:$0xff]   ;;  %v1449_v18 = vld [vmem:[%s1534_s26 + $0x28] sm:$0xff]  }
  0x14   : > { %1350 = vmatpush3.bf16.msra.mxu0 %v1434_v3  ;;  %1402 = vmatpush3.bf16.msra.mxu1 %v1434_v3  ;;  %v1446_v15 = vld [vmem:[%s1534_s26 + $0x58] sm:$0xff]   ;;  %v1448_v17 = vld [vmem:[%s1534_s26 + $0x60] sm:$0xff]   ;;  %v1450_v19 = vld [vmem:[%s1534_s26 + $0x68] sm:$0xff]  }
  0x15   : > { %1351 = vmatprep.subr.bf16.mxu0 %v1435_v6  ;;  %1395 = vmatprep.subr.bf16.mxu1 %v1435_v6  ;;  %v1451_v20 = vld [vmem:[%s1534_s26 + $0x30] sm:$0xff]   ;;  %v1453_v22 = vld [vmem:[%s1534_s26 + $0x38] sm:$0xff]  }
  0x16   : > { %v1452_v21 = vld [vmem:[%s1534_s26 + $0x70] sm:$0xff]   ;;  %v1454_v23 = vld [vmem:[%s1534_s26 + $0x78] sm:$0xff]  }
  0x18   : > { %1352 = vmatpush3.bf16.msra.mxu0 %v1435_v6  ;;  %1403 = vmatpush3.bf16.msra.mxu1 %v1435_v6 }
  0x19   : > { %1353 = vmatprep.subr.bf16.mxu0 %v1436_v7  ;;  %1396 = vmatprep.subr.bf16.mxu1 %v1436_v7 }
  0x1c   : > { %1354 = vmatpush3.bf16.msra.mxu0 %v1436_v7  ;;  %1404 = vmatpush3.bf16.msra.mxu1 %v1436_v7 }
  0x1d   : > { %1355 = vmatprep.subr.bf16.mxu0 %v1437_v8  ;;  %1397 = vmatprep.subr.bf16.mxu1 %v1437_v8 }
  0x20   : > { %1356 = vmatpush3.bf16.msra.mxu0 %v1437_v8  ;;  %1405 = vmatpush3.bf16.msra.mxu1 %v1437_v8 }
  0x21   : > { %1357 = vmatprep.subr.bf16.mxu0 %v1438_v9  ;;  %1398 = vmatprep.subr.bf16.mxu1 %v1438_v9 }
  0x24   : > { %1358 = vmatpush3.bf16.msra.mxu0 %v1438_v9  ;;  %1406 = vmatpush3.bf16.msra.mxu1 %v1438_v9 }
  0x27   : > { %1360 = vmatmul.mubr.bf16.vlgmr.msra.gmra.mrb[0].mxu0 %v1441_v10  ;;  %1376 = vmatmul.mubr.bf16.vlgmr.msra.gmra.mrb[0].mxu1 %v1442_v11 }
  0x28   : > { %1363 = vmatprep.mubr.bf16.mxu0 %v1443_v12  ;;  %1379 = vmatprep.mubr.bf16.mxu1 %v1444_v13 }
  0x2f   : > { %1364 = vmatmul.mubr.bf16.gmra.mrb[4].mxu0 %v1445_v14  ;;  %1380 = vmatmul.mubr.bf16.gmra.mrb[4].mxu1 %v1446_v15 }
  0x30   : > { %1367 = vmatprep.mubr.bf16.mxu0 %v1447_v16  ;;  %1383 = vmatprep.mubr.bf16.mxu1 %v1448_v17 }
  0x37   : > { %1368 = vmatmul.mubr.bf16.gmra.mrb[8].mxu0 %v1449_v18  ;;  %1384 = vmatmul.mubr.bf16.gmra.mrb[8].mxu1 %v1450_v19 }
  0x38   : > { %1371 = vmatprep.mubr.bf16.mxu0 %v1451_v20  ;;  %1387 = vmatprep.mubr.bf16.mxu1 %v1452_v21 }
  0x3f   : > { %1372 = vmatmul.mubr.bf16.gmra.mrb[12].mxu0 %v1453_v22  ;;  %1388 = vmatmul.mubr.bf16.gmra.mrb[12].mxu1 %v1454_v23 }
  0xfa   : > { %v1361_v25 = vpop.f32.mrb[0].mxu0  ;;  %v1377_v26 = vpop.f32.mrb[0].mxu1 }
  0xfb   : > { %v789_v27 = vadd.f32 %v1361_v25, %v1570_v24  ;;  %v805_v28 = vadd.f32 %v1377_v26, %v1570_v24  ;;  %v554_v29 = vpop.f32.mrb[1].mxu0  ;;  %v618_v30 = vpop.f32.mrb[1].mxu1 }
  0xfc   : > { %v787_v31 = vadd.f32 %v1570_v24, %v554_v29  ;;  %v803_v32 = vadd.f32 %v1570_v24, %v618_v30  ;;  %v1362_v33 = vpop.f32.mrb[2].mxu0  ;;  %v1378_v34 = vpop.f32.mrb[2].mxu1 }
  0xfd   : > { %v790_v35 = vadd.f32 %v1362_v33, %v1570_v24  ;;  %v806_v36 = vadd.f32 %v1378_v34, %v1570_v24  ;;  %v557_v37 = vpop.f32.mrb[3].mxu0  ;;  %v621_v38 = vpop.f32.mrb[3].mxu1  ;;  %v821_v41 = vmax.f32 %v789_v27, 0.0  ;;  %v837_v42 = vmax.f32 %v805_v28, 0.0 }
  0xfe   : > { %v788_v39 = vadd.f32 %v1570_v24, %v557_v37  ;;  %v804_v40 = vadd.f32 %v1570_v24, %v621_v38  ;;  %v819_v45 = vmax.f32 %v787_v31, 0.0  ;;  %v835_v46 = vmax.f32 %v803_v32, 0.0 }
  0xff   : > { %v822_v43 = vmax.f32 %v790_v35, 0.0  ;;  %v838_v44 = vmax.f32 %v806_v36, 0.0 }
 0x100   : > { %v820_v47 = vmax.f32 %v788_v39, 0.0  ;;  %v836_v48 = vmax.f32 %v804_v40, 0.0 }
 0x101   : > { %v1232_v49 = vpack.c.bf16 %v822_v43, %v821_v41  ;;  %v1272_v50 = vpack.c.bf16 %v838_v44, %v837_v42 }
 0x102   : > { %v1227_v51 = vpack.c.bf16 %v820_v47, %v819_v45  ;;  %v1267_v52 = vpack.c.bf16 %v836_v48, %v835_v46  ;;  %v1365_v53 = vpop.f32.mrb[4].mxu0  ;;  %v1381_v54 = vpop.f32.mrb[4].mxu1 }
 0x103   : > { %1304 = vst [vmem:[%s1585_s17 + $0x8] sm:$0xff] %v1232_v49   ;;  %1312 = vst [vmem:[%s1585_s17 + $0x48] sm:$0xff] %v1272_v50   ;;  %v793_v55 = vadd.f32 %v1365_v53, %v1570_v24  ;;  %v809_v56 = vadd.f32 %v1381_v54, %v1570_v24  ;;  %v570_v57 = vpop.f32.mrb[5].mxu0  ;;  %v634_v58 = vpop.f32.mrb[5].mxu1 }
 0x104   : > { %1228 = vst [vmem:[%s1585_s17] sm:$0xff] %v1227_v51   ;;  %1311 = vst [vmem:[%s1585_s17 + $0x40] sm:$0xff] %v1267_v52   ;;  %v791_v59 = vadd.f32 %v1570_v24, %v570_v57  ;;  %v807_v60 = vadd.f32 %v1570_v24, %v634_v58  ;;  %v1366_v61 = vpop.f32.mrb[6].mxu0  ;;  %v1382_v62 = vpop.f32.mrb[6].mxu1 }
 0x105   : > { %v794_v63 = vadd.f32 %v1366_v61, %v1570_v24  ;;  %v810_v0 = vadd.f32 %v1382_v62, %v1570_v24  ;;  %v573_v1 = vpop.f32.mrb[7].mxu0  ;;  %v637_v2 = vpop.f32.mrb[7].mxu1  ;;  %v825_v5 = vmax.f32 %v793_v55, 0.0  ;;  %v841_v6 = vmax.f32 %v809_v56, 0.0 }
 0x106   : > { %v792_v3 = vadd.f32 %v1570_v24, %v573_v1  ;;  %v808_v4 = vadd.f32 %v1570_v24, %v637_v2  ;;  %v823_v9 = vmax.f32 %v791_v59, 0.0  ;;  %v839_v10 = vmax.f32 %v807_v60, 0.0 }
 0x107   : > { %v826_v7 = vmax.f32 %v794_v63, 0.0  ;;  %v842_v8 = vmax.f32 %v810_v0, 0.0 }
 0x108   : > { %v824_v11 = vmax.f32 %v792_v3, 0.0  ;;  %v840_v12 = vmax.f32 %v808_v4, 0.0 }
 0x109   : > { %v1242_v13 = vpack.c.bf16 %v826_v7, %v825_v5  ;;  %v1282_v14 = vpack.c.bf16 %v842_v8, %v841_v6 }
 0x10a   : > { %v1237_v15 = vpack.c.bf16 %v824_v11, %v823_v9  ;;  %v1277_v16 = vpack.c.bf16 %v840_v12, %v839_v10  ;;  %v1369_v17 = vpop.f32.mrb[8].mxu0  ;;  %v1385_v18 = vpop.f32.mrb[8].mxu1 }
 0x10b   : > { %1306 = vst [vmem:[%s1585_s17 + $0x18] sm:$0xff] %v1242_v13   ;;  %1314 = vst [vmem:[%s1585_s17 + $0x58] sm:$0xff] %v1282_v14   ;;  %v797_v19 = vadd.f32 %v1369_v17, %v1570_v24  ;;  %v813_v20 = vadd.f32 %v1385_v18, %v1570_v24  ;;  %v586_v21 = vpop.f32.mrb[9].mxu0  ;;  %v650_v22 = vpop.f32.mrb[9].mxu1 }
 0x10c   : > { %1305 = vst [vmem:[%s1585_s17 + $0x10] sm:$0xff] %v1237_v15   ;;  %1313 = vst [vmem:[%s1585_s17 + $0x50] sm:$0xff] %v1277_v16   ;;  %v795_v23 = vadd.f32 %v1570_v24, %v586_v21  ;;  %v811_v25 = vadd.f32 %v1570_v24, %v650_v22  ;;  %v1370_v26 = vpop.f32.mrb[10].mxu0  ;;  %v1386_v27 = vpop.f32.mrb[10].mxu1 }
 0x10d   : > { %v798_v28 = vadd.f32 %v1370_v26, %v1570_v24  ;;  %v814_v29 = vadd.f32 %v1386_v27, %v1570_v24  ;;  %v589_v30 = vpop.f32.mrb[11].mxu0  ;;  %v653_v31 = vpop.f32.mrb[11].mxu1  ;;  %v829_v34 = vmax.f32 %v797_v19, 0.0  ;;  %v845_v35 = vmax.f32 %v813_v20, 0.0 }
 0x10e   : > { %v796_v32 = vadd.f32 %v1570_v24, %v589_v30  ;;  %v812_v33 = vadd.f32 %v1570_v24, %v653_v31  ;;  %v827_v38 = vmax.f32 %v795_v23, 0.0  ;;  %v843_v39 = vmax.f32 %v811_v25, 0.0 }
 0x10f   : > { %v830_v36 = vmax.f32 %v798_v28, 0.0  ;;  %v846_v37 = vmax.f32 %v814_v29, 0.0 }
 0x110   : > { %v828_v40 = vmax.f32 %v796_v32, 0.0  ;;  %v844_v41 = vmax.f32 %v812_v33, 0.0 }
 0x111   : > { %v1252_v42 = vpack.c.bf16 %v830_v36, %v829_v34  ;;  %v1292_v43 = vpack.c.bf16 %v846_v37, %v845_v35 }
 0x112   : > { %v1247_v44 = vpack.c.bf16 %v828_v40, %v827_v38  ;;  %v1287_v45 = vpack.c.bf16 %v844_v41, %v843_v39  ;;  %v1373_v46 = vpop.f32.mrb[12].mxu0  ;;  %v1389_v47 = vpop.f32.mrb[12].mxu1 }
 0x113   : > { %1308 = vst [vmem:[%s1585_s17 + $0x28] sm:$0xff] %v1252_v42   ;;  %1316 = vst [vmem:[%s1585_s17 + $0x68] sm:$0xff] %v1292_v43   ;;  %v801_v48 = vadd.f32 %v1373_v46, %v1570_v24  ;;  %v817_v49 = vadd.f32 %v1389_v47, %v1570_v24  ;;  %v602_v50 = vpop.f32.mrb[13].mxu0  ;;  %v666_v51 = vpop.f32.mrb[13].mxu1 }
 0x114   : > { %1307 = vst [vmem:[%s1585_s17 + $0x20] sm:$0xff] %v1247_v44   ;;  %1315 = vst [vmem:[%s1585_s17 + $0x60] sm:$0xff] %v1287_v45   ;;  %v799_v52 = vadd.f32 %v1570_v24, %v602_v50  ;;  %v815_v53 = vadd.f32 %v1570_v24, %v666_v51  ;;  %v1374_v54 = vpop.f32.mrb[14].mxu0  ;;  %v1390_v55 = vpop.f32.mrb[14].mxu1 }
 0x115   : > { %v802_v56 = vadd.f32 %v1374_v54, %v1570_v24  ;;  %v818_v57 = vadd.f32 %v1390_v55, %v1570_v24  ;;  %v605_v58 = vpop.f32.mrb[15].mxu0  ;;  %v669_v59 = vpop.f32.mrb[15].mxu1  ;;  %v833_v62 = vmax.f32 %v801_v48, 0.0  ;;  %v849_v63 = vmax.f32 %v817_v49, 0.0 }
 0x116   : > { %v800_v60 = vadd.f32 %v1570_v24, %v605_v58  ;;  %v816_v61 = vadd.f32 %v1570_v24, %v669_v59  ;;  %v831_v2 = vmax.f32 %v799_v52, 0.0  ;;  %v847_v3 = vmax.f32 %v815_v53, 0.0 }
 0x117   : > { %v834_v0 = vmax.f32 %v802_v56, 0.0  ;;  %v850_v1 = vmax.f32 %v818_v57, 0.0 }
 0x118   : > { %v832_v4 = vmax.f32 %v800_v60, 0.0  ;;  %v848_v5 = vmax.f32 %v816_v61, 0.0 }
 0x119   : > { %v1262_v6 = vpack.c.bf16 %v834_v0, %v833_v62  ;;  %v1302_v7 = vpack.c.bf16 %v850_v1, %v849_v63 }
 0x11a   : > { %v1257_v8 = vpack.c.bf16 %v832_v4, %v831_v2  ;;  %v1297_v9 = vpack.c.bf16 %v848_v5, %v847_v3 }
 0x11b   : > { %1310 = vst [vmem:[%s1585_s17 + $0x38] sm:$0xff] %v1262_v6   ;;  %1318 = vst [vmem:[%s1585_s17 + $0x78] sm:$0xff] %v1302_v7  }
 0x11c   : > { %1309 = vst [vmem:[%s1585_s17 + $0x30] sm:$0xff] %v1257_v8   ;;  %1317 = vst [vmem:[%s1585_s17 + $0x70] sm:$0xff] %v1297_v9  }
 0x11d PF: > { %s13_s14 = sadd.s32 1, %s1477_s14   ;;  %s1640_s12 = smov %s1473_s13 }
 0x11e   : > { %p10_p5 = scmp.ge.s32.totalorder %s13_s14, 4   ;;  %s1641_s13 = smov %s1643_s15 }
 0x120   :  { %12 = sbr.rel (!%p10_p5) target bundleno = 2 (0x2), region = 76 }

// kernel: sparse_bottleneck_forward.5
= control target key start
LH: loop header
LB: loop body
LE: loop exit
PB: predicated region body
PF: predicated region fallthrough
CT: control target
= control target key end

     0   :  { %s1460_s18 = smov 0   ;;  %s1639_s0 = inlined_call_operand.vmem [shape: bf16[512,128], index: 0, kind: input, shape index: {}]   ;;  %s1640_s1 = inlined_call_operand.vmem [shape: bf16[128,128], index: 1, kind: input, shape index: {}]   ;;  %s1641_s2 = inlined_call_operand.vmem [shape: bf16[512,128], index: 2, kind: input, shape index: {}]   ;;  %s1642_s3 = inlined_call_operand.vmem [shape: bf16[128,128], index: 3, kind: input, shape index: {}]   ;;  %s1643_s4 = inlined_call_operand.vmem [shape: f32[1,128], index: 4, kind: input, shape index: {}]   ;;  %s1644_s5 = inlined_call_operand.vmem [shape: f32[512,128], index: 5, kind: output, shape index: {}]  }
   0x1 LB: > { %s1128_s19 = sadd.s32 4294967295, %s1428_s18   ;;  %p1132_p0 = scmp.ge.s32.totalorder %s1428_s18, 1  ;;  %s1428_s18 = sphi %s1460_s18, %s15_s18  }
   0x2   : > { %p199_p1 = scmp.lt.s32.totalorder %s1428_s18, 3 }
   0x4   : > { %p200_p2 = pnand %p1132_p0, %p199_p1 }
   0x5   : > { %v1374_v0 = vld [vmem:[%s1642_s3] sm:$0xff] (!%p200_p2)   ;;  %s1133_s22 = sshll.u32 (!%p200_p2), %s1128_s19, 5  ;;  %v1376_v2 = vld [vmem:[%s1642_s3 + $0x8] sm:$0xff] (!%p200_p2)   ;;  %v1378_v4 = vld [vmem:[%s1642_s3 + $0x10] sm:$0xff] (!%p200_p2)  }
   0x6   : > { %203 = sbr.rel (%p200_p2) target bundleno = 317 (0x13d), region = 40  ;;  %v1375_v1 = vld [vmem:[%s1640_s1] sm:$0xff] (!%p200_p2)   ;;  %1238 = vmatprep.subr.bf16.mxu1 (!%p200_p2), %v1374_v0  ;;  %p233_p3 = scmp.lt.s32.totalorder (!%p200_p2), %s1133_s22, 63  ;;  %v1377_v3 = vld [vmem:[%s1640_s1 + $0x8] sm:$0xff] (!%p200_p2)   ;;  %v1379_v5 = vld [vmem:[%s1640_s1 + $0x10] sm:$0xff] (!%p200_p2)  }
   0x7   : > { %1286 = vmatprep.subr.bf16.mxu0 (!%p200_p2), %v1375_v1  ;;  %1239 = vmatpush3.bf16.msra.mxu1 (!%p200_p2), %v1374_v0  ;;  %v1380_v6 = vld [vmem:[%s1642_s3 + $0x18] sm:$0xff] (!%p200_p2)   ;;  %v1382_v8 = vld [vmem:[%s1642_s3 + $0x20] sm:$0xff] (!%p200_p2)   ;;  %v1384_v10 = vld [vmem:[%s1642_s3 + $0x28] sm:$0xff] (!%p200_p2)  }
   0x8   : > { %1287 = vmatpush3.bf16.msra.mxu0 (!%p200_p2), %v1375_v1  ;;  %1240 = vmatprep.subr.bf16.mxu1 (!%p200_p2), %v1376_v2  ;;  %v1381_v7 = vld [vmem:[%s1640_s1 + $0x18] sm:$0xff] (!%p200_p2)   ;;  %v1383_v9 = vld [vmem:[%s1640_s1 + $0x20] sm:$0xff] (!%p200_p2)   ;;  %v1385_v11 = vld [vmem:[%s1640_s1 + $0x28] sm:$0xff] (!%p200_p2)  }
   0x9   : > { %1288 = vmatprep.subr.bf16.mxu0 (!%p200_p2), %v1377_v3  ;;  %v1386_v14 = vld [vmem:[%s1642_s3 + $0x30] sm:$0xff] (!%p200_p2)   ;;  %v1388_v16 = vld [vmem:[%s1642_s3 + $0x38] sm:$0xff] (!%p200_p2)   ;;  %v1564_v50 = vld [vmem:[%s1643_s4] ss:$0 sm:$0xff] (!%p200_p2) }
   0xa   : > { %v1387_v15 = vld [vmem:[%s1640_s1 + $0x30] sm:$0xff] (!%p200_p2)   ;;  %v1389_v17 = vld [vmem:[%s1640_s1 + $0x38] sm:$0xff] (!%p200_p2)  }
   0xb   : > { %1241 = vmatpush3.bf16.msra.mxu1 (!%p200_p2), %v1376_v2 }
   0xc   : > { %1289 = vmatpush3.bf16.msra.mxu0 (!%p200_p2), %v1377_v3  ;;  %1242 = vmatprep.subr.bf16.mxu1 (!%p200_p2), %v1378_v4 }
   0xd   : > { %s1646_s22 = smov (!%p233_p3, %s1133_s22), 63  ;;  %1290 = vmatprep.subr.bf16.mxu0 %v1379_v5 }
   0xe   : > { %s1134_s12 = sshll.u32 %s1646_s22, 2  ;;  %s1138_s14 = sshll.u32 %s1646_s22, 3 }
   0xf   : > { %1243 = vmatpush3.bf16.msra.mxu1 %v1378_v4  ;;  %s1504_s20 = scalar_lea.vmem %s1641_s2, %s1134_s12  ;;  %s1512_s26 = scalar_lea.vmem %s1639_s0, %s1134_s12 }
  0x10   : > { %1291 = vmatpush3.bf16.msra.mxu0 %v1379_v5  ;;  %1244 = vmatprep.subr.bf16.mxu1 %v1380_v6  ;;  %v1390_v12 = vld [vmem:[%s1504_s20] sm:$0xff]   ;;  %v1392_v18 = vld [vmem:[%s1504_s20 + $0x8] sm:$0xff]   ;;  %v1394_v20 = vld [vmem:[%s1504_s20 + $0x10] sm:$0xff]   ;;  %s1571_s17 = scalar_lea.vmem %s1644_s5, %s1138_s14 }
  0x11   : > { %1292 = vmatprep.subr.bf16.mxu0 %v1381_v7  ;;  %v1391_v13 = vld [vmem:[%s1512_s26] sm:$0xff]   ;;  %1254 = vmatprep.mubr.bf16.mxu1 %v1390_v12  ;;  %v1393_v19 = vld [vmem:[%s1512_s26 + $0x8] sm:$0xff]   ;;  %v1395_v21 = vld [vmem:[%s1512_s26 + $0x10] sm:$0xff]  }
  0x12   : > { %1302 = vmatprep.mubr.bf16.mxu0 %v1391_v13  ;;  %v1396_v22 = vld [vmem:[%s1504_s20 + $0x18] sm:$0xff]   ;;  %v1398_v24 = vld [vmem:[%s1504_s20 + $0x20] sm:$0xff]   ;;  %v1400_v26 = vld [vmem:[%s1504_s20 + $0x28] sm:$0xff]  }
  0x13   : > { %1245 = vmatpush3.bf16.msra.mxu1 %v1380_v6  ;;  %v1397_v23 = vld [vmem:[%s1512_s26 + $0x18] sm:$0xff]   ;;  %v1399_v25 = vld [vmem:[%s1512_s26 + $0x20] sm:$0xff]   ;;  %v1401_v27 = vld [vmem:[%s1512_s26 + $0x28] sm:$0xff]  }
  0x14   : > { %1293 = vmatpush3.bf16.msra.mxu0 %v1381_v7  ;;  %1246 = vmatprep.subr.bf16.mxu1 %v1382_v8  ;;  %v1402_v28 = vld [vmem:[%s1504_s20 + $0x30] sm:$0xff]   ;;  %v1404_v30 = vld [vmem:[%s1504_s20 + $0x38] sm:$0xff]   ;;  %v1406_v32 = vld [vmem:[%s1504_s20 + $0x40] sm:$0xff]  }
  0x15   : > { %1294 = vmatprep.subr.bf16.mxu0 %v1383_v9  ;;  %v1403_v29 = vld [vmem:[%s1512_s26 + $0x30] sm:$0xff]   ;;  %v1405_v31 = vld [vmem:[%s1512_s26 + $0x38] sm:$0xff]   ;;  %v1407_v33 = vld [vmem:[%s1512_s26 + $0x40] sm:$0xff]  }
  0x16   : > { %v1408_v34 = vld [vmem:[%s1504_s20 + $0x48] sm:$0xff]   ;;  %v1410_v36 = vld [vmem:[%s1504_s20 + $0x50] sm:$0xff]   ;;  %v1412_v38 = vld [vmem:[%s1504_s20 + $0x58] sm:$0xff]  }
  0x17   : > { %1247 = vmatpush3.bf16.msra.mxu1 %v1382_v8  ;;  %v1409_v35 = vld [vmem:[%s1512_s26 + $0x48] sm:$0xff]   ;;  %v1411_v37 = vld [vmem:[%s1512_s26 + $0x50] sm:$0xff]   ;;  %v1413_v39 = vld [vmem:[%s1512_s26 + $0x58] sm:$0xff]  }
  0x18   : > { %1295 = vmatpush3.bf16.msra.mxu0 %v1383_v9  ;;  %1248 = vmatprep.subr.bf16.mxu1 %v1384_v10  ;;  %v1414_v40 = vld [vmem:[%s1504_s20 + $0x60] sm:$0xff]   ;;  %v1416_v42 = vld [vmem:[%s1504_s20 + $0x68] sm:$0xff]   ;;  %v1418_v44 = vld [vmem:[%s1504_s20 + $0x70] sm:$0xff]  }
  0x19   : > { %1296 = vmatprep.subr.bf16.mxu0 %v1385_v11  ;;  %v1415_v41 = vld [vmem:[%s1512_s26 + $0x60] sm:$0xff]   ;;  %v1417_v43 = vld [vmem:[%s1512_s26 + $0x68] sm:$0xff]   ;;  %v1419_v45 = vld [vmem:[%s1512_s26 + $0x70] sm:$0xff]  }
  0x1a   : > { %v1420_v46 = vld [vmem:[%s1504_s20 + $0x78] sm:$0xff]  }
  0x1b   : > { %1249 = vmatpush3.bf16.msra.mxu1 %v1384_v10  ;;  %v1421_v47 = vld [vmem:[%s1512_s26 + $0x78] sm:$0xff]  }
  0x1c   : > { %1297 = vmatpush3.bf16.msra.mxu0 %v1385_v11  ;;  %1250 = vmatprep.subr.bf16.mxu1 %v1386_v14 }
  0x1d   : > { %1298 = vmatprep.subr.bf16.mxu0 %v1387_v15 }
  0x1f   : > { %1251 = vmatpush3.bf16.msra.mxu1 %v1386_v14 }
  0x20   : > { %1299 = vmatpush3.bf16.msra.mxu0 %v1387_v15  ;;  %1252 = vmatprep.subr.bf16.mxu1 %v1388_v16 }
  0x21   : > { %1300 = vmatprep.subr.bf16.mxu0 %v1389_v17 }
  0x23   : > { %1253 = vmatpush3.bf16.msra.mxu1 %v1388_v16 }
  0x24   : > { %1301 = vmatpush3.bf16.msra.mxu0 %v1389_v17 }
  0x26   : > { %1255 = vmatmul.mubr.bf16.vlgmr.msra.gmra.mrb[0].mxu1 %v1392_v18 }
  0x27   : > { %1303 = vmatmul.mubr.bf16.vlgmr.msra.gmra.mrb[0].mxu0 %v1393_v19  ;;  %1258 = vmatprep.mubr.bf16.mxu1 %v1394_v20 }
  0x28   : > { %1306 = vmatprep.mubr.bf16.mxu0 %v1395_v21 }
  0x2e   : > { %1259 = vmatmul.mubr.bf16.gmra.mrb[4].mxu1 %v1396_v22 }
  0x2f   : > { %1307 = vmatmul.mubr.bf16.gmra.mrb[4].mxu0 %v1397_v23  ;;  %1262 = vmatprep.mubr.bf16.mxu1 %v1398_v24 }
  0x30   : > { %1310 = vmatprep.mubr.bf16.mxu0 %v1399_v25 }
  0x36   : > { %1263 = vmatmul.mubr.bf16.gmra.mrb[8].mxu1 %v1400_v26 }
  0x37   : > { %1311 = vmatmul.mubr.bf16.gmra.mrb[8].mxu0 %v1401_v27  ;;  %1266 = vmatprep.mubr.bf16.mxu1 %v1402_v28 }
  0x38   : > { %1314 = vmatprep.mubr.bf16.mxu0 %v1403_v29 }
  0x3e   : > { %1267 = vmatmul.mubr.bf16.gmra.mrb[12].mxu1 %v1404_v30 }
  0x3f   : > { %1315 = vmatmul.mubr.bf16.gmra.mrb[12].mxu0 %v1405_v31  ;;  %1270 = vmatprep.mubr.bf16.mxu1 %v1406_v32 }
  0x40   : > { %1318 = vmatprep.mubr.bf16.mxu0 %v1407_v33 }
  0x46   : > { %1271 = vmatmul.mubr.bf16.gmra.mrb[16].mxu1 %v1408_v34 }
  0x47   : > { %1319 = vmatmul.mubr.bf16.gmra.mrb[16].mxu0 %v1409_v35  ;;  %1274 = vmatprep.mubr.bf16.mxu1 %v1410_v36 }
  0x48   : > { %1322 = vmatprep.mubr.bf16.mxu0 %v1411_v37 }
  0x4e   : > { %1275 = vmatmul.mubr.bf16.gmra.mrb[20].mxu1 %v1412_v38 }
  0x4f   : > { %1323 = vmatmul.mubr.bf16.gmra.mrb[20].mxu0 %v1413_v39  ;;  %1278 = vmatprep.mubr.bf16.mxu1 %v1414_v40 }
  0x50   : > { %1326 = vmatprep.mubr.bf16.mxu0 %v1415_v41 }
  0x56   : > { %1279 = vmatmul.mubr.bf16.gmra.mrb[24].mxu1 %v1416_v42 }
  0x57   : > { %1327 = vmatmul.mubr.bf16.gmra.mrb[24].mxu0 %v1417_v43  ;;  %1282 = vmatprep.mubr.bf16.mxu1 %v1418_v44 }
  0x58   : > { %1330 = vmatprep.mubr.bf16.mxu0 %v1419_v45 }
  0x5e   : > { %1283 = vmatmul.mubr.bf16.gmra.mrb[28].mxu1 %v1420_v46 }
  0x5f   : > { %1331 = vmatmul.mubr.bf16.gmra.mrb[28].mxu0 %v1421_v47 }
  0xf9   : > { %v1256_v48 = vpop.f32.mrb[0].mxu1 }
  0xfa   : > { %v1304_v49 = vpop.f32.mrb[0].mxu0  ;;  %v525_v51 = vpop.f32.mrb[1].mxu1 }
  0xfb   : > { %v839_v52 = vadd.f32 %v1304_v49, %v1256_v48  ;;  %v830_v53 = vpop.f32.mrb[1].mxu0  ;;  %v1257_v54 = vpop.f32.mrb[2].mxu1 }
  0xfc   : > { %v831_v55 = vadd.f32 %v830_v53, %v525_v51  ;;  %v1305_v56 = vpop.f32.mrb[2].mxu0  ;;  %v528_v57 = vpop.f32.mrb[3].mxu1 }
  0xfd   : > { %v966_v58 = vadd.f32 %v1564_v50, %v839_v52  ;;  %v842_v59 = vadd.f32 %v1305_v56, %v1257_v54  ;;  %v833_v60 = vpop.f32.mrb[3].mxu0 }
  0xfe   : > { %v964_v61 = vadd.f32 %v1564_v50, %v831_v55  ;;  %v834_v62 = vadd.f32 %v833_v60, %v528_v57 }
  0xff   : > { %v998_v63 = vmax.f32 %v966_v58, 0.0  ;;  %v967_v0 = vadd.f32 %v1564_v50, %v842_v59 }
 0x100   : > { %v996_v1 = vmax.f32 %v964_v61, 0.0  ;;  %v965_v2 = vadd.f32 %v1564_v50, %v834_v62 }
 0x101   : > { %1030 = vst [vmem:[%s1571_s17 + $0x10] sm:$0xff] %v998_v63  ;;  %v999_v3 = vmax.f32 %v967_v0, 0.0  ;;  %v1260_v4 = vpop.f32.mrb[4].mxu1 }
 0x102   : > { %1028 = vst [vmem:[%s1571_s17] sm:$0xff] %v996_v1  ;;  %v997_v5 = vmax.f32 %v965_v2, 0.0  ;;  %v1308_v6 = vpop.f32.mrb[4].mxu0  ;;  %v541_v7 = vpop.f32.mrb[5].mxu1 }
 0x103   : > { %1031 = vst [vmem:[%s1571_s17 + $0x18] sm:$0xff] %v999_v3  ;;  %v855_v8 = vadd.f32 %v1308_v6, %v1260_v4  ;;  %v846_v9 = vpop.f32.mrb[5].mxu0  ;;  %v1261_v10 = vpop.f32.mrb[6].mxu1 }
 0x104   : > { %1029 = vst [vmem:[%s1571_s17 + $0x8] sm:$0xff] %v997_v5  ;;  %v847_v11 = vadd.f32 %v846_v9, %v541_v7  ;;  %v1309_v12 = vpop.f32.mrb[6].mxu0  ;;  %v544_v13 = vpop.f32.mrb[7].mxu1 }
 0x105   : > { %v970_v14 = vadd.f32 %v1564_v50, %v855_v8  ;;  %v858_v15 = vadd.f32 %v1309_v12, %v1261_v10  ;;  %v849_v16 = vpop.f32.mrb[7].mxu0 }
 0x106   : > { %v968_v17 = vadd.f32 %v1564_v50, %v847_v11  ;;  %v850_v18 = vadd.f32 %v849_v16, %v544_v13 }
 0x107   : > { %v1002_v19 = vmax.f32 %v970_v14, 0.0  ;;  %v971_v20 = vadd.f32 %v1564_v50, %v858_v15 }
 0x108   : > { %v1000_v21 = vmax.f32 %v968_v17, 0.0  ;;  %v969_v22 = vadd.f32 %v1564_v50, %v850_v18 }
 0x109   : > { %1034 = vst [vmem:[%s1571_s17 + $0x30] sm:$0xff] %v1002_v19  ;;  %v1003_v23 = vmax.f32 %v971_v20, 0.0  ;;  %v1264_v24 = vpop.f32.mrb[8].mxu1 }
 0x10a   : > { %1032 = vst [vmem:[%s1571_s17 + $0x20] sm:$0xff] %v1000_v21  ;;  %v1001_v25 = vmax.f32 %v969_v22, 0.0  ;;  %v1312_v26 = vpop.f32.mrb[8].mxu0  ;;  %v557_v27 = vpop.f32.mrb[9].mxu1 }
 0x10b   : > { %1035 = vst [vmem:[%s1571_s17 + $0x38] sm:$0xff] %v1003_v23  ;;  %v871_v28 = vadd.f32 %v1312_v26, %v1264_v24  ;;  %v862_v29 = vpop.f32.mrb[9].mxu0  ;;  %v1265_v30 = vpop.f32.mrb[10].mxu1 }
 0x10c   : > { %1033 = vst [vmem:[%s1571_s17 + $0x28] sm:$0xff] %v1001_v25  ;;  %v863_v31 = vadd.f32 %v862_v29, %v557_v27  ;;  %v1313_v32 = vpop.f32.mrb[10].mxu0  ;;  %v560_v33 = vpop.f32.mrb[11].mxu1 }
 0x10d   : > { %v974_v34 = vadd.f32 %v1564_v50, %v871_v28  ;;  %v874_v35 = vadd.f32 %v1313_v32, %v1265_v30  ;;  %v865_v36 = vpop.f32.mrb[11].mxu0 }
 0x10e   : > { %v972_v37 = vadd.f32 %v1564_v50, %v863_v31  ;;  %v866_v38 = vadd.f32 %v865_v36, %v560_v33 }
 0x10f   : > { %v1006_v39 = vmax.f32 %v974_v34, 0.0  ;;  %v975_v40 = vadd.f32 %v1564_v50, %v874_v35 }
 0x110   : > { %v1004_v41 = vmax.f32 %v972_v37, 0.0  ;;  %v973_v42 = vadd.f32 %v1564_v50, %v866_v38 }
 0x111   : > { %1038 = vst [vmem:[%s1571_s17 + $0x50] sm:$0xff] %v1006_v39  ;;  %v1007_v43 = vmax.f32 %v975_v40, 0.0  ;;  %v1268_v44 = vpop.f32.mrb[12].mxu1 }
 0x112   : > { %1036 = vst [vmem:[%s1571_s17 + $0x40] sm:$0xff] %v1004_v41  ;;  %v1005_v45 = vmax.f32 %v973_v42, 0.0  ;;  %v1316_v46 = vpop.f32.mrb[12].mxu0  ;;  %v573_v47 = vpop.f32.mrb[13].mxu1 }
 0x113   : > { %1039 = vst [vmem:[%s1571_s17 + $0x58] sm:$0xff] %v1007_v43  ;;  %v887_v48 = vadd.f32 %v1316_v46, %v1268_v44  ;;  %v878_v49 = vpop.f32.mrb[13].mxu0  ;;  %v1269_v51 = vpop.f32.mrb[14].mxu1 }
 0x114   : > { %1037 = vst [vmem:[%s1571_s17 + $0x48] sm:$0xff] %v1005_v45  ;;  %v879_v52 = vadd.f32 %v878_v49, %v573_v47  ;;  %v1317_v53 = vpop.f32.mrb[14].mxu0  ;;  %v576_v54 = vpop.f32.mrb[15].mxu1 }
 0x115   : > { %v978_v55 = vadd.f32 %v1564_v50, %v887_v48  ;;  %v890_v56 = vadd.f32 %v1317_v53, %v1269_v51  ;;  %v881_v57 = vpop.f32.mrb[15].mxu0 }
 0x116   : > { %v976_v58 = vadd.f32 %v1564_v50, %v879_v52  ;;  %v882_v59 = vadd.f32 %v881_v57, %v576_v54 }
 0x117   : > { %v1010_v60 = vmax.f32 %v978_v55, 0.0  ;;  %v979_v61 = vadd.f32 %v1564_v50, %v890_v56 }
 0x118   : > { %v1008_v62 = vmax.f32 %v976_v58, 0.0  ;;  %v977_v63 = vadd.f32 %v1564_v50, %v882_v59 }
 0x119   : > { %1042 = vst [vmem:[%s1571_s17 + $0x70] sm:$0xff] %v1010_v60  ;;  %v1011_v0 = vmax.f32 %v979_v61, 0.0  ;;  %v1272_v1 = vpop.f32.mrb[16].mxu1 }
 0x11a   : > { %1040 = vst [vmem:[%s1571_s17 + $0x60] sm:$0xff] %v1008_v62  ;;  %v1009_v2 = vmax.f32 %v977_v63, 0.0  ;;  %v1320_v3 = vpop.f32.mrb[16].mxu0  ;;  %v589_v4 = vpop.f32.mrb[17].mxu1 }
 0x11b   : > { %1043 = vst [vmem:[%s1571_s17 + $0x78] sm:$0xff] %v1011_v0  ;;  %v903_v5 = vadd.f32 %v1320_v3, %v1272_v1  ;;  %v894_v6 = vpop.f32.mrb[17].mxu0  ;;  %v1273_v7 = vpop.f32.mrb[18].mxu1 }
 0x11c   : > { %1041 = vst [vmem:[%s1571_s17 + $0x68] sm:$0xff] %v1009_v2  ;;  %v895_v8 = vadd.f32 %v894_v6, %v589_v4  ;;  %v1321_v9 = vpop.f32.mrb[18].mxu0  ;;  %v592_v10 = vpop.f32.mrb[19].mxu1 }
 0x11d   : > { %v982_v11 = vadd.f32 %v1564_v50, %v903_v5  ;;  %v906_v12 = vadd.f32 %v1321_v9, %v1273_v7  ;;  %v897_v13 = vpop.f32.mrb[19].mxu0 }
 0x11e   : > { %v980_v14 = vadd.f32 %v1564_v50, %v895_v8  ;;  %v898_v15 = vadd.f32 %v897_v13, %v592_v10 }
 0x11f   : > { %v1014_v16 = vmax.f32 %v982_v11, 0.0  ;;  %v983_v17 = vadd.f32 %v1564_v50, %v906_v12 }
 0x120   : > { %v1012_v18 = vmax.f32 %v980_v14, 0.0  ;;  %v981_v19 = vadd.f32 %v1564_v50, %v898_v15 }
 0x121   : > { %1046 = vst [vmem:[%s1571_s17 + $0x90] sm:$0xff] %v1014_v16  ;;  %v1015_v20 = vmax.f32 %v983_v17, 0.0  ;;  %v1276_v21 = vpop.f32.mrb[20].mxu1 }
 0x122   : > { %1044 = vst [vmem:[%s1571_s17 + $0x80] sm:$0xff] %v1012_v18  ;;  %v1013_v22 = vmax.f32 %v981_v19, 0.0  ;;  %v1324_v23 = vpop.f32.mrb[20].mxu0  ;;  %v605_v24 = vpop.f32.mrb[21].mxu1 }
 0x123   : > { %1047 = vst [vmem:[%s1571_s17 + $0x98] sm:$0xff] %v1015_v20  ;;  %v919_v25 = vadd.f32 %v1324_v23, %v1276_v21  ;;  %v910_v26 = vpop.f32.mrb[21].mxu0  ;;  %v1277_v27 = vpop.f32.mrb[22].mxu1 }
 0x124   : > { %1045 = vst [vmem:[%s1571_s17 + $0x88] sm:$0xff] %v1013_v22  ;;  %v911_v28 = vadd.f32 %v910_v26, %v605_v24  ;;  %v1325_v29 = vpop.f32.mrb[22].mxu0  ;;  %v608_v30 = vpop.f32.mrb[23].mxu1 }
 0x125   : > { %v986_v31 = vadd.f32 %v1564_v50, %v919_v25  ;;  %v922_v32 = vadd.f32 %v1325_v29, %v1277_v27  ;;  %v913_v33 = vpop.f32.mrb[23].mxu0 }
 0x126   : > { %v984_v34 = vadd.f32 %v1564_v50, %v911_v28  ;;  %v914_v35 = vadd.f32 %v913_v33, %v608_v30 }
 0x127   : > { %v1018_v36 = vmax.f32 %v986_v31, 0.0  ;;  %v987_v37 = vadd.f32 %v1564_v50, %v922_v32 }
 0x128   : > { %v1016_v38 = vmax.f32 %v984_v34, 0.0  ;;  %v985_v39 = vadd.f32 %v1564_v50, %v914_v35 }
 0x129   : > { %1050 = vst [vmem:[%s1571_s17 + $0xb0] sm:$0xff] %v1018_v36  ;;  %v1019_v40 = vmax.f32 %v987_v37, 0.0  ;;  %v1280_v41 = vpop.f32.mrb[24].mxu1 }
 0x12a   : > { %1048 = vst [vmem:[%s1571_s17 + $0xa0] sm:$0xff] %v1016_v38  ;;  %v1017_v42 = vmax.f32 %v985_v39, 0.0  ;;  %v1328_v43 = vpop.f32.mrb[24].mxu0  ;;  %v621_v44 = vpop.f32.mrb[25].mxu1 }
 0x12b   : > { %1051 = vst [vmem:[%s1571_s17 + $0xb8] sm:$0xff] %v1019_v40  ;;  %v935_v45 = vadd.f32 %v1328_v43, %v1280_v41  ;;  %v926_v46 = vpop.f32.mrb[25].mxu0  ;;  %v1281_v47 = vpop.f32.mrb[26].mxu1 }
 0x12c   : > { %1049 = vst [vmem:[%s1571_s17 + $0xa8] sm:$0xff] %v1017_v42  ;;  %v927_v48 = vadd.f32 %v926_v46, %v621_v44  ;;  %v1329_v49 = vpop.f32.mrb[26].mxu0  ;;  %v624_v51 = vpop.f32.mrb[27].mxu1 }
 0x12d   : > { %v990_v52 = vadd.f32 %v1564_v50, %v935_v45  ;;  %v938_v53 = vadd.f32 %v1329_v49, %v1281_v47  ;;  %v929_v54 = vpop.f32.mrb[27].mxu0 }
 0x12e   : > { %v988_v55 = vadd.f32 %v1564_v50, %v927_v48  ;;  %v930_v56 = vadd.f32 %v929_v54, %v624_v51 }
 0x12f   : > { %v1022_v57 = vmax.f32 %v990_v52, 0.0  ;;  %v991_v58 = vadd.f32 %v1564_v50, %v938_v53 }
 0x130   : > { %v1020_v59 = vmax.f32 %v988_v55, 0.0  ;;  %v989_v60 = vadd.f32 %v1564_v50, %v930_v56 }
 0x131   : > { %1054 = vst [vmem:[%s1571_s17 + $0xd0] sm:$0xff] %v1022_v57  ;;  %v1023_v61 = vmax.f32 %v991_v58, 0.0  ;;  %v1284_v62 = vpop.f32.mrb[28].mxu1 }
 0x132   : > { %1052 = vst [vmem:[%s1571_s17 + $0xc0] sm:$0xff] %v1020_v59  ;;  %v1021_v63 = vmax.f32 %v989_v60, 0.0  ;;  %v1332_v0 = vpop.f32.mrb[28].mxu0  ;;  %v637_v1 = vpop.f32.mrb[29].mxu1 }
 0x133   : > { %1055 = vst [vmem:[%s1571_s17 + $0xd8] sm:$0xff] %v1023_v61  ;;  %v951_v2 = vadd.f32 %v1332_v0, %v1284_v62  ;;  %v942_v3 = vpop.f32.mrb[29].mxu0  ;;  %v1285_v4 = vpop.f32.mrb[30].mxu1 }
 0x134   : > { %1053 = vst [vmem:[%s1571_s17 + $0xc8] sm:$0xff] %v1021_v63  ;;  %v943_v5 = vadd.f32 %v942_v3, %v637_v1  ;;  %v1333_v6 = vpop.f32.mrb[30].mxu0  ;;  %v640_v7 = vpop.f32.mrb[31].mxu1 }
 0x135   : > { %v994_v8 = vadd.f32 %v1564_v50, %v951_v2  ;;  %v954_v9 = vadd.f32 %v1333_v6, %v1285_v4  ;;  %v945_v10 = vpop.f32.mrb[31].mxu0 }
 0x136   : > { %v992_v11 = vadd.f32 %v1564_v50, %v943_v5  ;;  %v946_v12 = vadd.f32 %v945_v10, %v640_v7 }
 0x137   : > { %v1026_v13 = vmax.f32 %v994_v8, 0.0  ;;  %v995_v14 = vadd.f32 %v1564_v50, %v954_v9 }
 0x138   : > { %v1024_v15 = vmax.f32 %v992_v11, 0.0  ;;  %v993_v16 = vadd.f32 %v1564_v50, %v946_v12 }
 0x139   : > { %1058 = vst [vmem:[%s1571_s17 + $0xf0] sm:$0xff] %v1026_v13  ;;  %v1027_v17 = vmax.f32 %v995_v14, 0.0 }
 0x13a   : > { %1056 = vst [vmem:[%s1571_s17 + $0xe0] sm:$0xff] %v1024_v15  ;;  %v1025_v18 = vmax.f32 %v993_v16, 0.0 }
 0x13b   : > { %1059 = vst [vmem:[%s1571_s17 + $0xf8] sm:$0xff] %v1027_v17 }
 0x13c   : > { %1057 = vst [vmem:[%s1571_s17 + $0xe8] sm:$0xff] %v1025_v18 }
 0x13d PF: > { %s15_s18 = sadd.s32 1, %s1428_s18  }
 0x13e   : > { %p12_p4 = scmp.ge.s32.totalorder %s15_s18, 4  }
 0x140   :  { %14 = sbr.rel (!%p12_p4) target bundleno = 1 (0x1), region = 73 }

// kernel: sparse_bottleneck_forward.4
= control target key start
LH: loop header
LB: loop body
LE: loop exit
PB: predicated region body
PF: predicated region fallthrough
CT: control target
= control target key end

     0   :  { %s4043_s12 = smov 0   ;;  %s4045_s13 = smov 0   ;;  %s5154_s0 = inlined_call_operand.vmem [shape: bf16[2,16,16,128], index: 0, kind: input, shape index: {}]   ;;  %s5155_s1 = inlined_call_operand.vmem [shape: bf16[3,384,128], index: 1, kind: input, shape index: {}]   ;;  %s5156_s2 = inlined_call_operand.vmem [shape: f32[1,128], index: 2, kind: input, shape index: {}]   ;;  %s5157_s3 = inlined_call_operand.vmem [shape: bf16[2,16,16,128], index: 3, kind: output, shape index: {}]  }
   0x1   :  { %s4047_s14 = smov 0  }
   0x2 LB: > { %s25_s15 = sadd.s32 1, %s4016_s13  ;;  %p2800_p0 = scmp.ge.s32.totalorder %s4020_s14, 1  ;;  %s4020_s14 = sphi %s4047_s14, %s13_s14   ;;  %s4016_s13 = sphi %s4045_s13, %s5191_s13   ;;  %s4012_s12 = sphi %s4043_s12, %s5190_s12  }
   0x3   : > { %p27_p1 = scmp.ge.s32.totalorder %s25_s15, 2  ;;  %p151_p2 = scmp.lt.s32.totalorder %s4020_s14, 3 }
   0x5   : > { %s5193_s15 = smov (%p27_p1, %s25_s15), 0  ;;  %p152_p3 = pnand %p2800_p0, %p151_p2 }
   0x7   : > { %155 = sbr.rel (%p152_p3) target bundleno = 561 (0x231), region = 32 }
   0xe   : > { %v3910_v0 = vld [vmem:[%s5155_s1 + $0x100] sm:$0xff]   ;;  %v3913_v3 = vld [vmem:[%s5155_s1 + $0x108] sm:$0xff]   ;;  %v3916_v6 = vld [vmem:[%s5155_s1 + $0x110] sm:$0xff]   ;;  %p180_p4 = scmp.lt.s32.totalorder %s4012_s12, 1  ;;  %v4022_v18 = vmov 0   ;;  %vm513_vm0 = vcmask 1040384  }
   0xf   : > { %v4069_v1 = vld [vmem:[%s5155_s1 + $0x140] sm:$0xff]   ;;  %3157 = vmatprep.subr.bf16.mxu0 %v3910_v0  ;;  %v4082_v4 = vld [vmem:[%s5155_s1 + $0x148] sm:$0xff]   ;;  %v4094_v7 = vld [vmem:[%s5155_s1 + $0x150] sm:$0xff]   ;;  %v4143_v19 = vcombine.low %v4022_v18, %v4022_v18  ;;  %vm514_vm1 = vsmask.f32 256  ;;  %vm793_vm2 = vcmask 1046528  }
  0x10   : > { %v3912_v2 = vld [vmem:[%s5155_s1 + $0xc0] sm:$0xff]   ;;  %3709 = vmatprep.subr.bf16.mxu1 %v4069_v1  ;;  %v3915_v5 = vld [vmem:[%s5155_s1 + $0xc8] sm:$0xff]   ;;  %v3918_v8 = vld [vmem:[%s5155_s1 + $0xd0] sm:$0xff]   ;;  %s5195_s12 = smov (!%p180_p4, %s4012_s12), 1  ;;  %vm552_vm4 = vsmask.f32 7424 }
  0x11   : > { %3158 = vmatpush3.bf16.msra.mxu0 %v3912_v2  ;;  %3717 = vmatpush3.bf16.msra.mxu1 %v4069_v1  ;;  %v3919_v9 = vld [vmem:[%s5155_s1 + $0x118] sm:$0xff]   ;;  %v3922_v12 = vld [vmem:[%s5155_s1 + $0x120] sm:$0xff]   ;;  %v3925_v15 = vld [vmem:[%s5155_s1 + $0x128] sm:$0xff]   ;;  %s3028_s27 = sshll.u32 %s5195_s12, 7  ;;  %v352_v23 = vshrl.u32 %v4143_v19, 16  ;;  %v355_v30 = vshll.u32 %v4143_v19, 16 }
  0x12   : > { %3159 = vmatprep.subr.bf16.mxu0 %v3913_v3  ;;  %3710 = vmatprep.subr.bf16.mxu1 %v4082_v4  ;;  %v4107_v10 = vld [vmem:[%s5155_s1 + $0x158] sm:$0xff]   ;;  %v4121_v13 = vld [vmem:[%s5155_s1 + $0x160] sm:$0xff]   ;;  %v4137_v16 = vld [vmem:[%s5155_s1 + $0x168] sm:$0xff]   ;;  %s4160_s9 = scalar_lea.vmem %s5154_s0, %s3028_s27 }
  0x13   : > { %v3921_v11 = vld [vmem:[%s5155_s1 + $0xd8] sm:$0xff]   ;;  %v3924_v14 = vld [vmem:[%s5155_s1 + $0xe0] sm:$0xff]   ;;  %v3927_v17 = vld [vmem:[%s5155_s1 + $0xe8] sm:$0xff]   ;;  %v4180_v32 = vrot.slane %v352_v23, 7 }
  0x14   : > { %v3928_v20 = vld [vmem:[%s5155_s1 + $0x130] sm:$0xff]   ;;  %v3934_v24 = vld [vmem:[%s4160_s9] sm:$0xff]   ;;  %v3931_v25 = vld [vmem:[%s5155_s1 + $0x138] sm:$0xff]  }
  0x15   : > { %3160 = vmatpush3.bf16.msra.mxu0 %v3915_v5  ;;  %3718 = vmatpush3.bf16.msra.mxu1 %v4082_v4  ;;  %v4153_v21 = vld [vmem:[%s5155_s1 + $0x170] sm:$0xff]   ;;  %v4175_v26 = vld [vmem:[%s5155_s1 + $0x178] sm:$0xff]   ;;  %v359_v27 = vshrl.u32 %v3934_v24, 16  ;;  %v362_v28 = vshll.u32 %v3934_v24, 16  ;;  %v3935_v29 = vld [vmem:[%s4160_s9 + $0x40] sm:$0xff]   ;;  %v357_v5 = vor.u32 %v355_v30, %v4180_v32 }
  0x16   : > { %3161 = vmatprep.subr.bf16.mxu0 %v3916_v6  ;;  %3711 = vmatprep.subr.bf16.mxu1 %v4094_v7  ;;  %v3930_v22 = vld [vmem:[%s5155_s1 + $0xf0] sm:$0xff]   ;;  %v3936_v31 = vld [vmem:[%s4160_s9 + $0x48] sm:$0xff]   ;;  %v3933_v33 = vld [vmem:[%s5155_s1 + $0xf8] sm:$0xff]   ;;  %v415_v36 = vshrl.u32 %v3935_v29, 16  ;;  %v418_v37 = vshll.u32 %v3935_v29, 16 }
  0x17   : > { %v361_v34 = vrot.slane %v359_v27, 7  ;;  %vm4187_vm3 = vmand %vm513_vm0, %vm514_vm1  ;;  %v422_v38 = vshrl.u32 %v3936_v31, 16  ;;  %v3937_v39 = vld [vmem:[%s5155_s1 + $0x40] sm:$0xff]   ;;  %v425_v43 = vshll.u32 %v3936_v31, 16  ;;  %v3941_v53 = vld [vmem:[%s4160_s9 + $0x8] sm:$0xff]  }
  0x18   : > { %v417_v42 = vrot.slane %v415_v36, 7  ;;  %v3938_v60 = vld [vmem:[%s5155_s1] sm:$0xff]   ;;  %v366_v61 = vshrl.u32 %v3941_v53, 16  ;;  %v3939_v63 = vld [vmem:[%s5155_s1 + $0x48] sm:$0xff]   ;;  %v369_v0 = vshll.u32 %v3941_v53, 16  ;;  %v3942_v2 = vld [vmem:[%s4160_s9 + $0x50] sm:$0xff]  }
  0x19   : > { %3162 = vmatpush3.bf16.msra.mxu0 %v3918_v8  ;;  %3719 = vmatpush3.bf16.msra.mxu1 %v4094_v7  ;;  %v364_v40 = vor.u32 %v362_v28, %v361_v34  ;;  %v4197_v41 = vsel %vm4187_vm3, %v361_v34, 0  ;;  %v424_v45 = vrot.slane %v422_v38, 7  ;;  %v3943_v3 = vld [vmem:[%s4160_s9 + $0x58] sm:$0xff]   ;;  %v3940_v27 = vld [vmem:[%s5155_s1 + $0x8] sm:$0xff]   ;;  %v4271_v34 = vsel %vm4187_vm3, 0, %v357_v5 }
  0x1a   : > { %3163 = vmatprep.subr.bf16.mxu0 %v3919_v9  ;;  %3712 = vmatprep.subr.bf16.mxu1 %v4107_v10  ;;  %v573_v44 = vshll.u32 %v4197_v41, 16  ;;  %v420_v47 = vor.u32 %v418_v37, %v417_v42  ;;  %v4207_v48 = vsel %vm4187_vm3, %v417_v42, 0 }
  0x1b   : > { %v4203_v46 = vsel %vm4187_vm3, 0, %v364_v40  ;;  %v822_v52 = vrot.slane %v4207_v48, 1  ;;  %v427_v55 = vor.u32 %v425_v43, %v424_v45  ;;  %v4220_v56 = vsel %vm4187_vm3, %v424_v45, 0  ;;  %v3945_v45 = vld [vmem:[%s5155_s1 + $0x10] sm:$0xff]  }
  0x1c   : > { %v566_v49 = vshrl.u32 %v4203_v46, 16  ;;  %v568_v50 = vshll.u32 %v4203_v46, 16  ;;  %v575_v51 = vrot.slane %v573_v44, 1  ;;  %v4216_v54 = vsel %vm4187_vm3, 0, %v420_v47 }
  0x1d   : > { %3164 = vmatpush3.bf16.msra.mxu0 %v3921_v11  ;;  %3720 = vmatpush3.bf16.msra.mxu1 %v4107_v10  ;;  %v821_v58 = vrot.slane %v4216_v54, 1  ;;  %v825_v59 = vrot.slane %v4220_v56, 1  ;;  %v4229_v62 = vsel %vm4187_vm3, 0, %v427_v55  ;;  %v368_v11 = vrot.slane %v366_v61, 7 }
  0x1e   : > { %3165 = vmatprep.subr.bf16.mxu0 %v3922_v12  ;;  %3713 = vmatprep.subr.bf16.mxu1 %v4121_v13  ;;  %v570_v57 = vrot.slane %v568_v50, 1  ;;  %v824_v9 = vrot.slane %v4229_v62, 1  ;;  %v429_v12 = vshrl.u32 %v3942_v2, 16  ;;  %v3946_v50 = vld [vmem:[%s5155_s1 + $0x58] sm:$0xff]   ;;  %v681_v35 = vshll.u32 %v4220_v56, 16 }
  0x1f   : > { %v4238_v8 = vsel %vm793_vm2, %v821_v58, %v822_v52 }
  0x20   : > { %v571_v6 = vor.u32 %v570_v57, %v566_v49  ;;  %3597 = vmatprep.mubr.bf16.mxu1 %v4238_v8  ;;  %v4246_v19 = vsel %vm793_vm2, %v824_v9, %v825_v59  ;;  %v431_v24 = vrot.slane %v429_v12, 7  ;;  %v3949_v57 = vld [vmem:[%s4160_s9 + $0x60] sm:$0xff]   ;;  %v3947_v9 = vld [vmem:[%s5155_s1 + $0x18] sm:$0xff]  }
  0x21   : > { %3166 = vmatpush3.bf16.msra.mxu0 %v3924_v14  ;;  %3721 = vmatpush3.bf16.msra.mxu1 %v4121_v13  ;;  %v432_v14 = vshll.u32 %v3942_v2, 16  ;;  %v446_v2 = vshll.u32 %v3949_v57, 16 }
  0x22   : > { %3167 = vmatprep.subr.bf16.mxu0 %v3925_v15  ;;  %3714 = vmatprep.subr.bf16.mxu1 %v4137_v16  ;;  %v436_v15 = vshrl.u32 %v3943_v3, 16  ;;  %v4243_v18 = vsel %vm552_vm4, %v571_v6, %v575_v51  ;;  %v4275_v37 = vsel %vm4187_vm3, %v431_v24, 0 }
  0x23   : > { %1150 = vmatprep.mubr.bf16.mxu0 %v4243_v18  ;;  %v434_v31 = vor.u32 %v432_v14, %v431_v24  ;;  %v828_v43 = vrot.slane %v4275_v37, 1  ;;  %v3951_v14 = vld [vmem:[%s5155_s1 + $0x60] sm:$0xff]  }
  0x25   : > { %3168 = vmatpush3.bf16.msra.mxu0 %v3927_v17  ;;  %3722 = vmatpush3.bf16.msra.mxu1 %v4137_v16  ;;  %v439_v17 = vshll.u32 %v3943_v3, 16  ;;  %v4285_v42 = vsel %vm4187_vm3, 0, %v434_v31 }
  0x26   : > { %3169 = vmatprep.subr.bf16.mxu0 %v3928_v20  ;;  %3715 = vmatprep.subr.bf16.mxu1 %v4153_v21  ;;  %v371_v20 = vor.u32 %v369_v0, %v368_v11  ;;  %v827_v47 = vrot.slane %v4285_v42, 1  ;;  %v443_v0 = vshrl.u32 %v3949_v57, 16 }
  0x28   : > { %v4261_v28 = vsel %vm4187_vm3, 0, %v371_v20  ;;  %v4304_v58 = vsel %vm793_vm2, %v827_v47, %v828_v43  ;;  %v445_v12 = vrot.slane %v443_v0, 7 }
  0x29   : > { %3170 = vmatpush3.bf16.msra.mxu0 %v3930_v22  ;;  %3723 = vmatpush3.bf16.msra.mxu1 %v4153_v21  ;;  %v4250_v22 = vsel %vm4187_vm3, %v368_v11, 0  ;;  %v578_v29 = vshrl.u32 %v4261_v28, 16  ;;  %v580_v30 = vshll.u32 %v4261_v28, 16  ;;  %5172 = vst [vmem:[#allocation2_spill] sm:$0xff] %v4304_v58 }
  0x2a   : > { %3171 = vmatprep.subr.bf16.mxu0 %v3931_v25  ;;  %3716 = vmatprep.subr.bf16.mxu1 %v4175_v26  ;;  %v585_v23 = vshll.u32 %v4250_v22, 16  ;;  %v438_v25 = vrot.slane %v436_v15, 7 }
  0x2b   : > { %v582_v40 = vrot.slane %v580_v30, 1 }
  0x2c   : > { %v587_v36 = vrot.slane %v585_v23, 1  ;;  %v4279_v38 = vsel %vm4187_vm3, %v438_v25, 0 }
  0x2d   : > { %3172 = vmatpush3.bf16.msra.mxu0 %v3933_v33  ;;  %3724 = vmatpush3.bf16.msra.mxu1 %v4175_v26  ;;  %v3944_v33 = vld [vmem:[%s5155_s1 + $0x50] sm:$0xff]   ;;  %v831_v44 = vrot.slane %v4279_v38, 1  ;;  %v583_v53 = vor.u32 %v582_v40, %v578_v29  ;;  %v4342_v29 = vsel %vm4187_vm3, %v445_v12, 0 }
  0x2e   : > { %3565 = vmatprep.subr.bf16.mxu0 %v4069_v1  ;;  %3293 = vmatprep.subr.bf16.mxu1 %v3937_v39  ;;  %v3948_v39 = vld [vmem:[%s4160_s9 + $0x10] sm:$0xff]  }
  0x2f   : > { %v373_v51 = vshrl.u32 %v3948_v39, 16  ;;  %v376_v52 = vshll.u32 %v3948_v39, 16  ;;  %v4309_v61 = vsel %vm552_vm4, %v583_v53, %v587_v36  ;;  %v834_v36 = vrot.slane %v4342_v29, 1  ;;  %v3953_v39 = vld [vmem:[%s5155_s1 + $0x68] sm:$0xff]  }
  0x30   : > { %3598 = vmatmul.mubr.bf16.vlgmr.msra.gmra.mrb[0].mxu1 %v4246_v19  ;;  %1151 = vmatmul.mubr.bf16.vlgmr.msra.gmra.mrb[0].mxu0 %v4203_v46  ;;  %v3954_v53 = vld [vmem:[%s5155_s1 + $0x28] sm:$0xff]  }
  0x31   : > { %3294 = vmatpush3.bf16.msra.mxu1 %v3938_v60  ;;  %3566 = vmatpush3.bf16.msra.mxu0 %v4069_v1  ;;  %v441_v1 = vor.u32 %v439_v17, %v438_v25  ;;  %v375_v59 = vrot.slane %v373_v51, 7  ;;  %v3950_v60 = vld [vmem:[%s4160_s9 + $0x68] sm:$0xff]   ;;  %v448_v25 = vor.u32 %v446_v2, %v445_v12  ;;  %v3957_v51 = vld [vmem:[%s4160_s9 + $0x78] sm:$0xff]   ;;  %v3959_v12 = vld [vmem:[%s5155_s1 + $0x30] sm:$0xff]  }
  0x32   : > { %3295 = vmatprep.subr.bf16.mxu1 %v3939_v63  ;;  %3567 = vmatprep.subr.bf16.mxu0 %v4082_v4  ;;  %v450_v5 = vshrl.u32 %v3950_v60, 16  ;;  %v453_v6 = vshll.u32 %v3950_v60, 16  ;;  %v464_v2 = vshrl.u32 %v3957_v51, 16 }
  0x33   : > { %v4295_v49 = vsel %vm4187_vm3, 0, %v441_v1  ;;  %3601 = vmatprep.mubr.bf16.mxu1 %v4304_v58  ;;  %1158 = vmatprep.mubr.bf16.mxu0 %v4309_v61  ;;  %v4319_v3 = vsel %vm4187_vm3, %v375_v59, 0 }
  0x34   : > { %v830_v55 = vrot.slane %v4295_v49, 1  ;;  %v597_v11 = vshll.u32 %v4319_v3, 16  ;;  %v452_v17 = vrot.slane %v450_v5, 7 }
  0x35   : > { %3296 = vmatpush3.bf16.msra.mxu1 %v3940_v27  ;;  %3568 = vmatpush3.bf16.msra.mxu0 %v4082_v4  ;;  %v378_v4 = vor.u32 %v376_v52, %v375_v59  ;;  %v3952_v27 = vld [vmem:[%s5155_s1 + $0x20] sm:$0xff]  }
  0x36   : > { %3297 = vmatprep.subr.bf16.mxu1 %v3944_v33  ;;  %3569 = vmatprep.subr.bf16.mxu0 %v4094_v7  ;;  %v4313_v63 = vsel %vm793_vm2, %v830_v55, %v831_v44  ;;  %v599_v24 = vrot.slane %v597_v11, 1  ;;  %v455_v30 = vor.u32 %v453_v6, %v452_v17  ;;  %v4350_v33 = vsel %vm4187_vm3, 0, %v448_v25  ;;  %v3955_v44 = vld [vmem:[%s4160_s9 + $0x18] sm:$0xff]  }
  0x37   : > { %5173 = vst [vmem:[#allocation3_spill] sm:$0xff] %v4313_v63  ;;  %v4331_v15 = vsel %vm4187_vm3, 0, %v378_v4  ;;  %v833_v40 = vrot.slane %v4350_v33, 1  ;;  %v380_v55 = vshrl.u32 %v3955_v44, 16  ;;  %v383_v57 = vshll.u32 %v3955_v44, 16 }
  0x38   : > { %3602 = vmatmul.mubr.bf16.gmra.mrb[4].mxu1 %v4313_v63  ;;  %1159 = vmatmul.mubr.bf16.gmra.mrb[4].mxu0 %v4261_v28  ;;  %v590_v20 = vshrl.u32 %v4331_v15, 16  ;;  %v592_v23 = vshll.u32 %v4331_v15, 16  ;;  %v4360_v43 = vsel %vm4187_vm3, 0, %v455_v30  ;;  %v467_v6 = vshll.u32 %v3957_v51, 16 }
  0x39   : > { %3298 = vmatpush3.bf16.msra.mxu1 %v3945_v45  ;;  %3570 = vmatpush3.bf16.msra.mxu0 %v4094_v7  ;;  %v4346_v7 = vsel %vm4187_vm3, %v452_v17, 0  ;;  %v3956_v45 = vld [vmem:[%s4160_s9 + $0x70] sm:$0xff]   ;;  %v4369_v52 = vsel %vm793_vm2, %v833_v40, %v834_v36  ;;  %v382_v4 = vrot.slane %v380_v55, 7  ;;  %v466_v11 = vrot.slane %v464_v2, 7 }
  0x3a   : > { %3299 = vmatprep.subr.bf16.mxu1 %v3946_v50  ;;  %3571 = vmatprep.subr.bf16.mxu0 %v4107_v10  ;;  %v594_v31 = vrot.slane %v592_v23, 1  ;;  %v837_v1 = vrot.slane %v4346_v7, 1  ;;  %v836_v50 = vrot.slane %v4360_v43, 1  ;;  %5174 = vst [vmem:[#allocation4_spill] sm:$0xff] %v4369_v52  ;;  %v457_v59 = vshrl.u32 %v3956_v45, 16 }
  0x3b   : > { %3605 = vmatprep.mubr.bf16.mxu1 %v4369_v52  ;;  %v460_v0 = vshll.u32 %v3956_v45, 16  ;;  %v4392_v17 = vsel %vm4187_vm3, %v382_v4, 0  ;;  %v4403_v30 = vsel %vm4187_vm3, %v466_v11, 0 }
  0x3c   : > { %v595_v47 = vor.u32 %v594_v31, %v590_v20  ;;  %v459_v5 = vrot.slane %v457_v59, 7  ;;  %v3960_v31 = vld [vmem:[%s5155_s1 + $0x78] sm:$0xff]  }
  0x3d   : > { %3300 = vmatpush3.bf16.msra.mxu1 %v3947_v9  ;;  %3572 = vmatpush3.bf16.msra.mxu0 %v4107_v10  ;;  %v4379_v10 = vsel %vm793_vm2, %v836_v50, %v837_v1  ;;  %v3958_v9 = vld [vmem:[%s5155_s1 + $0x70] sm:$0xff]   ;;  %v922_v1 = vrot.slane %v4403_v30, 1  ;;  %v3961_v50 = vld [vmem:[%s5155_s1 + $0x38] sm:$0xff]  }
  0x3e   : > { %3301 = vmatprep.subr.bf16.mxu1 %v3951_v14  ;;  %3573 = vmatprep.subr.bf16.mxu0 %v4121_v13  ;;  %v4375_v60 = vsel %vm552_vm4, %v595_v47, %v599_v24  ;;  %5175 = vst [vmem:[#allocation5_spill] sm:$0xff] %v4379_v10  ;;  %v385_v14 = vor.u32 %v383_v57, %v382_v4  ;;  %v4396_v23 = vsel %vm4187_vm3, %v459_v5, 0  ;;  %v609_v24 = vshll.u32 %v4392_v17, 16 }
  0x3f   : > { %1166 = vmatprep.mubr.bf16.mxu0 %v4375_v60  ;;  %v462_v20 = vor.u32 %v460_v0, %v459_v5  ;;  %v840_v25 = vrot.slane %v4396_v23, 1  ;;  %v4432_v57 = vsel %vm4187_vm3, %v4180_v32, 0  ;;  %v554_v4 = vshrl.u32 %v4271_v34, 16  ;;  %v3963_v5 = vld [vmem:[%s5155_s1 + $0x80] sm:$0xff]  }
  0x40   : > { %3606 = vmatmul.mubr.bf16.gmra.mrb[8].mxu1 %v4379_v10  ;;  %1167 = vmatmul.mubr.bf16.gmra.mrb[8].mxu0 %v4331_v15  ;;  %v4411_v36 = vsel %vm4187_vm3, 0, %v385_v14  ;;  %v611_v45 = vrot.slane %v609_v24, 1  ;;  %v556_v32 = vshll.u32 %v4271_v34, 16 }
  0x41   : > { %3302 = vmatpush3.bf16.msra.mxu1 %v3952_v27  ;;  %3574 = vmatpush3.bf16.msra.mxu0 %v4121_v13  ;;  %v469_v27 = vor.u32 %v467_v6, %v466_v11  ;;  %v4415_v13 = vsel %vm4187_vm3, 0, %v462_v20  ;;  %v602_v40 = vshrl.u32 %v4411_v36, 16  ;;  %v604_v44 = vshll.u32 %v4411_v36, 16 }
  0x42   : > { %3303 = vmatprep.subr.bf16.mxu1 %v3953_v39  ;;  %3575 = vmatprep.subr.bf16.mxu0 %v4137_v16  ;;  %v3962_v39 = vld [vmem:[%s4160_s9 + $0x20] sm:$0xff]   ;;  %v839_v47 = vrot.slane %v4415_v13, 1  ;;  %v561_v6 = vshll.u32 %v4432_v57, 16  ;;  %v558_v24 = vrot.slane %v556_v32, 1 }
  0x43   : > { %v4427_v51 = vsel %vm4187_vm3, 0, %v469_v27  ;;  %v390_v55 = vshll.u32 %v3962_v39, 16  ;;  %v606_v59 = vrot.slane %v604_v44, 1  ;;  %v3965_v27 = vld [vmem:[%s4160_s9 + $0x30] sm:$0xff]  }
  0x44   : > { %v4436_v0 = vsel %vm793_vm2, %v839_v47, %v840_v25  ;;  %v921_v2 = vrot.slane %v4427_v51, 1  ;;  %v563_v25 = vrot.slane %v561_v6, 1  ;;  %v559_v47 = vor.u32 %v558_v24, %v554_v4 }
  0x45   : > { %3304 = vmatpush3.bf16.msra.mxu1 %v3954_v53  ;;  %v387_v53 = vshrl.u32 %v3962_v39, 16  ;;  %3576 = vmatpush3.bf16.msra.mxu0 %v4137_v16  ;;  %5176 = vst [vmem:[#allocation6_spill] sm:$0xff] %v4436_v0  ;;  %v607_v11 = vor.u32 %v606_v59, %v602_v40  ;;  %v662_v24 = vshrl.u32 %v4216_v54, 16 }
  0x46   : > { %3305 = vmatprep.subr.bf16.mxu1 %v3958_v9  ;;  %3577 = vmatprep.subr.bf16.mxu0 %v4153_v21  ;;  %v3964_v9 = vld [vmem:[%s4160_s9 + $0x28] sm:$0xff]  }
  0x47   : > { %3609 = vmatprep.mubr.bf16.mxu1 %v4436_v0  ;;  %v389_v16 = vrot.slane %v387_v53, 7  ;;  %v394_v39 = vshrl.u32 %v3964_v9, 16  ;;  %v397_v40 = vshll.u32 %v3964_v9, 16  ;;  %v401_v53 = vshrl.u32 %v3965_v27, 16 }
  0x48   : > { %v676_v0 = vshll.u32 %v4229_v62, 16 }
  0x49   : > { %3306 = vmatpush3.bf16.msra.mxu1 %v3959_v12  ;;  %v4449_v12 = vsel %vm793_vm2, %v921_v2, %v922_v1  ;;  %v392_v14 = vor.u32 %v390_v55, %v389_v16  ;;  %v4454_v20 = vsel %vm4187_vm3, %v389_v16, 0  ;;  %3578 = vmatpush3.bf16.msra.mxu0 %v4153_v21  ;;  %v404_v21 = vshll.u32 %v3965_v27, 16  ;;  %v3967_v55 = vld [vmem:[%s4160_s9 + $0x38] sm:$0xff]   ;;  %s5060_s9 = scalar_lea.vmem %s5157_s3, %s3028_s27 }
  0x4a   : > { %3307 = vmatprep.subr.bf16.mxu1 %v3960_v31  ;;  %5177 = vst [vmem:[#allocation7_spill] sm:$0xff] %v4449_v12  ;;  %3610 = vmatmul.mubr.bf16.gmra.mrb[12].mxu1 %v4449_v12  ;;  %v4459_v31 = vsel %vm552_vm4, %v607_v11, %v611_v45  ;;  %v621_v1 = vshll.u32 %v4454_v20, 16  ;;  %v396_v2 = vrot.slane %v394_v39, 7  ;;  %v4473_v16 = vsel %vm552_vm4, %v559_v47, %v563_v25 }
  0x4b   : > { %3579 = vmatprep.subr.bf16.mxu0 %v4175_v26  ;;  %1174 = vmatprep.mubr.bf16.mxu0 %v4459_v31  ;;  %v4466_v44 = vsel %vm4187_vm3, 0, %v392_v14  ;;  %5178 = vst [vmem:[#allocation8_spill] sm:$0xff] %v4473_v16  ;;  %v403_v32 = vrot.slane %v401_v53, 7  ;;  %v408_v6 = vshrl.u32 %v3967_v55, 16  ;;  %v411_v9 = vshll.u32 %v3967_v55, 16 }
  0x4c   : > { %1175 = vmatmul.mubr.bf16.gmra.mrb[12].mxu0 %v4411_v36  ;;  %v614_v45 = vshrl.u32 %v4466_v44, 16  ;;  %v623_v59 = vrot.slane %v621_v1, 1  ;;  %1616 = vmatprep.mubr.bf16.mxu1 %v4473_v16  ;;  %v399_v11 = vor.u32 %v397_v40, %v396_v2  ;;  %v4479_v14 = vsel %vm4187_vm3, %v396_v2, 0  ;;  %v3972_v16 = vld [vmem:[%s5155_s1 + $0x1c0] sm:$0xff]  }
  0x4d   : > { %3308 = vmatpush3.bf16.msra.mxu1 %v3961_v50  ;;  %v616_v50 = vshll.u32 %v4466_v44, 16  ;;  %3580 = vmatpush3.bf16.msra.mxu0 %v4175_v26  ;;  %v633_v27 = vshll.u32 %v4479_v14, 16  ;;  %v406_v1 = vor.u32 %v404_v21, %v403_v32  ;;  %v4485_v25 = vsel %vm4187_vm3, %v403_v32, 0  ;;  %v3966_v26 = vld [vmem:[%s5155_s1 + $0x88] sm:$0xff]  }
  0x4e   : > { %3613 = vmatprep.subr.bf16.mxu1 %v3963_v5  ;;  %v410_v39 = vrot.slane %v408_v6, 7  ;;  %v4492_v40 = vsel %vm4187_vm3, 0, %v399_v11  ;;  %v645_v53 = vshll.u32 %v4485_v25, 16  ;;  %v664_v55 = vshll.u32 %v4216_v54, 16  ;;  %3429 = vmatprep.subr.bf16.mxu0 %v3972_v16 }
  0x4f   : > { %v618_v4 = vrot.slane %v616_v50, 1  ;;  %v626_v21 = vshrl.u32 %v4492_v40, 16  ;;  %v628_v50 = vshll.u32 %v4492_v40, 16  ;;  %v635_v2 = vrot.slane %v633_v27, 1 }
  0x50   : > { %v4501_v32 = vsel %vm4187_vm3, 0, %v406_v1  ;;  %v647_v11 = vrot.slane %v645_v53, 1  ;;  %v413_v1 = vor.u32 %v411_v9, %v410_v39  ;;  %v669_v12 = vshll.u32 %v4207_v48, 16 }
  0x51   : > { %v619_v47 = vor.u32 %v618_v4, %v614_v45  ;;  %v638_v6 = vshrl.u32 %v4501_v32, 16  ;;  %v640_v4 = vshll.u32 %v4501_v32, 16  ;;  %v630_v27 = vrot.slane %v628_v50, 1 }
  0x52   : > { %1617 = vmatmul.mubr.bf16.vlgmr.msra.gmra.mrb[16].mxu1 %v4271_v34  ;;  %v674_v50 = vshrl.u32 %v4229_v62, 16  ;;  %v671_v58 = vrot.slane %v669_v12, 1  ;;  %v678_v16 = vrot.slane %v676_v0, 1  ;;  %v683_v12 = vrot.slane %v681_v35, 1 }
  0x53   : > { %v4504_v45 = vsel %vm552_vm4, %v619_v47, %v623_v59  ;;  %3614 = vmatpush3.bf16.msra.mxu1 %v3963_v5  ;;  %1624 = vmatprep.mubr.bf16.mxu1 %v4243_v18  ;;  %v4515_v59 = vsel %vm4187_vm3, %v410_v39, 0  ;;  %v666_v5 = vrot.slane %v664_v55, 1  ;;  %v3968_v18 = vld [vmem:[%s5155_s1 + $0x90] sm:$0xff]   ;;  %v642_v47 = vrot.slane %v640_v4, 1 }
  0x54   : > { %1182 = vmatprep.mubr.bf16.mxu0 %v4504_v45  ;;  %3615 = vmatprep.subr.bf16.mxu1 %v3966_v26  ;;  %v657_v53 = vshll.u32 %v4515_v59, 16  ;;  %v631_v9 = vor.u32 %v630_v27, %v626_v21  ;;  %v4526_v39 = vsel %vm4187_vm3, 0, %v413_v1  ;;  %v679_v56 = vor.u32 %v678_v16, %v674_v50 }
  0x55   : > { %1183 = vmatmul.mubr.bf16.gmra.mrb[16].mxu0 %v4466_v44  ;;  %v667_v55 = vor.u32 %v666_v5, %v662_v24  ;;  %v643_v10 = vor.u32 %v642_v47, %v638_v6  ;;  %v650_v52 = vshrl.u32 %v4526_v39, 16  ;;  %v652_v4 = vshll.u32 %v4526_v39, 16  ;;  %v3969_v24 = vld [vmem:[%s5155_s1 + $0x98] sm:$0xff]  }
  0x56   : > { %v659_v63 = vrot.slane %v657_v53, 1  ;;  %v4532_v48 = vsel %vm552_vm4, %v631_v9, %v635_v2  ;;  %v686_v6 = vshrl.u32 %v4285_v42, 16  ;;  %v688_v2 = vshll.u32 %v4285_v42, 16 }
  0x57   : > { %3616 = vmatpush3.bf16.msra.mxu1 %v3966_v26  ;;  %1190 = vmatprep.mubr.bf16.mxu0 %v4532_v48  ;;  %v4540_v26 = vsel %vm552_vm4, %v643_v10, %v647_v11  ;;  %v654_v21 = vrot.slane %v652_v4, 1  ;;  %v4546_v0 = vsel %vm552_vm4, %v667_v55, %v671_v58  ;;  %v693_v27 = vshll.u32 %v4275_v37, 16  ;;  %v3970_v37 = vld [vmem:[%s5155_s1 + $0xa0] sm:$0xff]  }
  0x58   : > { %3617 = vmatprep.subr.bf16.mxu1 %v3968_v18  ;;  %v690_v10 = vrot.slane %v688_v2, 1  ;;  %v698_v11 = vshrl.u32 %v4295_v49, 16  ;;  %v700_v5 = vshll.u32 %v4295_v49, 16  ;;  %v4553_v47 = vsel %vm552_vm4, %v679_v56, %v683_v12 }
  0x59   : > { %v655_v1 = vor.u32 %v654_v21, %v650_v52  ;;  %v695_v53 = vrot.slane %v693_v27, 1  ;;  %v705_v58 = vshll.u32 %v4279_v38, 16  ;;  %v710_v50 = vshrl.u32 %v4350_v33, 16  ;;  %v3971_v21 = vld [vmem:[%s5155_s1 + $0xa8] sm:$0xff]  }
  0x5a   : > { %1625 = vmatmul.mubr.bf16.gmra.mrb[20].mxu1 %v4203_v46  ;;  %v702_v9 = vrot.slane %v700_v5, 1  ;;  %v712_v55 = vshll.u32 %v4350_v33, 16  ;;  %v717_v38 = vshll.u32 %v4342_v29, 16  ;;  %v722_v16 = vshrl.u32 %v4360_v43, 16 }
  0x5b   : > { %1632 = vmatprep.mubr.bf16.mxu1 %v4309_v61  ;;  %3618 = vmatpush3.bf16.msra.mxu1 %v3968_v18  ;;  %v4562_v52 = vsel %vm552_vm4, %v655_v1, %v659_v63  ;;  %v691_v18 = vor.u32 %v690_v10, %v686_v6  ;;  %v707_v4 = vrot.slane %v705_v58, 1  ;;  %v724_v35 = vshll.u32 %v4360_v43, 16 }
  0x5c   : > { %3619 = vmatprep.subr.bf16.mxu1 %v3969_v24  ;;  %v703_v6 = vor.u32 %v702_v9, %v698_v11  ;;  %v714_v2 = vrot.slane %v712_v55, 1  ;;  %v729_v56 = vshll.u32 %v4346_v7, 16  ;;  %v719_v12 = vrot.slane %v717_v38, 1 }
  0x5d   : > { %1191 = vmatmul.mubr.bf16.gmra.mrb[20].mxu0 %v4492_v40  ;;  %v4573_v63 = vsel %vm552_vm4, %v691_v18, %v695_v53  ;;  %v726_v27 = vrot.slane %v724_v35, 1  ;;  %v734_v29 = vshrl.u32 %v4415_v13, 16  ;;  %v736_v1 = vshll.u32 %v4415_v13, 16 }
  0x5e   : > { %1198 = vmatprep.mubr.bf16.mxu0 %v4540_v26  ;;  %v4579_v10 = vsel %vm552_vm4, %v703_v6, %v707_v4  ;;  %v715_v5 = vor.u32 %v714_v2, %v710_v50  ;;  %v731_v58 = vrot.slane %v729_v56, 1  ;;  %v741_v53 = vshll.u32 %v4396_v23, 16  ;;  %v3974_v23 = vld [vmem:[%s5155_s1 + $0xb0] sm:$0xff]  }
  0x5f   : > { %3620 = vmatpush3.bf16.msra.mxu1 %v3969_v24  ;;  %v727_v24 = vor.u32 %v726_v27, %v722_v16  ;;  %v738_v11 = vrot.slane %v736_v1, 1  ;;  %v907_v7 = vshrl.u32 %v4427_v51, 16  ;;  %v909_v18 = vshll.u32 %v4427_v51, 16 }
  0x60   : > { %3621 = vmatprep.subr.bf16.mxu1 %v3970_v37  ;;  %v4587_v9 = vsel %vm552_vm4, %v715_v5, %v719_v12  ;;  %v743_v55 = vrot.slane %v741_v53, 1  ;;  %v914_v50 = vshll.u32 %v4403_v30, 16  ;;  %v797_v4 = vrot.slane %v4203_v46, 1 }
  0x61   : > { %v4595_v38 = vsel %vm552_vm4, %v727_v24, %v731_v58  ;;  %v739_v16 = vor.u32 %v738_v11, %v734_v29  ;;  %v911_v35 = vrot.slane %v909_v18, 1  ;;  %v798_v6 = vrot.slane %v4197_v41, 1  ;;  %v3983_v41 = vld [vmem:[%s5155_s1 + $0xb8] sm:$0xff]   ;;  %v3973_v58 = vld [vmem:[%s5155_s1 + $0x180] sm:$0xff]  }
  0x62   : > { %1633 = vmatmul.mubr.bf16.gmra.mrb[24].mxu1 %v4261_v28  ;;  %v801_v12 = vrot.slane %v4250_v22, 1  ;;  %v800_v27 = vrot.slane %v4261_v28, 1  ;;  %v803_v29 = vrot.slane %v4331_v15, 1  ;;  %v804_v1 = vrot.slane %v4319_v3, 1  ;;  %v3975_v22 = vld [vmem:[%s5155_s1 + $0x1c8] sm:$0xff]  }
  0x63   : > { %1640 = vmatprep.mubr.bf16.mxu1 %v4375_v60  ;;  %3622 = vmatpush3.bf16.msra.mxu1 %v3970_v37  ;;  %v916_v37 = vrot.slane %v914_v50, 1  ;;  %v4601_v30 = vsel %vm552_vm4, %v739_v16, %v743_v55  ;;  %v912_v46 = vor.u32 %v911_v35, %v907_v7  ;;  %v4604_v2 = vsel %vm793_vm2, %v797_v4, %v798_v6  ;;  %v3976_v3 = vld [vmem:[%s5155_s1 + $0x188] sm:$0xff]   ;;  %v3977_v7 = vld [vmem:[%s5155_s1 + $0x1d0] sm:$0xff]   ;;  %v3981_v6 = vld [vmem:[%s5155_s1 + $0x1e0] sm:$0xff]  }
  0x64   : > { %3623 = vmatprep.subr.bf16.mxu1 %v3971_v21  ;;  %v4659_v5 = vsel %vm793_vm2, %v800_v27, %v801_v12  ;;  %v4669_v53 = vsel %vm793_vm2, %v803_v29, %v804_v1  ;;  %v806_v24 = vrot.slane %v4411_v36, 1  ;;  %v807_v11 = vrot.slane %v4392_v17, 1  ;;  %v3978_v4 = vld [vmem:[%s5155_s1 + $0x190] sm:$0xff]   ;;  %v3979_v17 = vld [vmem:[%s5155_s1 + $0x1d8] sm:$0xff]   ;;  %v3982_v12 = vld [vmem:[%s5155_s1 + $0x1a0] sm:$0xff]  }
  0x65   : > { %1199 = vmatmul.mubr.bf16.gmra.mrb[24].mxu0 %v4501_v32  ;;  %v4607_v56 = vsel %vm552_vm4, %v912_v46, %v916_v37  ;;  %v809_v18 = vrot.slane %v4466_v44, 1  ;;  %v810_v55 = vrot.slane %v4454_v20, 1  ;;  %v3980_v20 = vld [vmem:[%s5155_s1 + $0x198] sm:$0xff]   ;;  %v812_v16 = vrot.slane %v4492_v40, 1  ;;  %v3985_v1 = vld [vmem:[%s5155_s1 + $0x1a8] sm:$0xff]  }
  0x66   : > { %1206 = vmatprep.mubr.bf16.mxu0 %v4562_v52  ;;  %v4685_v50 = vsel %vm793_vm2, %v806_v24, %v807_v11  ;;  %v813_v35 = vrot.slane %v4479_v14, 1  ;;  %v815_v37 = vrot.slane %v4501_v32, 1  ;;  %v816_v46 = vrot.slane %v4485_v25, 1  ;;  %v3984_v14 = vld [vmem:[%s5155_s1 + $0x1e8] sm:$0xff]   ;;  %v3987_v11 = vld [vmem:[%s5155_s1 + $0x1b0] sm:$0xff]  }
  0x67   : > { %3624 = vmatpush3.bf16.msra.mxu1 %v3971_v21  ;;  %v4619_v21 = vld [vmem:[%s5155_s1 + $0x200] sm:$0xff]   ;;  %v794_v25 = vrot.slane %v4271_v34, 1  ;;  %v795_v29 = vrot.slane %v4432_v57, 1 }
  0x68   : > { %3625 = vmatprep.subr.bf16.mxu1 %v3974_v23  ;;  %v4721_v27 = vsel %vm793_vm2, %v815_v37, %v816_v46 }
  0x69   : > { %v4737_v57 = vsel %vm793_vm2, %v794_v25, %v795_v29 }
  0x6a   : > { %1641 = vmatmul.mubr.bf16.gmra.mrb[28].mxu1 %v4331_v15 }
  0x6b   : > { %1648 = vmatprep.mubr.bf16.mxu1 %v4459_v31  ;;  %3626 = vmatpush3.bf16.msra.mxu1 %v3974_v23  ;;  %v4695_v23 = vsel %vm793_vm2, %v809_v18, %v810_v55  ;;  %v3991_v18 = vld [vmem:[%s5155_s1 + $0x208] sm:$0xff]   ;;  %v3992_v55 = vld [vmem:[%s5155_s1 + $0x210] sm:$0xff]  }
  0x6c   : > { %3627 = vmatprep.subr.bf16.mxu1 %v3983_v41 }
  0x6d   : > { %1207 = vmatmul.mubr.bf16.gmra.mrb[28].mxu0 %v4526_v39 }
  0x6e   : > { %1214 = vmatprep.mubr.bf16.mxu0 %v4546_v0 }
  0x6f   : > { %3628 = vmatpush3.bf16.msra.mxu1 %v3983_v41  ;;  %v4711_v41 = vsel %vm793_vm2, %v812_v16, %v813_v35 }
  0x70   : > { %3661 = vmatprep.subr.bf16.mxu1 %v4619_v21 }
  0x72   : > { %1649 = vmatmul.mubr.bf16.gmra.mrb[32].mxu1 %v4411_v36 }
  0x73   : > { %1656 = vmatprep.mubr.bf16.mxu1 %v4504_v45 }
  0x75   : > { %1215 = vmatmul.mubr.bf16.gmra.mrb[32].mxu0 %v4216_v54 }
  0x76   : > { %1222 = vmatprep.mubr.bf16.mxu0 %v4553_v47 }
  0x7a   : > { %1657 = vmatmul.mubr.bf16.gmra.mrb[36].mxu1 %v4466_v44 }
  0x7b   : > { %1664 = vmatprep.mubr.bf16.mxu1 %v4532_v48 }
  0x7d   : > { %1223 = vmatmul.mubr.bf16.gmra.mrb[36].mxu0 %v4229_v62 }
  0x7e   : > { %1230 = vmatprep.mubr.bf16.mxu0 %v4573_v63 }
  0x82   : > { %1665 = vmatmul.mubr.bf16.gmra.mrb[40].mxu1 %v4492_v40 }
  0x83   : > { %1672 = vmatprep.mubr.bf16.mxu1 %v4540_v26 }
  0x85   : > { %1231 = vmatmul.mubr.bf16.gmra.mrb[40].mxu0 %v4285_v42 }
  0x86   : > { %1238 = vmatprep.mubr.bf16.mxu0 %v4579_v10 }
  0x8a   : > { %1673 = vmatmul.mubr.bf16.gmra.mrb[44].mxu1 %v4501_v32 }
  0x8b   : > { %1680 = vmatprep.mubr.bf16.mxu1 %v4562_v52 }
  0x8d   : > { %1239 = vmatmul.mubr.bf16.gmra.mrb[44].mxu0 %v4295_v49 }
  0x8e   : > { %1246 = vmatprep.mubr.bf16.mxu0 %v4587_v9 }
  0x92   : > { %1681 = vmatmul.mubr.bf16.gmra.mrb[48].mxu1 %v4526_v39 }
  0x93   : > { %1688 = vmatprep.mubr.bf16.mxu1 %v4546_v0 }
  0x95   : > { %1247 = vmatmul.mubr.bf16.gmra.mrb[48].mxu0 %v4350_v33 }
  0x96   : > { %1254 = vmatprep.mubr.bf16.mxu0 %v4595_v38 }
  0x9a   : > { %1689 = vmatmul.mubr.bf16.gmra.mrb[52].mxu1 %v4216_v54 }
  0x9b   : > { %1696 = vmatprep.mubr.bf16.mxu1 %v4553_v47 }
  0x9d   : > { %1255 = vmatmul.mubr.bf16.gmra.mrb[52].mxu0 %v4360_v43 }
  0x9e   : > { %1262 = vmatprep.mubr.bf16.mxu0 %v4601_v30 }
  0xa2   : > { %1697 = vmatmul.mubr.bf16.gmra.mrb[56].mxu1 %v4229_v62 }
  0xa3   : > { %1704 = vmatprep.mubr.bf16.mxu1 %v4573_v63 }
  0xa5   : > { %1263 = vmatmul.mubr.bf16.gmra.mrb[56].mxu0 %v4415_v13 }
  0xa6   : > { %1270 = vmatprep.mubr.bf16.mxu0 %v4607_v56 }
  0xaa   : > { %1705 = vmatmul.mubr.bf16.gmra.mrb[60].mxu1 %v4285_v42 }
  0xab   : > { %1712 = vmatprep.mubr.bf16.mxu1 %v4579_v10 }
  0xad   : > { %1271 = vmatmul.mubr.bf16.gmra.mrb[60].mxu0 %v4427_v51 }
  0xae   : > { %3581 = vmatprep.mubr.bf16.mxu0 %v4604_v2 }
  0xb2   : > { %1713 = vmatmul.mubr.bf16.gmra.mrb[64].mxu1 %v4295_v49 }
  0xb3   : > { %1720 = vmatprep.mubr.bf16.mxu1 %v4587_v9 }
  0xb5   : > { %3582 = vmatmul.mubr.bf16.vlgmr.msra.gmra.mrb[64].mxu0 %v4659_v5 }
  0xb6   : > { %3430 = vmatpush3.bf16.msra.mxu0 %v3973_v58  ;;  %3585 = vmatprep.mubr.bf16.mxu0 %v4669_v53  ;;  %v818_v58 = vrot.slane %v4526_v39, 1 }
  0xb7   : > { %3431 = vmatprep.subr.bf16.mxu0 %v3975_v22  ;;  %v819_v22 = vrot.slane %v4515_v59, 1  ;;  %v3988_v59 = vld [vmem:[%s5155_s1 + $0x1f8] sm:$0xff]  }
  0xb9   : > { %v4740_v24 = vsel %vm793_vm2, %v818_v58, %v819_v22 }
  0xba   : > { %3432 = vmatpush3.bf16.msra.mxu0 %v3976_v3  ;;  %1721 = vmatmul.mubr.bf16.gmra.mrb[68].mxu1 %v4350_v33  ;;  %v3986_v3 = vld [vmem:[%s5155_s1 + $0x1f0] sm:$0xff]  }
  0xbb   : > { %3433 = vmatprep.subr.bf16.mxu0 %v3977_v7  ;;  %1728 = vmatprep.mubr.bf16.mxu1 %v4595_v38  ;;  %v3989_v7 = vld [vmem:[%s5155_s1 + $0x1b8] sm:$0xff]  }
  0xbd   : > { %3586 = vmatmul.mubr.bf16.gmra.mrb[68].mxu0 %v4685_v50 }
  0xbe   : > { %3434 = vmatpush3.bf16.msra.mxu0 %v3978_v4  ;;  %3589 = vmatprep.mubr.bf16.mxu0 %v4695_v23 }
  0xbf   : > { %3435 = vmatprep.subr.bf16.mxu0 %v3979_v17  ;;  %v5182_v17 = vld [vmem:[#allocation5_spill] sm:$0xff] }
  0xc2   : > { %3436 = vmatpush3.bf16.msra.mxu0 %v3980_v20  ;;  %1729 = vmatmul.mubr.bf16.gmra.mrb[72].mxu1 %v4360_v43  ;;  %v5183_v20 = vld [vmem:[#allocation6_spill] sm:$0xff] }
  0xc3   : > { %3437 = vmatprep.subr.bf16.mxu0 %v3981_v6  ;;  %1736 = vmatprep.mubr.bf16.mxu1 %v4601_v30 }
  0xc5   : > { %3590 = vmatmul.mubr.bf16.gmra.mrb[72].mxu0 %v4711_v41 }
  0xc6   : > { %3438 = vmatpush3.bf16.msra.mxu0 %v3982_v12  ;;  %3593 = vmatprep.mubr.bf16.mxu0 %v4721_v27 }
  0xc7   : > { %3439 = vmatprep.subr.bf16.mxu0 %v3984_v14 }
  0xca   : > { %3440 = vmatpush3.bf16.msra.mxu0 %v3985_v1  ;;  %1737 = vmatmul.mubr.bf16.gmra.mrb[76].mxu1 %v4415_v13 }
  0xcb   : > { %3441 = vmatprep.subr.bf16.mxu0 %v3986_v3  ;;  %3629 = vmatprep.mubr.bf16.mxu1 %v4737_v57 }
  0xcd   : > { %3594 = vmatmul.mubr.bf16.gmra.mrb[76].mxu0 %v4740_v24 }
  0xce   : > { %3442 = vmatpush3.bf16.msra.mxu0 %v3987_v11  ;;  %2150 = vmatprep.mubr.bf16.mxu0 %v4309_v61  ;;  %v3993_v61 = vld [vmem:[%s5155_s1 + $0x218] sm:$0xff]  }
  0xcf   : > { %3443 = vmatprep.subr.bf16.mxu0 %v3988_v59 }
  0xd2   : > { %3444 = vmatpush3.bf16.msra.mxu0 %v3989_v7  ;;  %3630 = vmatmul.mubr.bf16.vlgmr.msra.gmra.mrb[80].mxu1 %v4604_v2  ;;  %v3994_v2 = vld [vmem:[%s5155_s1 + $0x220] sm:$0xff]  }
  0xd3   : > { %3662 = vmatpush3.bf16.msra.mxu1 %v4619_v21  ;;  %3633 = vmatprep.mubr.bf16.mxu1 %v4659_v5 }
  0xd4   : > { %3663 = vmatprep.subr.bf16.mxu1 %v3991_v18 }
  0xd5   : > { %2151 = vmatmul.mubr.bf16.vlgmr.msra.gmra.mrb[80].mxu0 %v4261_v28  ;;  %v3995_v28 = vld [vmem:[%s5155_s1 + $0x228] sm:$0xff]  }
  0xd6   : > { %2158 = vmatprep.mubr.bf16.mxu0 %v4375_v60  ;;  %v3996_v60 = vld [vmem:[%s5155_s1 + $0x230] sm:$0xff]  }
  0xd7   : > { %3664 = vmatpush3.bf16.msra.mxu1 %v3991_v18 }
  0xd8   : > { %3665 = vmatprep.subr.bf16.mxu1 %v3992_v55 }
  0xda   : > { %3634 = vmatmul.mubr.bf16.gmra.mrb[84].mxu1 %v4669_v53 }
  0xdb   : > { %3637 = vmatprep.mubr.bf16.mxu1 %v4685_v50  ;;  %3666 = vmatpush3.bf16.msra.mxu1 %v3992_v55 }
  0xdc   : > { %3667 = vmatprep.subr.bf16.mxu1 %v3993_v61 }
  0xdd   : > { %2159 = vmatmul.mubr.bf16.gmra.mrb[84].mxu0 %v4331_v15  ;;  %v3997_v15 = vld [vmem:[%s5155_s1 + $0x238] sm:$0xff]  }
  0xde   : > { %2166 = vmatprep.mubr.bf16.mxu0 %v4459_v31  ;;  %v5180_v31 = vld [vmem:[#allocation3_spill] sm:$0xff] }
  0xdf   : > { %3668 = vmatpush3.bf16.msra.mxu1 %v3993_v61 }
  0xe0   : > { %3669 = vmatprep.subr.bf16.mxu1 %v3994_v2 }
  0xe2   : > { %3638 = vmatmul.mubr.bf16.gmra.mrb[88].mxu1 %v4695_v23 }
  0xe3   : > { %3641 = vmatprep.mubr.bf16.mxu1 %v4711_v41  ;;  %3670 = vmatpush3.bf16.msra.mxu1 %v3994_v2 }
  0xe4   : > { %3671 = vmatprep.subr.bf16.mxu1 %v3995_v28 }
  0xe5   : > { %2167 = vmatmul.mubr.bf16.gmra.mrb[88].mxu0 %v4411_v36  ;;  %v5179_v36 = vld [vmem:[#allocation2_spill] sm:$0xff] }
  0xe6   : > { %2174 = vmatprep.mubr.bf16.mxu0 %v4504_v45  ;;  %v5181_v45 = vld [vmem:[#allocation4_spill] sm:$0xff] }
  0xe7   : > { %3672 = vmatpush3.bf16.msra.mxu1 %v3995_v28 }
  0xe8   : > { %3673 = vmatprep.subr.bf16.mxu1 %v3996_v60 }
  0xea   : > { %3642 = vmatmul.mubr.bf16.gmra.mrb[92].mxu1 %v4721_v27 }
  0xeb   : > { %3645 = vmatprep.mubr.bf16.mxu1 %v4740_v24  ;;  %3674 = vmatpush3.bf16.msra.mxu1 %v3996_v60 }
  0xec   : > { %3675 = vmatprep.subr.bf16.mxu1 %v3997_v15 }
  0xed   : > { %2175 = vmatmul.mubr.bf16.gmra.mrb[92].mxu0 %v4466_v44 }
  0xee   : > { %2182 = vmatprep.mubr.bf16.mxu0 %v4532_v48 }
  0xef   : > { %3676 = vmatpush3.bf16.msra.mxu1 %v3997_v15 }
  0xf2   : > { %3646 = vmatmul.mubr.bf16.gmra.mrb[0].mxu1 %v4238_v8 }
  0xf3   : > { %3649 = vmatprep.mubr.bf16.mxu1 %v4246_v19 }
  0xf5   : > { %2183 = vmatmul.mubr.bf16.gmra.mrb[96].mxu0 %v4492_v40 }
  0xf6   : > { %2190 = vmatprep.mubr.bf16.mxu0 %v4540_v26 }
  0xfa   : > { %3650 = vmatmul.mubr.bf16.gmra.mrb[4].mxu1 %v5179_v36 }
  0xfb   : > { %3653 = vmatprep.mubr.bf16.mxu1 %v5180_v31 }
  0xfd   : > { %2191 = vmatmul.mubr.bf16.gmra.mrb[100].mxu0 %v4501_v32 }
  0xfe   : > { %2198 = vmatprep.mubr.bf16.mxu0 %v4562_v52 }
 0x102   : > { %3654 = vmatmul.mubr.bf16.gmra.mrb[8].mxu1 %v5181_v45 }
 0x103   : > { %v3173_v44 = vpop.f32.mrb[0].mxu0  ;;  %3657 = vmatprep.mubr.bf16.mxu1 %v5182_v17 }
 0x104   : > { %v3174_v48 = vpop.f32.mrb[1].mxu0 }
 0x105   : > { %v4802_v21 = vadd.f32 %v3174_v48, %v3173_v44  ;;  %v3176_v4 = vpop.f32.mrb[2].mxu0  ;;  %2199 = vmatmul.mubr.bf16.gmra.mrb[104].mxu0 %v4526_v39 }
 0x106   : > { %v3177_v40 = vpop.f32.mrb[3].mxu0  ;;  %2206 = vmatprep.mubr.bf16.mxu0 %v4546_v0 }
 0x107   : > { %v4806_v26 = vadd.f32 %v3177_v40, %v3176_v4 }
 0x10a   : > { %3658 = vmatmul.mubr.bf16.gmra.mrb[12].mxu1 %v5183_v20 }
 0x10b   : > { %v3179_v32 = vpop.f32.mrb[4].mxu0  ;;  %3677 = vmatprep.mubr.bf16.mxu1 %v4659_v5 }
 0x10c   : > { %v3180_v52 = vpop.f32.mrb[5].mxu0 }
 0x10d   : > { %v4811_v16 = vadd.f32 %v3180_v52, %v3179_v32  ;;  %v3182_v35 = vpop.f32.mrb[6].mxu0  ;;  %2207 = vmatmul.mubr.bf16.gmra.mrb[108].mxu0 %v4216_v54 }
 0x10e   : > { %v3183_v6 = vpop.f32.mrb[7].mxu0  ;;  %2214 = vmatprep.mubr.bf16.mxu0 %v4553_v47 }
 0x10f   : > { %v4814_v37 = vadd.f32 %v3183_v6, %v3182_v35 }
 0x112   : > { %3678 = vmatmul.mubr.bf16.vlgmr.msra.gmra.mrb[80].mxu1 %v4669_v53 }
 0x113   : > { %3681 = vmatprep.mubr.bf16.mxu1 %v4685_v50  ;;  %v3185_v39 = vpop.f32.mrb[8].mxu0 }
 0x114   : > { %v3186_v0 = vpop.f32.mrb[9].mxu0 }
 0x115   : > { %2215 = vmatmul.mubr.bf16.gmra.mrb[112].mxu0 %v4229_v62  ;;  %v4820_v46 = vadd.f32 %v3186_v0, %v3185_v39  ;;  %v3188_v5 = vpop.f32.mrb[10].mxu0 }
 0x116   : > { %2222 = vmatprep.mubr.bf16.mxu0 %v4573_v63  ;;  %v3189_v12 = vpop.f32.mrb[11].mxu0 }
 0x117   : > { %v4823_v54 = vadd.f32 %v3189_v12, %v3188_v5 }
 0x11a   : > { %3682 = vmatmul.mubr.bf16.gmra.mrb[84].mxu1 %v4695_v23 }
 0x11b   : > { %3685 = vmatprep.mubr.bf16.mxu1 %v4711_v41 }
 0x11d   : > { %2223 = vmatmul.mubr.bf16.gmra.mrb[116].mxu0 %v4285_v42 }
 0x11e   : > { %2230 = vmatprep.mubr.bf16.mxu0 %v4579_v10 }
 0x11f   : > { %v3191_v47 = vpop.f32.mrb[12].mxu0 }
 0x120   : > { %v3192_v53 = vpop.f32.mrb[13].mxu0 }
 0x121   : > { %v4829_v62 = vadd.f32 %v3192_v53, %v3191_v47  ;;  %v3194_v50 = vpop.f32.mrb[14].mxu0  ;;  %v5184_v53 = vld [vmem:[#allocation7_spill] sm:$0xff] }
 0x122   : > { %3686 = vmatmul.mubr.bf16.gmra.mrb[88].mxu1 %v4721_v27  ;;  %v3195_v14 = vpop.f32.mrb[15].mxu0 }
 0x123   : > { %3689 = vmatprep.mubr.bf16.mxu1 %v4740_v24  ;;  %v4833_v63 = vadd.f32 %v3195_v14, %v3194_v50  ;;  %v5185_v14 = vld [vmem:[#allocation8_spill] sm:$0xff] }
 0x125   : > { %2231 = vmatmul.mubr.bf16.gmra.mrb[120].mxu0 %v4295_v49  ;;  %v3309_v23 = vpop.f32.mrb[16].mxu1 }
 0x126   : > { %v3310_v41 = vpop.f32.mrb[17].mxu1  ;;  %2238 = vmatprep.mubr.bf16.mxu0 %v4587_v9 }
 0x127   : > { %v4837_v42 = vadd.f32 %v3310_v41, %v3309_v23  ;;  %v3312_v10 = vpop.f32.mrb[18].mxu1 }
 0x128   : > { %v3197_v25 = vpop.f32.mrb[16].mxu0  ;;  %v3313_v29 = vpop.f32.mrb[19].mxu1 }
 0x129   : > { %v3198_v1 = vpop.f32.mrb[17].mxu0  ;;  %v4839_v58 = vadd.f32 %v3313_v29, %v3312_v10 }
 0x12a   : > { %v4841_v27 = vadd.f32 %v3198_v1, %v3197_v25  ;;  %v3200_v22 = vpop.f32.mrb[18].mxu0  ;;  %3690 = vmatmul.mubr.bf16.gmra.mrb[92].mxu1 %v4238_v8 }
 0x12b   : > { %v3201_v3 = vpop.f32.mrb[19].mxu0  ;;  %3693 = vmatprep.mubr.bf16.mxu1 %v4246_v19 }
 0x12c   : > { %v4845_v49 = vadd.f32 %v3201_v3, %v3200_v22 }
 0x12d   : > { %2239 = vmatmul.mubr.bf16.gmra.mrb[124].mxu0 %v4350_v33  ;;  %v3315_v9 = vpop.f32.mrb[20].mxu1 }
 0x12e   : > { %v3316_v24 = vpop.f32.mrb[21].mxu1  ;;  %2246 = vmatprep.mubr.bf16.mxu0 %v4595_v38 }
 0x12f   : > { %v4849_v11 = vadd.f32 %v3316_v24, %v3315_v9  ;;  %v3318_v59 = vpop.f32.mrb[22].mxu1 }
 0x130   : > { %v3203_v7 = vpop.f32.mrb[20].mxu0  ;;  %v3319_v18 = vpop.f32.mrb[23].mxu1 }
 0x131   : > { %v3204_v55 = vpop.f32.mrb[21].mxu0  ;;  %v4851_v61 = vadd.f32 %v3319_v18, %v3318_v59 }
 0x132   : > { %v4853_v8 = vadd.f32 %v3204_v55, %v3203_v7  ;;  %v3206_v2 = vpop.f32.mrb[22].mxu0  ;;  %3694 = vmatmul.mubr.bf16.gmra.mrb[0].mxu1 %v5179_v36 }
 0x133   : > { %v3207_v19 = vpop.f32.mrb[23].mxu0  ;;  %3697 = vmatprep.mubr.bf16.mxu1 %v5180_v31 }
 0x134   : > { %v4857_v33 = vadd.f32 %v3207_v19, %v3206_v2 }
 0x135   : > { %2247 = vmatmul.mubr.bf16.gmra.mrb[128].mxu0 %v4360_v43  ;;  %v3321_v38 = vpop.f32.mrb[24].mxu1 }
 0x136   : > { %v3322_v28 = vpop.f32.mrb[25].mxu1  ;;  %2254 = vmatprep.mubr.bf16.mxu0 %v4601_v30 }
 0x137   : > { %v4861_v60 = vadd.f32 %v3322_v28, %v3321_v38  ;;  %v3324_v15 = vpop.f32.mrb[26].mxu1 }
 0x138   : > { %v3209_v44 = vpop.f32.mrb[24].mxu0  ;;  %v3325_v48 = vpop.f32.mrb[27].mxu1 }
 0x139   : > { %v3210_v4 = vpop.f32.mrb[25].mxu0  ;;  %v4863_v40 = vadd.f32 %v3325_v48, %v3324_v15 }
 0x13a   : > { %v4865_v36 = vadd.f32 %v3210_v4, %v3209_v44  ;;  %v3212_v32 = vpop.f32.mrb[26].mxu0  ;;  %3698 = vmatmul.mubr.bf16.gmra.mrb[4].mxu1 %v5181_v45 }
 0x13b   : > { %v3213_v31 = vpop.f32.mrb[27].mxu0  ;;  %3701 = vmatprep.mubr.bf16.mxu1 %v5182_v17 }
 0x13c   : > { %v4869_v43 = vadd.f32 %v3213_v31, %v3212_v32 }
 0x13d   : > { %2255 = vmatmul.mubr.bf16.gmra.mrb[132].mxu0 %v4415_v13  ;;  %v3327_v30 = vpop.f32.mrb[28].mxu1 }
 0x13e   : > { %v3328_v52 = vpop.f32.mrb[29].mxu1  ;;  %2262 = vmatprep.mubr.bf16.mxu0 %v4607_v56 }
 0x13f   : > { %v4873_v35 = vadd.f32 %v3328_v52, %v3327_v30  ;;  %v3330_v6 = vpop.f32.mrb[30].mxu1 }
 0x140   : > { %v3215_v39 = vpop.f32.mrb[28].mxu0  ;;  %v3331_v0 = vpop.f32.mrb[31].mxu1 }
 0x141   : > { %v3216_v5 = vpop.f32.mrb[29].mxu0  ;;  %v4875_v12 = vadd.f32 %v3331_v0, %v3330_v6 }
 0x142   : > { %v4877_v45 = vadd.f32 %v3216_v5, %v3215_v39  ;;  %v3218_v47 = vpop.f32.mrb[30].mxu0  ;;  %3702 = vmatmul.mubr.bf16.gmra.mrb[8].mxu1 %v5183_v20 }
 0x143   : > { %v3219_v17 = vpop.f32.mrb[31].mxu0  ;;  %3705 = vmatprep.mubr.bf16.mxu1 %v5184_v53 }
 0x144   : > { %v4881_v13 = vadd.f32 %v3219_v17, %v3218_v47 }
 0x145   : > { %2263 = vmatmul.mubr.bf16.gmra.mrb[136].mxu0 %v4427_v51  ;;  %v3333_v56 = vpop.f32.mrb[32].mxu1 }
 0x146   : > { %v3334_v50 = vpop.f32.mrb[33].mxu1  ;;  %2270 = vmatprep.mubr.bf16.mxu0 %v5185_v14 }
 0x147   : > { %v4885_v23 = vadd.f32 %v3334_v50, %v3333_v56  ;;  %v3336_v41 = vpop.f32.mrb[34].mxu1 }
 0x148   : > { %v3221_v10 = vpop.f32.mrb[32].mxu0  ;;  %v3337_v25 = vpop.f32.mrb[35].mxu1 }
 0x149   : > { %v3222_v29 = vpop.f32.mrb[33].mxu0  ;;  %v4887_v1 = vadd.f32 %v3337_v25, %v3336_v41 }
 0x14a   : > { %v3223_v20 = vadd.f32 %v3222_v29, %v3221_v10  ;;  %v3224_v22 = vpop.f32.mrb[34].mxu0  ;;  %3706 = vmatmul.mubr.bf16.gmra.mrb[12].mxu1 %v4737_v57 }
 0x14b   : > { %v3225_v3 = vpop.f32.mrb[35].mxu0 }
 0x14c   : > { %v3226_v9 = vadd.f32 %v3225_v3, %v3224_v22 }
 0x14d   : > { %2271 = vmatmul.mubr.bf16.gmra.mrb[140].mxu0 %v4271_v34  ;;  %v3339_v51 = vpop.f32.mrb[36].mxu1 }
 0x14e   : > { %v3340_v24 = vpop.f32.mrb[37].mxu1 }
 0x14f   : > { %v4891_v59 = vadd.f32 %v3340_v24, %v3339_v51  ;;  %v3342_v7 = vpop.f32.mrb[38].mxu1 }
 0x150   : > { %v3227_v18 = vpop.f32.mrb[36].mxu0  ;;  %v3343_v55 = vpop.f32.mrb[39].mxu1 }
 0x151   : > { %v3228_v2 = vpop.f32.mrb[37].mxu0  ;;  %v4893_v19 = vadd.f32 %v3343_v55, %v3342_v7 }
 0x152   : > { %v3229_v38 = vadd.f32 %v3228_v2, %v3227_v18  ;;  %v3230_v28 = vpop.f32.mrb[38].mxu0 }
 0x153   : > { %v3231_v15 = vpop.f32.mrb[39].mxu0 }
 0x154   : > { %v3232_v44 = vadd.f32 %v3231_v15, %v3230_v28 }
 0x155   : > { %v3345_v48 = vpop.f32.mrb[40].mxu1 }
 0x156   : > { %v3346_v57 = vpop.f32.mrb[41].mxu1 }
 0x157   : > { %v4895_v4 = vadd.f32 %v3346_v57, %v3345_v48  ;;  %v3348_v32 = vpop.f32.mrb[42].mxu1 }
 0x158   : > { %v3233_v34 = vpop.f32.mrb[40].mxu0  ;;  %v3349_v31 = vpop.f32.mrb[43].mxu1 }
 0x159   : > { %v3234_v30 = vpop.f32.mrb[41].mxu0  ;;  %v4897_v52 = vadd.f32 %v3349_v31, %v3348_v32 }
 0x15a   : > { %v3235_v6 = vadd.f32 %v3234_v30, %v3233_v34  ;;  %v3236_v39 = vpop.f32.mrb[42].mxu0 }
 0x15b   : > { %v3237_v0 = vpop.f32.mrb[43].mxu0 }
 0x15c   : > { %v3238_v5 = vadd.f32 %v3237_v0, %v3236_v39 }
 0x15d   : > { %v3351_v47 = vpop.f32.mrb[44].mxu1 }
 0x15e   : > { %v3352_v17 = vpop.f32.mrb[45].mxu1 }
 0x15f   : > { %v4899_v53 = vadd.f32 %v3352_v17, %v3351_v47  ;;  %v3354_v56 = vpop.f32.mrb[46].mxu1 }
 0x160   : > { %v3239_v50 = vpop.f32.mrb[44].mxu0  ;;  %v3355_v14 = vpop.f32.mrb[47].mxu1 }
 0x161   : > { %v3240_v41 = vpop.f32.mrb[45].mxu0  ;;  %v4901_v10 = vadd.f32 %v3355_v14, %v3354_v56 }
 0x162   : > { %v3241_v25 = vadd.f32 %v3240_v41, %v3239_v50  ;;  %v3242_v29 = vpop.f32.mrb[46].mxu0 }
 0x163   : > { %v3243_v22 = vpop.f32.mrb[47].mxu0 }
 0x164   : > { %v3244_v3 = vadd.f32 %v3243_v22, %v3242_v29 }
 0x165   : > { %v3357_v51 = vpop.f32.mrb[48].mxu1 }
 0x166   : > { %v3358_v24 = vpop.f32.mrb[49].mxu1 }
 0x167   : > { %v3359_v7 = vadd.f32 %v3358_v24, %v3357_v51  ;;  %v3360_v18 = vpop.f32.mrb[50].mxu1 }
 0x168   : > { %v3245_v55 = vpop.f32.mrb[48].mxu0  ;;  %v3361_v2 = vpop.f32.mrb[51].mxu1 }
 0x169   : > { %v3246_v28 = vpop.f32.mrb[49].mxu0  ;;  %v4903_v15 = vadd.f32 %v3359_v7, %v3223_v20  ;;  %v3362_v48 = vadd.f32 %v3361_v2, %v3360_v18 }
 0x16a   : > { %v3247_v57 = vadd.f32 %v3246_v28, %v3245_v55  ;;  %v3248_v32 = vpop.f32.mrb[50].mxu0 }
 0x16b   : > { %v3249_v34 = vpop.f32.mrb[51].mxu0  ;;  %v4905_v31 = vadd.f32 %v3362_v48, %v3226_v9 }
 0x16c   : > { %v3250_v30 = vadd.f32 %v3249_v34, %v3248_v32 }
 0x16d   : > { %v3363_v39 = vpop.f32.mrb[52].mxu1 }
 0x16e   : > { %v3364_v0 = vpop.f32.mrb[53].mxu1 }
 0x16f   : > { %v3365_v47 = vadd.f32 %v3364_v0, %v3363_v39  ;;  %v3366_v17 = vpop.f32.mrb[54].mxu1 }
 0x170   : > { %v3251_v56 = vpop.f32.mrb[52].mxu0  ;;  %v3367_v50 = vpop.f32.mrb[55].mxu1 }
 0x171   : > { %v3252_v14 = vpop.f32.mrb[53].mxu0  ;;  %v4907_v41 = vadd.f32 %v3365_v47, %v3229_v38  ;;  %v3368_v29 = vadd.f32 %v3367_v50, %v3366_v17 }
 0x172   : > { %v3253_v22 = vadd.f32 %v3252_v14, %v3251_v56  ;;  %v3254_v20 = vpop.f32.mrb[54].mxu0 }
 0x173   : > { %v3255_v51 = vpop.f32.mrb[55].mxu0  ;;  %v4909_v24 = vadd.f32 %v3368_v29, %v3232_v44 }
 0x174   : > { %v4911_v7 = vadd.f32 %v3255_v51, %v3254_v20 }
 0x175   : > { %v3369_v9 = vpop.f32.mrb[56].mxu1 }
 0x176   : > { %v3370_v18 = vpop.f32.mrb[57].mxu1 }
 0x177   : > { %v3371_v55 = vadd.f32 %v3370_v18, %v3369_v9  ;;  %v3372_v2 = vpop.f32.mrb[58].mxu1 }
 0x178   : > { %v3257_v28 = vpop.f32.mrb[56].mxu0  ;;  %v3373_v48 = vpop.f32.mrb[59].mxu1 }
 0x179   : > { %v3258_v32 = vpop.f32.mrb[57].mxu0  ;;  %v4913_v34 = vadd.f32 %v3371_v55, %v3235_v6  ;;  %v3374_v39 = vadd.f32 %v3373_v48, %v3372_v2 }
 0x17a   : > { %v4915_v38 = vadd.f32 %v3258_v32, %v3257_v28  ;;  %v3260_v0 = vpop.f32.mrb[58].mxu0 }
 0x17b   : > { %5186 = vst [vmem:[#allocation2_spill] sm:$0xff] %v4913_v34  ;;  %v3261_v47 = vpop.f32.mrb[59].mxu0  ;;  %v4917_v17 = vadd.f32 %v3374_v39, %v3238_v5 }
 0x17c   : > { %v4919_v44 = vadd.f32 %v3261_v47, %v3260_v0 }
 0x17d   : > { %5187 = vst [vmem:[#allocation3_spill] sm:$0xff] %v4917_v17  ;;  %v3375_v56 = vpop.f32.mrb[60].mxu1 }
 0x17e   : > { %v3376_v50 = vpop.f32.mrb[61].mxu1 }
 0x17f   : > { %v3377_v14 = vadd.f32 %v3376_v50, %v3375_v56  ;;  %v3378_v29 = vpop.f32.mrb[62].mxu1 }
 0x180   : > { %v3263_v20 = vpop.f32.mrb[60].mxu0  ;;  %v3379_v51 = vpop.f32.mrb[63].mxu1 }
 0x181   : > { %v3264_v9 = vpop.f32.mrb[61].mxu0  ;;  %v4921_v18 = vadd.f32 %v3377_v14, %v3241_v25  ;;  %v3380_v6 = vadd.f32 %v3379_v51, %v3378_v29 }
 0x182   : > { %v4923_v55 = vadd.f32 %v3264_v9, %v3263_v20  ;;  %v3266_v2 = vpop.f32.mrb[62].mxu0 }
 0x183   : > { %v3267_v28 = vpop.f32.mrb[63].mxu0  ;;  %v4925_v48 = vadd.f32 %v3380_v6, %v3244_v3 }
 0x184   : > { %v4927_v5 = vadd.f32 %v3267_v28, %v3266_v2 }
 0x185   : > { %v3381_v32 = vpop.f32.mrb[64].mxu1 }
 0x186   : > { %v3382_v39 = vpop.f32.mrb[65].mxu1 }
 0x187   : > { %v3383_v0 = vadd.f32 %v3382_v39, %v3381_v32  ;;  %v3384_v47 = vpop.f32.mrb[66].mxu1 }
 0x188   : > { %v3583_v56 = vpop.f32.mrb[64].mxu0  ;;  %v3385_v50 = vpop.f32.mrb[67].mxu1 }
 0x189   : > { %v1322_v17 = vadd.f32 %v3583_v56, %v4811_v16  ;;  %v1313_v34 = vpop.f32.mrb[65].mxu0  ;;  %v4930_v25 = vadd.f32 %v3383_v0, %v3247_v57  ;;  %v3386_v14 = vadd.f32 %v3385_v50, %v3384_v47 }
 0x18a   : > { %v1314_v29 = vadd.f32 %v4802_v21, %v1313_v34  ;;  %v3584_v20 = vpop.f32.mrb[66].mxu0 }
 0x18b   : > { %v4934_v3 = vadd.f32 %v4849_v11, %v1322_v17  ;;  %v1325_v51 = vadd.f32 %v3584_v20, %v4814_v37  ;;  %v1316_v9 = vpop.f32.mrb[67].mxu0  ;;  %v4937_v6 = vadd.f32 %v3386_v14, %v3250_v30 }
 0x18c   : > { %v4940_v2 = vadd.f32 %v4837_v42, %v1314_v29  ;;  %v1317_v16 = vadd.f32 %v4806_v26, %v1316_v9 }
 0x18d   : > { %v4944_v57 = vadd.f32 %v4851_v61, %v1325_v51  ;;  %v3387_v28 = vpop.f32.mrb[68].mxu1 }
 0x18e   : > { %v4947_v21 = vadd.f32 %v4839_v58, %v1317_v16  ;;  %v3388_v34 = vpop.f32.mrb[69].mxu1 }
 0x18f   : > { %v3389_v11 = vadd.f32 %v3388_v34, %v3387_v28  ;;  %v3390_v17 = vpop.f32.mrb[70].mxu1 }
 0x190   : > { %v3587_v32 = vpop.f32.mrb[68].mxu0  ;;  %v3391_v37 = vpop.f32.mrb[71].mxu1 }
 0x191   : > { %v1338_v30 = vadd.f32 %v3587_v32, %v4829_v62  ;;  %v1329_v39 = vpop.f32.mrb[69].mxu0  ;;  %v4950_v0 = vadd.f32 %v3389_v11, %v3253_v22  ;;  %v3392_v42 = vadd.f32 %v3391_v37, %v3390_v17 }
 0x192   : > { %v1330_v26 = vadd.f32 %v4820_v46, %v1329_v39  ;;  %v3588_v47 = vpop.f32.mrb[70].mxu0 }
 0x193   : > { %v4954_v61 = vadd.f32 %v4873_v35, %v1338_v30  ;;  %v1341_v58 = vadd.f32 %v3588_v47, %v4833_v63  ;;  %v1332_v56 = vpop.f32.mrb[71].mxu0  ;;  %v4958_v50 = vadd.f32 %v3392_v42, %v4911_v7 }
 0x194   : > { %v4961_v14 = vadd.f32 %v4861_v60, %v1330_v26  ;;  %v1333_v62 = vadd.f32 %v4823_v54, %v1332_v56 }
 0x195   : > { %v4965_v22 = vadd.f32 %v4875_v12, %v1341_v58  ;;  %v3393_v29 = vpop.f32.mrb[72].mxu1 }
 0x196   : > { %v4968_v46 = vadd.f32 %v4863_v40, %v1333_v62  ;;  %v3394_v35 = vpop.f32.mrb[73].mxu1 }
 0x197   : > { %v3395_v20 = vadd.f32 %v3394_v35, %v3393_v29  ;;  %v3396_v51 = vpop.f32.mrb[74].mxu1 }
 0x198   : > { %v3591_v63 = vpop.f32.mrb[72].mxu0  ;;  %v3397_v9 = vpop.f32.mrb[75].mxu1 }
 0x199   : > { %v1354_v7 = vadd.f32 %v3591_v63, %v4853_v8  ;;  %v1345_v16 = vpop.f32.mrb[73].mxu0  ;;  %v4972_v60 = vadd.f32 %v3395_v20, %v4915_v38  ;;  %v3398_v28 = vadd.f32 %v3397_v9, %v3396_v51 }
 0x19a   : > { %v1346_v54 = vadd.f32 %v4841_v27, %v1345_v16  ;;  %v3592_v12 = vpop.f32.mrb[74].mxu0 }
 0x19b   : > { %v4976_v34 = vadd.f32 %v4891_v59, %v1354_v7  ;;  %v1357_v40 = vadd.f32 %v3592_v12, %v4857_v33  ;;  %v1348_v11 = vpop.f32.mrb[75].mxu0  ;;  %v4980_v17 = vadd.f32 %v3398_v28, %v4919_v44 }
 0x19c   : > { %v1651_v32 = vadd.f32 %v4885_v23, %v1346_v54  ;;  %v1349_v8 = vadd.f32 %v4845_v49, %v1348_v11 }
 0x19d   : > { %v4985_v38 = vadd.f32 %v4893_v19, %v1357_v40  ;;  %v3399_v37 = vpop.f32.mrb[76].mxu1 }
 0x19e   : > { %v1654_v27 = vadd.f32 %v4887_v1, %v1349_v8  ;;  %v3400_v30 = vpop.f32.mrb[77].mxu1 }
 0x19f   : > { %v3401_v39 = vadd.f32 %v3400_v30, %v3399_v37  ;;  %v3402_v59 = vpop.f32.mrb[78].mxu1 }
 0x1a0   : > { %v3595_v42 = vpop.f32.mrb[76].mxu0  ;;  %v3403_v26 = vpop.f32.mrb[79].mxu1 }
 0x1a1   : > { %v1370_v33 = vadd.f32 %v3595_v42, %v4877_v45  ;;  %v1361_v47 = vpop.f32.mrb[77].mxu0  ;;  %v4990_v44 = vadd.f32 %v3401_v39, %v4923_v55  ;;  %v3404_v23 = vadd.f32 %v3403_v26, %v3402_v59 }
 0x1a2   : > { %v1362_v49 = vadd.f32 %v4865_v36, %v1361_v47  ;;  %v3596_v58 = vpop.f32.mrb[78].mxu0 }
 0x1a3   : > { %v4994_v19 = vadd.f32 %v4899_v53, %v1370_v33  ;;  %v1373_v1 = vadd.f32 %v3596_v58, %v4881_v13  ;;  %v1364_v56 = vpop.f32.mrb[79].mxu0  ;;  %v4998_v62 = vadd.f32 %v3404_v23, %v4927_v5 }
 0x1a4   : > { %v1667_v29 = vadd.f32 %v4895_v4, %v1362_v49  ;;  %v1365_v45 = vadd.f32 %v4869_v43, %v1364_v56 }
 0x1a5   : > { %v5003_v55 = vadd.f32 %v4901_v10, %v1373_v1 }
 0x1a6   : > { %v1670_v35 = vadd.f32 %v4897_v52, %v1365_v45 }
 0x1a8   : > { %v3445_v36 = vpop.f32.mrb[80].mxu0 }
 0x1a9   : > { %v3446_v20 = vpop.f32.mrb[81].mxu0 }
 0x1aa   : > { %v3447_v51 = vadd.f32 %v3446_v20, %v3445_v36  ;;  %v3448_v53 = vpop.f32.mrb[82].mxu0 }
 0x1ab   : > { %v3449_v63 = vpop.f32.mrb[83].mxu0 }
 0x1ac   : > { %v3450_v9 = vadd.f32 %v3449_v63, %v3448_v53  ;;  %v3731_v13 = vadd.f32 %v3447_v51, %v4940_v2 }
 0x1ae   : > { %v5008_v5 = vadd.f32 %v3450_v9, %v4947_v21 }
 0x1b0   : > { %v3451_v7 = vpop.f32.mrb[84].mxu0 }
 0x1b1   : > { %v3452_v4 = vpop.f32.mrb[85].mxu0 }
 0x1b2   : > { %v3453_v16 = vadd.f32 %v3452_v4, %v3451_v7  ;;  %v3454_v43 = vpop.f32.mrb[86].mxu0 }
 0x1b3   : > { %v3455_v28 = vpop.f32.mrb[87].mxu0 }
 0x1b4   : > { %v3456_v10 = vadd.f32 %v3455_v28, %v3454_v43  ;;  %v3727_v54 = vadd.f32 %v3453_v16, %v4934_v3 }
 0x1b6   : > { %v3735_v52 = vadd.f32 %v3456_v10, %v4944_v57 }
 0x1b8   : > { %v3457_v12 = vpop.f32.mrb[88].mxu0 }
 0x1b9   : > { %v3458_v40 = vpop.f32.mrb[89].mxu0 }
 0x1ba   : > { %v3459_v11 = vadd.f32 %v3458_v40, %v3457_v12  ;;  %v3460_v8 = vpop.f32.mrb[90].mxu0 }
 0x1bb   : > { %v3461_v37 = vpop.f32.mrb[91].mxu0 }
 0x1bc   : > { %v3462_v30 = vadd.f32 %v3461_v37, %v3460_v8  ;;  %v5013_v2 = vadd.f32 %v3459_v11, %v4961_v14 }
 0x1be   : > { %v5016_v21 = vadd.f32 %v3462_v30, %v4968_v46 }
 0x1c0   : > { %v3463_v39 = vpop.f32.mrb[92].mxu0 }
 0x1c1   : > { %v3464_v59 = vpop.f32.mrb[93].mxu0 }
 0x1c2   : > { %v3465_v42 = vadd.f32 %v3464_v59, %v3463_v39  ;;  %v3466_v26 = vpop.f32.mrb[94].mxu0  ;;  %v5042_v39 = vld [vmem:[%s5156_s2] ss:$0 sm:$0xff] }
 0x1c3   : > { %v3467_v33 = vpop.f32.mrb[95].mxu0 }
 0x1c4   : > { %v3468_v3 = vadd.f32 %v3467_v33, %v3466_v26  ;;  %v3743_v57 = vadd.f32 %v3465_v42, %v4954_v61 }
 0x1c6   : > { %v5020_v47 = vadd.f32 %v3468_v3, %v4965_v22 }
 0x1c8   : > { %v3469_v23 = vpop.f32.mrb[96].mxu0 }
 0x1c9   : > { %v3470_v49 = vpop.f32.mrb[97].mxu0 }
 0x1ca   : > { %v3471_v58 = vadd.f32 %v3470_v49, %v3469_v23  ;;  %v3472_v1 = vpop.f32.mrb[98].mxu0 }
 0x1cb   : > { %v3473_v14 = vpop.f32.mrb[99].mxu0 }
 0x1cc   : > { %v3474_v56 = vadd.f32 %v3473_v14, %v3472_v1  ;;  %v5022_v45 = vadd.f32 %v3471_v58, %v1651_v32 }
 0x1ce   : > { %v5024_v46 = vadd.f32 %v3474_v56, %v1654_v27 }
 0x1d0   : > { %v3475_v36 = vpop.f32.mrb[100].mxu0 }
 0x1d1   : > { %v3476_v20 = vpop.f32.mrb[101].mxu0 }
 0x1d2   : > { %v3477_v51 = vadd.f32 %v3476_v20, %v3475_v36  ;;  %v3478_v53 = vpop.f32.mrb[102].mxu0 }
 0x1d3   : > { %v3479_v63 = vpop.f32.mrb[103].mxu0 }
 0x1d4   : > { %v3480_v9 = vadd.f32 %v3479_v63, %v3478_v53  ;;  %v5027_v61 = vadd.f32 %v3477_v51, %v4976_v34 }
 0x1d6   : > { %v5030_v22 = vadd.f32 %v3480_v9, %v4985_v38 }
 0x1d8   : > { %v3481_v7 = vpop.f32.mrb[104].mxu0 }
 0x1d9   : > { %v3482_v4 = vpop.f32.mrb[105].mxu0 }
 0x1da   : > { %v3483_v16 = vadd.f32 %v3482_v4, %v3481_v7  ;;  %v3484_v43 = vpop.f32.mrb[106].mxu0 }
 0x1db   : > { %v3485_v32 = vpop.f32.mrb[107].mxu0 }
 0x1dc   : > { %v3486_v28 = vadd.f32 %v3485_v32, %v3484_v43  ;;  %v5032_v27 = vadd.f32 %v3483_v16, %v1667_v29 }
 0x1de   : > { %v5034_v10 = vadd.f32 %v3486_v28, %v1670_v35 }
 0x1e0   : > { %v3487_v12 = vpop.f32.mrb[108].mxu0 }
 0x1e1   : > { %v3488_v40 = vpop.f32.mrb[109].mxu0 }
 0x1e2   : > { %v3489_v11 = vadd.f32 %v3488_v40, %v3487_v12  ;;  %v3490_v8 = vpop.f32.mrb[110].mxu0 }
 0x1e3   : > { %v3491_v37 = vpop.f32.mrb[111].mxu0 }
 0x1e4   : > { %v3492_v34 = vadd.f32 %v3491_v37, %v3490_v8  ;;  %v5037_v30 = vadd.f32 %v3489_v11, %v4994_v19 }
 0x1e5   : > { %v3679_v38 = vpop.f32.mrb[80].mxu1 }
 0x1e6   : > { %v3728_v59 = vadd.f32 %v3727_v54, %v3679_v38  ;;  %v2313_v29 = vpop.f32.mrb[81].mxu1  ;;  %v5045_v35 = vadd.f32 %v3492_v34, %v5003_v55 }
 0x1e7   : > { %v3732_v42 = vadd.f32 %v3731_v13, %v2313_v29  ;;  %v3680_v26 = vpop.f32.mrb[82].mxu1 }
 0x1e8   : > { %v3493_v33 = vpop.f32.mrb[112].mxu0  ;;  %v2481_v3 = vadd.f32 %v3728_v59, %v5042_v39  ;;  %v3736_v23 = vadd.f32 %v3735_v52, %v3680_v26  ;;  %v2316_v19 = vpop.f32.mrb[83].mxu1 }
 0x1e9   : > { %v3494_v49 = vpop.f32.mrb[113].mxu0  ;;  %v2479_v58 = vadd.f32 %v3732_v42, %v5042_v39  ;;  %v3740_v1 = vadd.f32 %v5008_v5, %v2316_v19 }
 0x1ea   : > { %v3495_v14 = vadd.f32 %v3494_v49, %v3493_v33  ;;  %v3496_v56 = vpop.f32.mrb[114].mxu0  ;;  %v2482_v54 = vadd.f32 %v3736_v23, %v5042_v39  ;;  %v2513_v13 = vmax.f32 %v2481_v3, 0.0 }
 0x1eb   : > { %v3497_v36 = vpop.f32.mrb[115].mxu0  ;;  %v2480_v55 = vadd.f32 %v3740_v1, %v5042_v39  ;;  %v2511_v52 = vmax.f32 %v2479_v58, 0.0 }
 0x1ec   : > { %v2514_v20 = vmax.f32 %v2482_v54, 0.0  ;;  %v3498_v51 = vadd.f32 %v3497_v36, %v3496_v56  ;;  %v5053_v53 = vadd.f32 %v4903_v15, %v3495_v14 }
 0x1ed   : > { %v2512_v5 = vmax.f32 %v2480_v55, 0.0  ;;  %v3683_v63 = vpop.f32.mrb[84].mxu1 }
 0x1ee   : > { %v3070_v9 = vpack.c.bf16 %v2514_v20, %v2513_v13  ;;  %v3744_v7 = vadd.f32 %v3743_v57, %v3683_v63  ;;  %v2329_v4 = vpop.f32.mrb[85].mxu1  ;;  %v5063_v16 = vadd.f32 %v4905_v31, %v3498_v51 }
 0x1ef   : > { %v3065_v43 = vpack.c.bf16 %v2512_v5, %v2511_v52  ;;  %v3748_v15 = vadd.f32 %v5013_v2, %v2329_v4  ;;  %v3684_v32 = vpop.f32.mrb[86].mxu1  ;;  %v5188_v4 = vld [vmem:[#allocation2_spill] sm:$0xff] }
 0x1f0   : > { %3142 = vst [vmem:[%s5060_s9 + $0x8] sm:$0xff] %v3070_v9   ;;  %v3499_v28 = vpop.f32.mrb[116].mxu0  ;;  %v2485_v12 = vadd.f32 %v3744_v7, %v5042_v39  ;;  %v3752_v40 = vadd.f32 %v5020_v47, %v3684_v32  ;;  %v2332_v11 = vpop.f32.mrb[87].mxu1 }
 0x1f1   : > { %3066 = vst [vmem:[%s5060_s9] sm:$0xff] %v3065_v43   ;;  %v3500_v8 = vpop.f32.mrb[117].mxu0  ;;  %v2483_v37 = vadd.f32 %v3748_v15, %v5042_v39  ;;  %v3756_v57 = vadd.f32 %v5016_v21, %v2332_v11 }
 0x1f2   : > { %v3501_v34 = vadd.f32 %v3500_v8, %v3499_v28  ;;  %v3502_v31 = vpop.f32.mrb[118].mxu0  ;;  %v2486_v38 = vadd.f32 %v3752_v40, %v5042_v39  ;;  %v2517_v29 = vmax.f32 %v2485_v12, 0.0  ;;  %v5189_v40 = vld [vmem:[#allocation3_spill] sm:$0xff] }
 0x1f3   : > { %v3503_v59 = vpop.f32.mrb[119].mxu0  ;;  %v2484_v2 = vadd.f32 %v3756_v57, %v5042_v39  ;;  %v2515_v33 = vmax.f32 %v2483_v37, 0.0 }
 0x1f4   : > { %v2518_v42 = vmax.f32 %v2486_v38, 0.0  ;;  %v3504_v26 = vadd.f32 %v3503_v59, %v3502_v31  ;;  %v3790_v47 = vadd.f32 %v4907_v41, %v3501_v34 }
 0x1f5   : > { %v2516_v3 = vmax.f32 %v2484_v2, 0.0  ;;  %v3687_v23 = vpop.f32.mrb[88].mxu1 }
 0x1f6   : > { %v3080_v19 = vpack.c.bf16 %v2518_v42, %v2517_v29  ;;  %v3760_v21 = vadd.f32 %v5027_v61, %v3687_v23  ;;  %v2345_v49 = vpop.f32.mrb[89].mxu1  ;;  %v5077_v58 = vadd.f32 %v4909_v24, %v3504_v26 }
 0x1f7   : > { %v3075_v1 = vpack.c.bf16 %v2516_v3, %v2515_v33  ;;  %v3764_v14 = vadd.f32 %v5022_v45, %v2345_v49  ;;  %v3688_v56 = vpop.f32.mrb[90].mxu1 }
 0x1f8   : > { %3144 = vst [vmem:[%s5060_s9 + $0x18] sm:$0xff] %v3080_v19   ;;  %v3505_v54 = vpop.f32.mrb[120].mxu0  ;;  %v2489_v36 = vadd.f32 %v3760_v21, %v5042_v39  ;;  %v3768_v41 = vadd.f32 %v5030_v22, %v3688_v56  ;;  %v2348_v55 = vpop.f32.mrb[91].mxu1 }
 0x1f9   : > { %3143 = vst [vmem:[%s5060_s9 + $0x10] sm:$0xff] %v3075_v1   ;;  %v3506_v13 = vpop.f32.mrb[121].mxu0  ;;  %v2487_v20 = vadd.f32 %v3764_v14, %v5042_v39  ;;  %v3772_v61 = vadd.f32 %v5024_v46, %v2348_v55 }
 0x1fa   : > { %v3507_v51 = vadd.f32 %v3506_v13, %v3505_v54  ;;  %v3508_v24 = vpop.f32.mrb[122].mxu0  ;;  %v2490_v52 = vadd.f32 %v3768_v41, %v5042_v39  ;;  %v2521_v63 = vmax.f32 %v2489_v36, 0.0 }
 0x1fb   : > { %v3509_v5 = vpop.f32.mrb[123].mxu0  ;;  %v2488_v45 = vadd.f32 %v3772_v61, %v5042_v39  ;;  %v2519_v43 = vmax.f32 %v2487_v20, 0.0 }
 0x1fc   : > { %v2522_v9 = vmax.f32 %v2490_v52, 0.0  ;;  %v3510_v7 = vadd.f32 %v3509_v5, %v3508_v24  ;;  %v5089_v22 = vadd.f32 %v5188_v4, %v3507_v51 }
 0x1fd   : > { %v2520_v15 = vmax.f32 %v2488_v45, 0.0  ;;  %v3691_v32 = vpop.f32.mrb[92].mxu1 }
 0x1fe   : > { %v3090_v28 = vpack.c.bf16 %v2522_v9, %v2521_v63  ;;  %v3776_v46 = vadd.f32 %v5037_v30, %v3691_v32  ;;  %v2361_v12 = vpop.f32.mrb[93].mxu1  ;;  %v5093_v11 = vadd.f32 %v5189_v40, %v3510_v7 }
 0x1ff   : > { %v3085_v8 = vpack.c.bf16 %v2520_v15, %v2519_v43  ;;  %v3780_v37 = vadd.f32 %v5032_v27, %v2361_v12  ;;  %v3692_v57 = vpop.f32.mrb[94].mxu1 }
 0x200   : > { %3146 = vst [vmem:[%s5060_s9 + $0x28] sm:$0xff] %v3090_v28   ;;  %v3511_v34 = vpop.f32.mrb[124].mxu0  ;;  %v2493_v31 = vadd.f32 %v3776_v46, %v5042_v39  ;;  %v3784_v38 = vadd.f32 %v5045_v35, %v3692_v57  ;;  %v2364_v59 = vpop.f32.mrb[95].mxu1 }
 0x201   : > { %3145 = vst [vmem:[%s5060_s9 + $0x20] sm:$0xff] %v3085_v8   ;;  %v3512_v2 = vpop.f32.mrb[125].mxu0  ;;  %v2491_v29 = vadd.f32 %v3780_v37, %v5042_v39  ;;  %v3788_v30 = vadd.f32 %v5034_v10, %v2364_v59 }
 0x202   : > { %v3513_v42 = vadd.f32 %v3512_v2, %v3511_v34  ;;  %v3514_v26 = vpop.f32.mrb[126].mxu0  ;;  %v2494_v33 = vadd.f32 %v3784_v38, %v5042_v39  ;;  %v2525_v23 = vmax.f32 %v2493_v31, 0.0 }
 0x203   : > { %v3515_v3 = vpop.f32.mrb[127].mxu0  ;;  %v2492_v27 = vadd.f32 %v3788_v30, %v5042_v39  ;;  %v2523_v49 = vmax.f32 %v2491_v29, 0.0 }
 0x204   : > { %v2526_v19 = vmax.f32 %v2494_v33, 0.0  ;;  %v3516_v21 = vadd.f32 %v3515_v3, %v3514_v26  ;;  %v3802_v35 = vadd.f32 %v4921_v18, %v3513_v42 }
 0x205   : > { %v2524_v1 = vmax.f32 %v2492_v27, 0.0  ;;  %v3695_v14 = vpop.f32.mrb[0].mxu1 }
 0x206   : > { %v3100_v56 = vpack.c.bf16 %v2526_v19, %v2525_v23  ;;  %v3791_v54 = vadd.f32 %v3790_v47, %v3695_v14  ;;  %v2377_v10 = vpop.f32.mrb[1].mxu1  ;;  %v3808_v36 = vadd.f32 %v4925_v48, %v3516_v21 }
 0x207   : > { %v3095_v41 = vpack.c.bf16 %v2524_v1, %v2523_v49  ;;  %v3794_v55 = vadd.f32 %v5053_v53, %v2377_v10  ;;  %v3696_v13 = vpop.f32.mrb[2].mxu1 }
 0x208   : > { %3148 = vst [vmem:[%s5060_s9 + $0x38] sm:$0xff] %v3100_v56   ;;  %v3517_v20 = vpop.f32.mrb[128].mxu0  ;;  %v2497_v61 = vadd.f32 %v3791_v54, %v5042_v39  ;;  %v3797_v51 = vadd.f32 %v5077_v58, %v3696_v13  ;;  %v2380_v18 = vpop.f32.mrb[3].mxu1 }
 0x209   : > { %3147 = vst [vmem:[%s5060_s9 + $0x30] sm:$0xff] %v3095_v41   ;;  %v3518_v24 = vpop.f32.mrb[129].mxu0  ;;  %v2495_v52 = vadd.f32 %v3794_v55, %v5042_v39  ;;  %v3800_v47 = vadd.f32 %v5063_v16, %v2380_v18 }
 0x20a   : > { %v3519_v5 = vadd.f32 %v3518_v24, %v3517_v20  ;;  %v3520_v45 = vpop.f32.mrb[130].mxu0  ;;  %v2498_v48 = vadd.f32 %v3797_v51, %v5042_v39  ;;  %v2529_v9 = vmax.f32 %v2497_v61, 0.0 }
 0x20b   : > { %v3521_v63 = vpop.f32.mrb[131].mxu0  ;;  %v2496_v53 = vadd.f32 %v3800_v47, %v5042_v39  ;;  %v2527_v43 = vmax.f32 %v2495_v52, 0.0 }
 0x20c   : > { %v2530_v7 = vmax.f32 %v2498_v48, 0.0  ;;  %v3522_v4 = vadd.f32 %v3521_v63, %v3520_v45  ;;  %v3817_v58 = vadd.f32 %v4930_v25, %v3519_v5 }
 0x20d   : > { %v2528_v15 = vmax.f32 %v2496_v53, 0.0  ;;  %v3699_v32 = vpop.f32.mrb[4].mxu1 }
 0x20e   : > { %v3110_v28 = vpack.c.bf16 %v2530_v7, %v2529_v9  ;;  %v3803_v46 = vadd.f32 %v3802_v35, %v3699_v32  ;;  %v2393_v16 = vpop.f32.mrb[5].mxu1  ;;  %v3823_v12 = vadd.f32 %v4937_v6, %v3522_v4 }
 0x20f   : > { %v3105_v40 = vpack.c.bf16 %v2528_v15, %v2527_v43  ;;  %v3806_v8 = vadd.f32 %v5089_v22, %v2393_v16  ;;  %v3700_v37 = vpop.f32.mrb[6].mxu1 }
 0x210   : > { %3150 = vst [vmem:[%s5060_s9 + $0x48] sm:$0xff] %v3110_v28   ;;  %v3523_v57 = vpop.f32.mrb[132].mxu0  ;;  %v2501_v34 = vadd.f32 %v3803_v46, %v5042_v39  ;;  %v3809_v31 = vadd.f32 %v3808_v36, %v3700_v37  ;;  %v2396_v38 = vpop.f32.mrb[7].mxu1 }
 0x211   : > { %3149 = vst [vmem:[%s5060_s9 + $0x40] sm:$0xff] %v3105_v40   ;;  %v3524_v25 = vpop.f32.mrb[133].mxu0  ;;  %v2499_v59 = vadd.f32 %v3806_v8, %v5042_v39  ;;  %v3812_v2 = vadd.f32 %v5093_v11, %v2396_v38 }
 0x212   : > { %v3525_v29 = vadd.f32 %v3524_v25, %v3523_v57  ;;  %v3526_v30 = vpop.f32.mrb[134].mxu0  ;;  %v2502_v6 = vadd.f32 %v3809_v31, %v5042_v39  ;;  %v2533_v26 = vmax.f32 %v2501_v34, 0.0 }
 0x213   : > { %v3527_v42 = vpop.f32.mrb[135].mxu0  ;;  %v2500_v22 = vadd.f32 %v3812_v2, %v5042_v39  ;;  %v2531_v23 = vmax.f32 %v2499_v59, 0.0 }
 0x214   : > { %v2534_v33 = vmax.f32 %v2502_v6, 0.0  ;;  %v3528_v3 = vadd.f32 %v3527_v42, %v3526_v30  ;;  %v3814_v27 = vadd.f32 %v4950_v0, %v3525_v29 }
 0x215   : > { %v2532_v19 = vmax.f32 %v2500_v22, 0.0  ;;  %v3703_v21 = vpop.f32.mrb[8].mxu1 }
 0x216   : > { %v3120_v35 = vpack.c.bf16 %v2534_v33, %v2533_v26  ;;  %v3815_v49 = vadd.f32 %v3814_v27, %v3703_v21  ;;  %v2409_v11 = vpop.f32.mrb[9].mxu1  ;;  %v3820_v1 = vadd.f32 %v4958_v50, %v3528_v3 }
 0x217   : > { %v3115_v14 = vpack.c.bf16 %v2532_v19, %v2531_v23  ;;  %v3818_v56 = vadd.f32 %v3817_v58, %v2409_v11  ;;  %v3704_v54 = vpop.f32.mrb[10].mxu1 }
 0x218   : > { %3152 = vst [vmem:[%s5060_s9 + $0x58] sm:$0xff] %v3120_v35   ;;  %v3529_v10 = vpop.f32.mrb[136].mxu0  ;;  %v2505_v36 = vadd.f32 %v3815_v49, %v5042_v39  ;;  %v3821_v41 = vadd.f32 %v3820_v1, %v3704_v54  ;;  %v2412_v55 = vpop.f32.mrb[11].mxu1 }
 0x219   : > { %3151 = vst [vmem:[%s5060_s9 + $0x50] sm:$0xff] %v3115_v14   ;;  %v3530_v0 = vpop.f32.mrb[137].mxu0  ;;  %v2503_v13 = vadd.f32 %v3818_v56, %v5042_v39  ;;  %v3824_v20 = vadd.f32 %v3823_v12, %v2412_v55 }
 0x21a   : > { %v3531_v61 = vadd.f32 %v3530_v0, %v3529_v10  ;;  %v3532_v51 = vpop.f32.mrb[138].mxu0  ;;  %v2506_v18 = vadd.f32 %v3821_v41, %v5042_v39  ;;  %v2537_v52 = vmax.f32 %v2505_v36, 0.0 }
 0x21b   : > { %v3533_v50 = vpop.f32.mrb[139].mxu0  ;;  %v2504_v24 = vadd.f32 %v3824_v20, %v5042_v39  ;;  %v2535_v48 = vmax.f32 %v2503_v13, 0.0 }
 0x21c   : > { %v2538_v47 = vmax.f32 %v2506_v18, 0.0  ;;  %v3534_v5 = vadd.f32 %v3533_v50, %v3532_v51  ;;  %v3829_v45 = vadd.f32 %v4972_v60, %v3531_v61 }
 0x21d   : > { %v2536_v63 = vmax.f32 %v2504_v24, 0.0  ;;  %v3707_v53 = vpop.f32.mrb[12].mxu1 }
 0x21e   : > { %v3130_v9 = vpack.c.bf16 %v2538_v47, %v2537_v52  ;;  %v2425_v7 = vpop.f32.mrb[13].mxu1  ;;  %v3835_v4 = vadd.f32 %v4980_v17, %v3534_v5 }
 0x21f   : > { %v3125_v58 = vpack.c.bf16 %v2536_v63, %v2535_v48  ;;  %v3830_v43 = vadd.f32 %v3829_v45, %v2425_v7  ;;  %v3708_v15 = vpop.f32.mrb[14].mxu1 }
 0x220   : > { %3154 = vst [vmem:[%s5060_s9 + $0x68] sm:$0xff] %v3130_v9   ;;  %v3535_v32 = vpop.f32.mrb[140].mxu0  ;;  %v2428_v28 = vpop.f32.mrb[15].mxu1 }
 0x221   : > { %3153 = vst [vmem:[%s5060_s9 + $0x60] sm:$0xff] %v3125_v58   ;;  %v3536_v46 = vpop.f32.mrb[141].mxu0  ;;  %v2507_v16 = vadd.f32 %v3830_v43, %v5042_v39  ;;  %v3836_v12 = vadd.f32 %v3835_v4, %v2428_v28 }
 0x222   : > { %v3537_v60 = vadd.f32 %v3536_v46, %v3535_v32  ;;  %v3538_v40 = vpop.f32.mrb[142].mxu0 }
 0x223   : > { %v3539_v8 = vpop.f32.mrb[143].mxu0  ;;  %v2508_v37 = vadd.f32 %v3836_v12, %v5042_v39  ;;  %v2539_v34 = vmax.f32 %v2507_v16, 0.0 }
 0x224   : > { %v3826_v17 = vadd.f32 %v4990_v44, %v3537_v60  ;;  %v3540_v57 = vadd.f32 %v3539_v8, %v3538_v40 }
 0x225   : > { %v2540_v31 = vmax.f32 %v2508_v37, 0.0 }
 0x226   : > { %v3827_v38 = vadd.f32 %v3826_v17, %v3707_v53  ;;  %v3832_v25 = vadd.f32 %v4998_v62, %v3540_v57 }
 0x227   : > { %v3135_v59 = vpack.c.bf16 %v2540_v31, %v2539_v34 }
 0x228   : > { %v2509_v2 = vadd.f32 %v3827_v38, %v5042_v39  ;;  %v3833_v29 = vadd.f32 %v3832_v25, %v3708_v15 }
 0x229   : > { %3155 = vst [vmem:[%s5060_s9 + $0x70] sm:$0xff] %v3135_v59  }
 0x22a   : > { %v2510_v30 = vadd.f32 %v3833_v29, %v5042_v39  ;;  %v2541_v6 = vmax.f32 %v2509_v2, 0.0 }
 0x22c   : > { %v2542_v42 = vmax.f32 %v2510_v30, 0.0 }
 0x22e   : > { %v3140_v22 = vpack.c.bf16 %v2542_v42, %v2541_v6 }
 0x230   : > { %3156 = vst [vmem:[%s5060_s9 + $0x78] sm:$0xff] %v3140_v22  }
 0x231 PF: > { %s13_s14 = sadd.s32 1, %s4020_s14   ;;  %s5190_s12 = smov %s4016_s13 }
 0x232   : > { %p10_p5 = scmp.ge.s32.totalorder %s13_s14, 4   ;;  %s5191_s13 = smov %s5193_s15 }
 0x234   :  { %12 = sbr.rel (!%p10_p5) target bundleno = 2 (0x2), region = 67 }

</bundles_post_ra>
